<compile_context>
chip_gen: v6e
topology: v6e:2x2x1
jax: 0.10.0
libtpu: 0.0.40
codegen_flags: <defaults>
</compile_context>

<pallas_src>
import functools

import jax
import jax.numpy as jnp
import numpy as np
from jax.experimental import pallas as pl
from jax.experimental.pallas import tpu as pltpu

# Scoped-VMEM budget: fits v5e/v6e (128 MiB physical) and v7x (64 MiB) with headroom.
_VMEM_LIMIT = 48 * 1024 * 1024


def _cdiv(a, b):
    return (a + b - 1) // b


# ----------------------------------------------------------------------------
# Fused Conv2d (stride 1) + folded BatchNorm (+ residual) (+ ReLU).
# ----------------------------------------------------------------------------
def conv_bn_act(x, w, scale, bias, *, pad, relu, residual=None, row_tile=32,
                out_dtype=jnp.bfloat16):
    """x: (B, H, W, Cin) NHWC. w: (kh, kw, Cin, Cout). stride = 1.
    Computes conv2d -> y*scale + bias -> (+residual) -> (relu).

    Per-row-tile halo slabs are flattened over (rows, cols) so that each kernel
    tap is a contiguous (M, Cin) slice; the flat layout yields kw-1 "garbage"
    columns per row that are cropped in the wrapper (tiny overhead at real
    sizes), keeping the in-kernel math to plain 2D MXU matmuls."""
    B, H, W, Cin = x.shape
    kh, kw, _, Cout = w.shape
    Ho = H + 2 * pad - kh + 1
    Wo = W + 2 * pad - kw + 1
    Wp = W + 2 * pad                      # = Wo + kw - 1

    TH = max(1, min(row_tile, Ho))        # output rows per grid step
    NR = _cdiv(Ho, TH)
    Ho_pad = NR * TH
    extra = Ho_pad - Ho
    RH = TH + kh                          # tile rows + halo + 1 spare row (keeps flat taps in-bounds)
    FLAT = RH * Wp
    M = TH * Wp                           # flat output rows per tile (incl. kw-1 garbage cols/row)

    xp = jnp.pad(x, ((0, 0), (pad, pad + extra + 1), (pad, pad), (0, 0)))
    xp = xp.astype(jnp.bfloat16)
    # Halo row slabs (~1.1x duplication), flattened so taps are contiguous slices.
    slabs = jnp.stack([xp[:, r * TH:r * TH + RH] for r in range(NR)], axis=1)
    slabs = slabs.reshape(B, NR, FLAT, Cin)

    wt = w.reshape(kh * kw, Cin, Cout).astype(jnp.bfloat16)
    s2 = scale.reshape(1, Cout).astype(jnp.float32)
    b2 = bias.reshape(1, Cout).astype(jnp.float32)

    has_res = residual is not None
    if has_res:
        res = jnp.pad(residual, ((0, 0), (0, extra), (0, kw - 1), (0, 0)))
        res = res.reshape(B, NR, M, Cout).astype(jnp.bfloat16)

    def kernel(*refs):
        if has_res:
            x_ref, w_ref, s_ref, bb_ref, r_ref, o_ref = refs
        else:
            x_ref, w_ref, s_ref, bb_ref, o_ref = refs
        acc = jnp.zeros((M, Cout), jnp.float32)
        for ky in range(kh):                      # static unroll over kh*kw taps
            for kx in range(kw):
                off = ky * Wp + kx
                patch = x_ref[pl.ds(off, M), :]                         # (M, Cin) bf16
                acc = acc + jnp.dot(patch, w_ref[ky * kw + kx],
                                    preferred_element_type=jnp.float32)
        y = acc * s_ref[...] + bb_ref[...]                              # fused BatchNorm
        if has_res:
            y = y + r_ref[...].astype(jnp.float32)                      # residual add
        if relu:
            y = jnp.maximum(y, 0.0)
        o_ref[...] = y.astype(o_ref.dtype)

    in_specs = [
        pl.BlockSpec((None, None, FLAT, Cin), lambda b, r: (b, r, 0, 0)),
        pl.BlockSpec((kh * kw, Cin, Cout), lambda b, r: (0, 0, 0)),
        pl.BlockSpec((1, Cout), lambda b, r: (0, 0)),
        pl.BlockSpec((1, Cout), lambda b, r: (0, 0)),
    ]
    args = [slabs, wt, s2, b2]
    if has_res:
        in_specs.append(pl.BlockSpec((None, None, M, Cout), lambda b, r: (b, r, 0, 0)))
        args.append(res)

    flops = 2 * B * NR * M * kh * kw * Cin * Cout
    bytes_accessed = int(slabs.size * 2 + wt.size * 2 + (s2.size + b2.size) * 4
                         + B * NR * M * Cout * 2 * (2 if has_res else 1))

    out = pl.pallas_call(
        kernel,
        out_shape=jax.ShapeDtypeStruct((B, NR, M, Cout), out_dtype),
        grid=(B, NR),
        in_specs=in_specs,
        out_specs=pl.BlockSpec((None, None, M, Cout), lambda b, r: (b, r, 0, 0)),
        compiler_params=pltpu.CompilerParams(
            dimension_semantics=("parallel", "parallel"),
            vmem_limit_bytes=_VMEM_LIMIT),
        cost_estimate=pl.CostEstimate(flops=flops, transcendentals=0,
                                      bytes_accessed=bytes_accessed),
    )(*args)

    # Drop the kw-1 garbage columns / padded rows produced by the flat layout.
    out = out.reshape(B, Ho_pad, Wp, Cout)[:, :Ho, :Wo, :]
    return out


# ----------------------------------------------------------------------------
# ResNet conv1: 7x7 / stride 2 / pad 3, via space-to-depth -> 4x4 / stride 1.
# ----------------------------------------------------------------------------
def conv1_7x7_s2(x, w7, scale, bias, *, relu=True, row_tile=32):
    """Fold the stride-2 into a 2x2 space-to-depth relayout (Cin 3 -> 12) so the
    generic stride-1 kernel is reused; avoids the 49x im2col expansion and the
    K=147 MXU lane padding flagged in review."""
    B, H, W, C = x.shape
    assert C == 3 and H % 2 == 0 and W % 2 == 0
    co = w7.shape[-1]
    xpad = jnp.pad(x, ((0, 0), (3, 3), (3, 3), (0, 0)))
    Hp, Wpp = H + 6, W + 6
    xs = xpad.reshape(B, Hp // 2, 2, Wpp // 2, 2, 3)
    xs = xs.transpose(0, 1, 3, 2, 4, 5).reshape(B, Hp // 2, Wpp // 2, 12)
    wp = jnp.pad(w7, ((0, 1), (0, 1), (0, 0), (0, 0)))            # (8, 8, 3, Cout)
    ws = wp.reshape(4, 2, 4, 2, 3, co).transpose(0, 2, 1, 3, 4, 5).reshape(4, 4, 12, co)
    return conv_bn_act(xs, ws, scale, bias, pad=0, relu=relu, row_tile=row_tile)


# ----------------------------------------------------------------------------
# MaxPool 3x3 / stride 2 / pad 1 (padding value -inf, matching PyTorch).
# ----------------------------------------------------------------------------
def maxpool_3x3_s2(x, *, row_tile=32):
    B, H, W, C = x.shape
    Hm, Wm = H // 2, W // 2
    TH = max(1, min(row_tile, Hm))
    NR = _cdiv(Hm, TH)
    Hm_pad = NR * TH

    xp = jnp.pad(x, ((0, 0), (1, 1), (1, 1), (0, 0)), constant_values=-jnp.inf)
    # Even/odd row+column phases (glue, one pass): each (B, Hm+1, Wm+1, C).
    phases = jnp.stack([xp[:, py::2, px::2, :] for py in (0, 1) for px in (0, 1)],
                       axis=1)                                   # (B, 4, Hm+1, Wm+1, C)
    prows = Hm + 1
    need = Hm_pad + 1
    if need > prows:
        phases = jnp.pad(phases, ((0, 0), (0, 0), (0, need - prows), (0, 0), (0, 0)),
                         constant_values=-jnp.inf)
    slabs = jnp.stack([phases[:, :, r * TH:r * TH + TH + 1] for r in range(NR)],
                      axis=1)                                    # (B, NR, 4, TH+1, Wm+1, C)

    def kernel(p_ref, o_ref):
        ee = p_ref[0]   # row-even / col-even
        eo = p_ref[1]   # row-even / col-odd
        oe = p_ref[2]   # row-odd  / col-even
        oo = p_ref[3]   # row-odd  / col-odd

        def win(a, dy, dx):
            return a[dy:dy + TH, dx:dx + Wm, :]

        v = win(ee, 0, 0)
        for a, dy, dx in ((ee, 0, 1), (ee, 1, 0), (ee, 1, 1),
                          (eo, 0, 0), (eo, 1, 0),
                          (oe, 0, 0), (oe, 0, 1),
                          (oo, 0, 0)):
            v = jnp.maximum(v, win(a, dy, dx))
        o_ref[...] = v

    itm = x.dtype.itemsize
    out = pl.pallas_call(
        kernel,
        out_shape=jax.ShapeDtypeStruct((B, Hm_pad, Wm, C), x.dtype),
        grid=(B, NR),
        in_specs=[pl.BlockSpec((None, None, 4, TH + 1, Wm + 1, C),
                               lambda b, r: (b, r, 0, 0, 0, 0))],
        out_specs=pl.BlockSpec((None, TH, Wm, C), lambda b, r: (b, r, 0, 0)),
        compiler_params=pltpu.CompilerParams(
            dimension_semantics=("parallel", "parallel"),
            vmem_limit_bytes=_VMEM_LIMIT),
        cost_estimate=pl.CostEstimate(
            flops=9 * B * Hm_pad * Wm * C, transcendentals=0,
            bytes_accessed=int(slabs.size * itm + B * Hm_pad * Wm * C * itm)),
    )(slabs)
    return out[:, :Hm]


# ----------------------------------------------------------------------------
# Bilinear upsample (align_corners=True) of f1 to f0's size, fused with concat.
# ----------------------------------------------------------------------------
def _bilinear_matrix(out_size, in_size):
    o = np.arange(out_size, dtype=np.float64)
    if out_size > 1 and in_size > 1:
        src = o * (in_size - 1) / (out_size - 1)
    else:
        src = np.zeros((out_size,), dtype=np.float64)
    i0 = np.clip(np.floor(src).astype(np.int64), 0, in_size - 1)
    i1 = np.minimum(i0 + 1, in_size - 1)
    w1 = src - i0
    w0 = 1.0 - w1
    m = np.zeros((out_size, in_size), dtype=np.float64)
    np.add.at(m, (np.arange(out_size), i0), w0)
    np.add.at(m, (np.arange(out_size), i1), w1)
    return m.astype(np.float32)


def upsample_concat(f0, f1, *, row_tile=32, out_dtype=jnp.float32):
    """Writes the final (B, Hf, Wf, 128) latent in one lane-dense pass:
    channels [0:64) = f0, channels [64:128) = bilinear-upsampled f1.
    Row-tiled (grid = (B, row_tiles)); row interpolation uses a per-tile matrix
    block, column interpolation the proven small einsum form."""
    B, Hf, Wf, C0 = f0.shape
    _, Hm, Wm, C1 = f1.shape
    Cout = C0 + C1
    TH = max(1, min(row_tile, Hf))
    NR = _cdiv(Hf, TH)
    Hf_pad = NR * TH

    ry = _bilinear_matrix(Hf, Hm)                               # (Hf, Hm)
    ry = np.pad(ry, ((0, Hf_pad - Hf), (0, 0))).reshape(NR, TH, Hm)
    rx = _bilinear_matrix(Wf, Wm)                               # (Wf, Wm)
    ry = jnp.asarray(ry, jnp.bfloat16)
    rx = jnp.asarray(rx, jnp.bfloat16)

    f0p = jnp.pad(f0, ((0, 0), (0, Hf_pad - Hf), (0, 0), (0, 0))).astype(jnp.bfloat16)
    f1b = f1.astype(jnp.bfloat16)

    def kernel(f0_ref, f1_ref, ry_ref, rx_ref, o_ref):
        ry_t = ry_ref[...]                                             # (TH, Hm)
        f1v = f1_ref[...]                                              # (Hm, Wm, C1)
        t = jnp.einsum("th,hwc->twc", ry_t, f1v,
                       preferred_element_type=jnp.float32)             # (TH, Wm, C1)
        up = jnp.einsum("vw,twc->tvc", rx_ref[...], t.astype(jnp.bfloat16),
                        preferred_element_type=jnp.float32)            # (TH, Wf, C1)
        o_ref[:, :, 0:C0] = f0_ref[...].astype(o_ref.dtype)
        o_ref[:, :, C0:Cout] = up.astype(o_ref.dtype)

    out = pl.pallas_call(
        kernel,
        out_shape=jax.ShapeDtypeStruct((B, Hf_pad, Wf, Cout), out_dtype),
        grid=(B, NR),
        in_specs=[
            pl.BlockSpec((None, TH, Wf, C0), lambda b, r: (b, r, 0, 0)),
            pl.BlockSpec((None, Hm, Wm, C1), lambda b, r: (b, 0, 0, 0)),
            pl.BlockSpec((None, TH, Hm), lambda b, r: (r, 0, 0)),
            pl.BlockSpec((Wf, Wm), lambda b, r: (0, 0)),
        ],
        out_specs=pl.BlockSpec((None, TH, Wf, Cout), lambda b, r: (b, r, 0, 0)),
        compiler_params=pltpu.CompilerParams(
            dimension_semantics=("parallel", "parallel"),
            vmem_limit_bytes=_VMEM_LIMIT),
        cost_estimate=pl.CostEstimate(
            flops=2 * B * (Hf_pad * Wm * C1 * Hm + Hf_pad * Wf * C1 * Wm),
            transcendentals=0,
            bytes_accessed=int((f0p.size + f1b.size) * 2 + B * Hf_pad * Wf * Cout * 4)),
    )(f0p, f1b, ry, rx)
    return out[:, :Hf]


# ----------------------------------------------------------------------------
# Parameter construction (deterministic; eval-mode BatchNorm folded to scale/bias).
# ----------------------------------------------------------------------------
def _fold_bn(gamma, beta, mean, var, eps=1e-5):
    scale = gamma * jax.lax.rsqrt(var + eps)
    bias = beta - mean * scale
    return scale, bias


def init_params(key):
    def conv_w(k, kh, kw, cin, cout):
        fan_in = kh * kw * cin
        return jax.random.normal(k, (kh, kw, cin, cout), jnp.float32) * np.sqrt(2.0 / fan_in)

    def bn_params(k, c):
        k1, k2, k3, k4 = jax.random.split(k, 4)
        gamma = 1.0 + 0.1 * jax.random.normal(k1, (c,), jnp.float32)
        beta = 0.1 * jax.random.normal(k2, (c,), jnp.float32)
        mean = 0.1 * jax.random.normal(k3, (c,), jnp.float32)
        var = 0.5 + jax.random.uniform(k4, (c,), jnp.float32)
        return _fold_bn(gamma, beta, mean, var)

    ks = jax.random.split(key, 10)
    params = {}
    params["conv1_w"] = conv_w(ks[0], 7, 7, 3, 64)               # resnet conv1: 7x7/s2/p3
    params["bn1_scale"], params["bn1_bias"] = bn_params(ks[1], 64)

    # layer1: two BasicBlocks (64 -> 64), stride 1, no downsample
    layer1 = []
    for i in range(2):
        kb = jax.random.split(ks[2 + i], 4)
        s1, b1 = bn_params(kb[1], 64)
        s2, b2 = bn_params(kb[3], 64)
        layer1.append(dict(
            w1=conv_w(kb[0], 3, 3, 64, 64), s1=s1, b1=b1,
            w2=conv_w(kb[2], 3, 3, 64, 64), s2=s2, b2=b2,
        ))
    params["layer1"] = layer1
    return params


# ----------------------------------------------------------------------------
# SpatialEncoder.forward
# ----------------------------------------------------------------------------
@functools.partial(jax.jit, static_argnames=("row_tile",))
def spatial_encoder_forward(x_nchw, params, row_tile=32):
    """x_nchw: (B, 3, H, W) f32 -> latent (B, 128, H/2, W/2) f32, latent_scaling (2,)."""
    # image_scale == 1.0 so the F.interpolate pre-scaling branch is a no-op.
    # TODO(synk): image_scale != 1.0 ('area'/'bilinear' pre-resize) not implemented.
    x = jnp.transpose(x_nchw, (0, 2, 3, 1))                      # NCHW -> NHWC

    # conv1 + bn1 + relu -> latents[0]  (B, H/2, W/2, 64)  (bf16 internal)
    f0 = conv1_7x7_s2(x, params["conv1_w"], params["bn1_scale"], params["bn1_bias"],
                      relu=True, row_tile=row_tile)

    # maxpool (use_first_pool=True) then layer1 -> latents[1] (B, H/4, W/4, 64)
    y = maxpool_3x3_s2(f0, row_tile=row_tile)
    for blk in params["layer1"]:
        identity = y
        h = conv_bn_act(y, blk["w1"], blk["s1"], blk["b1"], pad=1, relu=True,
                        row_tile=row_tile)
        y = conv_bn_act(h, blk["w2"], blk["s2"], blk["b2"], pad=1, relu=True,
                        residual=identity, row_tile=row_tile)
    f1 = y

    # Upsample latents[1] to latents[0] size and concat -> lane-dense 128-ch latent.
    latent_nhwc = upsample_concat(f0, f1, row_tile=row_tile)     # (B, H/2, W/2, 128) f32
    latent = jnp.transpose(latent_nhwc, (0, 3, 1, 2))            # back to NCHW

    ls = jnp.array([latent.shape[-1], latent.shape[-2]], jnp.float32)
    latent_scaling = ls / (ls - 1.0) * 2.0
    # TODO(synk): index() / F.grid_sample pixel-aligned lookup is not part of forward().
    return latent, latent_scaling


if __name__ == "__main__":
    key = jax.random.PRNGKey(0)
    k_x, k_p = jax.random.split(key)
    B, C, H, W = 2, 3, 16, 16
    x = jax.random.normal(k_x, (B, C, H, W), jnp.float32)
    params = init_params(k_p)

    # row_tile=4 exercises the multi-row-tile (B, NR>1) grid path even at this size.
    latent, latent_scaling = spatial_encoder_forward(x, params, row_tile=4)
    latent = jax.block_until_ready(latent)
    latent_scaling = jax.block_until_ready(latent_scaling)

    assert latent.shape == (B, 128, H // 2, W // 2), latent.shape
    assert latent_scaling.shape == (2,)
    assert bool(jnp.all(jnp.isfinite(latent)))
    print("KERNEL_OK")
</pallas_src>

<mosaic_0001>
module attributes {stable_mosaic.version = 11 : i64} {
  func.func @kernel(%arg0: i32, %arg1: i32, %arg2: memref<1x1x88x12xbf16, #tpu.memory_space<vmem>>, %arg3: memref<16x12x64xbf16, #tpu.memory_space<vmem>>, %arg4: memref<1x64xf32, #tpu.memory_space<vmem>>, %arg5: memref<1x64xf32, #tpu.memory_space<vmem>>, %arg6: memref<1x1x44x64xbf16, #tpu.memory_space<vmem>>) attributes {dimension_semantics = [#tpu.dimension_semantics<parallel>, #tpu.dimension_semantics<parallel>], iteration_bounds = array<i64: 2, 2>, scalar_prefetch = 0 : i64, scratch_operands = 0 : i64, tpu.core_type = #tpu.core_type<tc>, window_params = [{transform_indices = @transform_0, window_bounds = array<i64: 1, 1, 88, 12>}, {pipeline_mode = #tpu.pipeline_mode<synchronous>, transform_indices = @transform_1, window_bounds = array<i64: 16, 12, 64>}, {pipeline_mode = #tpu.pipeline_mode<synchronous>, transform_indices = @transform_2, window_bounds = array<i64: 1, 64>}, {pipeline_mode = #tpu.pipeline_mode<synchronous>, transform_indices = @transform_3, window_bounds = array<i64: 1, 64>}, {transform_indices = @transform_4, window_bounds = array<i64: 1, 1, 44, 64>}]} {
    %cst = arith.constant 0.000000e+00 : f32
    %0 = vector.broadcast %cst : f32 to vector<44x64xf32>
    %c0 = arith.constant 0 : index
    %c0_0 = arith.constant 0 : index
    %c0_1 = arith.constant 0 : index
    %c0_2 = arith.constant 0 : index
    %1 = vector.load %arg2[%c0, %c0_0, %c0_1, %c0_2] : memref<1x1x88x12xbf16, #tpu.memory_space<vmem>>, vector<1x1x44x12xbf16>
    %2 = vector.shape_cast %1 : vector<1x1x44x12xbf16> to vector<44x12xbf16>
    %c0_3 = arith.constant 0 : index
    %c0_4 = arith.constant 0 : index
    %c0_5 = arith.constant 0 : index
    %3 = vector.load %arg3[%c0_3, %c0_4, %c0_5] : memref<16x12x64xbf16, #tpu.memory_space<vmem>>, vector<1x12x64xbf16>
    %4 = vector.shape_cast %3 : vector<1x12x64xbf16> to vector<12x64xbf16>
    %cst_6 = arith.constant dense<0.000000e+00> : vector<44x64xf32>
    %5 = tpu.matmul %2, %4, %cst_6 {dimension_numbers = #tpu.dot_dimension_numbers<[1], [0], [0], [1], [0, 0, 1, 1], [], []>} : vector<44x12xbf16>, vector<12x64xbf16>, vector<44x64xf32> -> vector<44x64xf32>
    %6 = arith.addf %0, %5 : vector<44x64xf32>
    %c0_7 = arith.constant 0 : index
    %c0_8 = arith.constant 0 : index
    %c1 = arith.constant 1 : index
    %c0_9 = arith.constant 0 : index
    %7 = vector.load %arg2[%c0_7, %c0_8, %c1, %c0_9] : memref<1x1x88x12xbf16, #tpu.memory_space<vmem>>, vector<1x1x44x12xbf16>
    %8 = vector.shape_cast %7 : vector<1x1x44x12xbf16> to vector<44x12xbf16>
    %c1_10 = arith.constant 1 : index
    %c0_11 = arith.constant 0 : index
    %c0_12 = arith.constant 0 : index
    %9 = vector.load %arg3[%c1_10, %c0_11, %c0_12] : memref<16x12x64xbf16, #tpu.memory_space<vmem>>, vector<1x12x64xbf16>
    %10 = vector.shape_cast %9 : vector<1x12x64xbf16> to vector<12x64xbf16>
    %cst_13 = arith.constant dense<0.000000e+00> : vector<44x64xf32>
    %11 = tpu.matmul %8, %10, %cst_13 {dimension_numbers = #tpu.dot_dimension_numbers<[1], [0], [0], [1], [0, 0, 1, 1], [], []>} : vector<44x12xbf16>, vector<12x64xbf16>, vector<44x64xf32> -> vector<44x64xf32>
    %12 = arith.addf %6, %11 : vector<44x64xf32>
    %c0_14 = arith.constant 0 : index
    %c0_15 = arith.constant 0 : index
    %c2 = arith.constant 2 : index
    %c0_16 = arith.constant 0 : index
    %13 = vector.load %arg2[%c0_14, %c0_15, %c2, %c0_16] : memref<1x1x88x12xbf16, #tpu.memory_space<vmem>>, vector<1x1x44x12xbf16>
    %14 = vector.shape_cast %13 : vector<1x1x44x12xbf16> to vector<44x12xbf16>
    %c2_17 = arith.constant 2 : index
    %c0_18 = arith.constant 0 : index
    %c0_19 = arith.constant 0 : index
    %15 = vector.load %arg3[%c2_17, %c0_18, %c0_19] : memref<16x12x64xbf16, #tpu.memory_space<vmem>>, vector<1x12x64xbf16>
    %16 = vector.shape_cast %15 : vector<1x12x64xbf16> to vector<12x64xbf16>
    %cst_20 = arith.constant dense<0.000000e+00> : vector<44x64xf32>
    %17 = tpu.matmul %14, %16, %cst_20 {dimension_numbers = #tpu.dot_dimension_numbers<[1], [0], [0], [1], [0, 0, 1, 1], [], []>} : vector<44x12xbf16>, vector<12x64xbf16>, vector<44x64xf32> -> vector<44x64xf32>
    %18 = arith.addf %12, %17 : vector<44x64xf32>
    %c0_21 = arith.constant 0 : index
    %c0_22 = arith.constant 0 : index
    %c3 = arith.constant 3 : index
    %c0_23 = arith.constant 0 : index
    %19 = vector.load %arg2[%c0_21, %c0_22, %c3, %c0_23] : memref<1x1x88x12xbf16, #tpu.memory_space<vmem>>, vector<1x1x44x12xbf16>
    %20 = vector.shape_cast %19 : vector<1x1x44x12xbf16> to vector<44x12xbf16>
    %c3_24 = arith.constant 3 : index
    %c0_25 = arith.constant 0 : index
    %c0_26 = arith.constant 0 : index
    %21 = vector.load %arg3[%c3_24, %c0_25, %c0_26] : memref<16x12x64xbf16, #tpu.memory_space<vmem>>, vector<1x12x64xbf16>
    %22 = vector.shape_cast %21 : vector<1x12x64xbf16> to vector<12x64xbf16>
    %cst_27 = arith.constant dense<0.000000e+00> : vector<44x64xf32>
    %23 = tpu.matmul %20, %22, %cst_27 {dimension_numbers = #tpu.dot_dimension_numbers<[1], [0], [0], [1], [0, 0, 1, 1], [], []>} : vector<44x12xbf16>, vector<12x64xbf16>, vector<44x64xf32> -> vector<44x64xf32>
    %24 = arith.addf %18, %23 : vector<44x64xf32>
    %c0_28 = arith.constant 0 : index
    %c0_29 = arith.constant 0 : index
    %c11 = arith.constant 11 : index
    %c0_30 = arith.constant 0 : index
    %25 = vector.load %arg2[%c0_28, %c0_29, %c11, %c0_30] : memref<1x1x88x12xbf16, #tpu.memory_space<vmem>>, vector<1x1x44x12xbf16>
    %26 = vector.shape_cast %25 : vector<1x1x44x12xbf16> to vector<44x12xbf16>
    %c4 = arith.constant 4 : index
    %c0_31 = arith.constant 0 : index
    %c0_32 = arith.constant 0 : index
    %27 = vector.load %arg3[%c4, %c0_31, %c0_32] : memref<16x12x64xbf16, #tpu.memory_space<vmem>>, vector<1x12x64xbf16>
    %28 = vector.shape_cast %27 : vector<1x12x64xbf16> to vector<12x64xbf16>
    %cst_33 = arith.constant dense<0.000000e+00> : vector<44x64xf32>
    %29 = tpu.matmul %26, %28, %cst_33 {dimension_numbers = #tpu.dot_dimension_numbers<[1], [0], [0], [1], [0, 0, 1, 1], [], []>} : vector<44x12xbf16>, vector<12x64xbf16>, vector<44x64xf32> -> vector<44x64xf32>
    %30 = arith.addf %24, %29 : vector<44x64xf32>
    %c0_34 = arith.constant 0 : index
    %c0_35 = arith.constant 0 : index
    %c12 = arith.constant 12 : index
    %c0_36 = arith.constant 0 : index
    %31 = vector.load %arg2[%c0_34, %c0_35, %c12, %c0_36] : memref<1x1x88x12xbf16, #tpu.memory_space<vmem>>, vector<1x1x44x12xbf16>
    %32 = vector.shape_cast %31 : vector<1x1x44x12xbf16> to vector<44x12xbf16>
    %c5 = arith.constant 5 : index
    %c0_37 = arith.constant 0 : index
    %c0_38 = arith.constant 0 : index
    %33 = vector.load %arg3[%c5, %c0_37, %c0_38] : memref<16x12x64xbf16, #tpu.memory_space<vmem>>, vector<1x12x64xbf16>
    %34 = vector.shape_cast %33 : vector<1x12x64xbf16> to vector<12x64xbf16>
    %cst_39 = arith.constant dense<0.000000e+00> : vector<44x64xf32>
    %35 = tpu.matmul %32, %34, %cst_39 {dimension_numbers = #tpu.dot_dimension_numbers<[1], [0], [0], [1], [0, 0, 1, 1], [], []>} : vector<44x12xbf16>, vector<12x64xbf16>, vector<44x64xf32> -> vector<44x64xf32>
    %36 = arith.addf %30, %35 : vector<44x64xf32>
    %c0_40 = arith.constant 0 : index
    %c0_41 = arith.constant 0 : index
    %c13 = arith.constant 13 : index
    %c0_42 = arith.constant 0 : index
    %37 = vector.load %arg2[%c0_40, %c0_41, %c13, %c0_42] : memref<1x1x88x12xbf16, #tpu.memory_space<vmem>>, vector<1x1x44x12xbf16>
    %38 = vector.shape_cast %37 : vector<1x1x44x12xbf16> to vector<44x12xbf16>
    %c6 = arith.constant 6 : index
    %c0_43 = arith.constant 0 : index
    %c0_44 = arith.constant 0 : index
    %39 = vector.load %arg3[%c6, %c0_43, %c0_44] : memref<16x12x64xbf16, #tpu.memory_space<vmem>>, vector<1x12x64xbf16>
    %40 = vector.shape_cast %39 : vector<1x12x64xbf16> to vector<12x64xbf16>
    %cst_45 = arith.constant dense<0.000000e+00> : vector<44x64xf32>
    %41 = tpu.matmul %38, %40, %cst_45 {dimension_numbers = #tpu.dot_dimension_numbers<[1], [0], [0], [1], [0, 0, 1, 1], [], []>} : vector<44x12xbf16>, vector<12x64xbf16>, vector<44x64xf32> -> vector<44x64xf32>
    %42 = arith.addf %36, %41 : vector<44x64xf32>
    %c0_46 = arith.constant 0 : index
    %c0_47 = arith.constant 0 : index
    %c14 = arith.constant 14 : index
    %c0_48 = arith.constant 0 : index
    %43 = vector.load %arg2[%c0_46, %c0_47, %c14, %c0_48] : memref<1x1x88x12xbf16, #tpu.memory_space<vmem>>, vector<1x1x44x12xbf16>
    %44 = vector.shape_cast %43 : vector<1x1x44x12xbf16> to vector<44x12xbf16>
    %c7 = arith.constant 7 : index
    %c0_49 = arith.constant 0 : index
    %c0_50 = arith.constant 0 : index
    %45 = vector.load %arg3[%c7, %c0_49, %c0_50] : memref<16x12x64xbf16, #tpu.memory_space<vmem>>, vector<1x12x64xbf16>
    %46 = vector.shape_cast %45 : vector<1x12x64xbf16> to vector<12x64xbf16>
    %cst_51 = arith.constant dense<0.000000e+00> : vector<44x64xf32>
    %47 = tpu.matmul %44, %46, %cst_51 {dimension_numbers = #tpu.dot_dimension_numbers<[1], [0], [0], [1], [0, 0, 1, 1], [], []>} : vector<44x12xbf16>, vector<12x64xbf16>, vector<44x64xf32> -> vector<44x64xf32>
    %48 = arith.addf %42, %47 : vector<44x64xf32>
    %c0_52 = arith.constant 0 : index
    %c0_53 = arith.constant 0 : index
    %c22 = arith.constant 22 : index
    %c0_54 = arith.constant 0 : index
    %49 = vector.load %arg2[%c0_52, %c0_53, %c22, %c0_54] : memref<1x1x88x12xbf16, #tpu.memory_space<vmem>>, vector<1x1x44x12xbf16>
    %50 = vector.shape_cast %49 : vector<1x1x44x12xbf16> to vector<44x12xbf16>
    %c8 = arith.constant 8 : index
    %c0_55 = arith.constant 0 : index
    %c0_56 = arith.constant 0 : index
    %51 = vector.load %arg3[%c8, %c0_55, %c0_56] : memref<16x12x64xbf16, #tpu.memory_space<vmem>>, vector<1x12x64xbf16>
    %52 = vector.shape_cast %51 : vector<1x12x64xbf16> to vector<12x64xbf16>
    %cst_57 = arith.constant dense<0.000000e+00> : vector<44x64xf32>
    %53 = tpu.matmul %50, %52, %cst_57 {dimension_numbers = #tpu.dot_dimension_numbers<[1], [0], [0], [1], [0, 0, 1, 1], [], []>} : vector<44x12xbf16>, vector<12x64xbf16>, vector<44x64xf32> -> vector<44x64xf32>
    %54 = arith.addf %48, %53 : vector<44x64xf32>
    %c0_58 = arith.constant 0 : index
    %c0_59 = arith.constant 0 : index
    %c23 = arith.constant 23 : index
    %c0_60 = arith.constant 0 : index
    %55 = vector.load %arg2[%c0_58, %c0_59, %c23, %c0_60] : memref<1x1x88x12xbf16, #tpu.memory_space<vmem>>, vector<1x1x44x12xbf16>
    %56 = vector.shape_cast %55 : vector<1x1x44x12xbf16> to vector<44x12xbf16>
    %c9 = arith.constant 9 : index
    %c0_61 = arith.constant 0 : index
    %c0_62 = arith.constant 0 : index
    %57 = vector.load %arg3[%c9, %c0_61, %c0_62] : memref<16x12x64xbf16, #tpu.memory_space<vmem>>, vector<1x12x64xbf16>
    %58 = vector.shape_cast %57 : vector<1x12x64xbf16> to vector<12x64xbf16>
    %cst_63 = arith.constant dense<0.000000e+00> : vector<44x64xf32>
    %59 = tpu.matmul %56, %58, %cst_63 {dimension_numbers = #tpu.dot_dimension_numbers<[1], [0], [0], [1], [0, 0, 1, 1], [], []>} : vector<44x12xbf16>, vector<12x64xbf16>, vector<44x64xf32> -> vector<44x64xf32>
    %60 = arith.addf %54, %59 : vector<44x64xf32>
    %c0_64 = arith.constant 0 : index
    %c0_65 = arith.constant 0 : index
    %c24 = arith.constant 24 : index
    %c0_66 = arith.constant 0 : index
    %61 = vector.load %arg2[%c0_64, %c0_65, %c24, %c0_66] : memref<1x1x88x12xbf16, #tpu.memory_space<vmem>>, vector<1x1x44x12xbf16>
    %62 = vector.shape_cast %61 : vector<1x1x44x12xbf16> to vector<44x12xbf16>
    %c10 = arith.constant 10 : index
    %c0_67 = arith.constant 0 : index
    %c0_68 = arith.constant 0 : index
    %63 = vector.load %arg3[%c10, %c0_67, %c0_68] : memref<16x12x64xbf16, #tpu.memory_space<vmem>>, vector<1x12x64xbf16>
    %64 = vector.shape_cast %63 : vector<1x12x64xbf16> to vector<12x64xbf16>
    %cst_69 = arith.constant dense<0.000000e+00> : vector<44x64xf32>
    %65 = tpu.matmul %62, %64, %cst_69 {dimension_numbers = #tpu.dot_dimension_numbers<[1], [0], [0], [1], [0, 0, 1, 1], [], []>} : vector<44x12xbf16>, vector<12x64xbf16>, vector<44x64xf32> -> vector<44x64xf32>
    %66 = arith.addf %60, %65 : vector<44x64xf32>
    %c0_70 = arith.constant 0 : index
    %c0_71 = arith.constant 0 : index
    %c25 = arith.constant 25 : index
    %c0_72 = arith.constant 0 : index
    %67 = vector.load %arg2[%c0_70, %c0_71, %c25, %c0_72] : memref<1x1x88x12xbf16, #tpu.memory_space<vmem>>, vector<1x1x44x12xbf16>
    %68 = vector.shape_cast %67 : vector<1x1x44x12xbf16> to vector<44x12xbf16>
    %c11_73 = arith.constant 11 : index
    %c0_74 = arith.constant 0 : index
    %c0_75 = arith.constant 0 : index
    %69 = vector.load %arg3[%c11_73, %c0_74, %c0_75] : memref<16x12x64xbf16, #tpu.memory_space<vmem>>, vector<1x12x64xbf16>
    %70 = vector.shape_cast %69 : vector<1x12x64xbf16> to vector<12x64xbf16>
    %cst_76 = arith.constant dense<0.000000e+00> : vector<44x64xf32>
    %71 = tpu.matmul %68, %70, %cst_76 {dimension_numbers = #tpu.dot_dimension_numbers<[1], [0], [0], [1], [0, 0, 1, 1], [], []>} : vector<44x12xbf16>, vector<12x64xbf16>, vector<44x64xf32> -> vector<44x64xf32>
    %72 = arith.addf %66, %71 : vector<44x64xf32>
    %c0_77 = arith.constant 0 : index
    %c0_78 = arith.constant 0 : index
    %c33 = arith.constant 33 : index
    %c0_79 = arith.constant 0 : index
    %73 = vector.load %arg2[%c0_77, %c0_78, %c33, %c0_79] : memref<1x1x88x12xbf16, #tpu.memory_space<vmem>>, vector<1x1x44x12xbf16>
    %74 = vector.shape_cast %73 : vector<1x1x44x12xbf16> to vector<44x12xbf16>
    %c12_80 = arith.constant 12 : index
    %c0_81 = arith.constant 0 : index
    %c0_82 = arith.constant 0 : index
    %75 = vector.load %arg3[%c12_80, %c0_81, %c0_82] : memref<16x12x64xbf16, #tpu.memory_space<vmem>>, vector<1x12x64xbf16>
    %76 = vector.shape_cast %75 : vector<1x12x64xbf16> to vector<12x64xbf16>
    %cst_83 = arith.constant dense<0.000000e+00> : vector<44x64xf32>
    %77 = tpu.matmul %74, %76, %cst_83 {dimension_numbers = #tpu.dot_dimension_numbers<[1], [0], [0], [1], [0, 0, 1, 1], [], []>} : vector<44x12xbf16>, vector<12x64xbf16>, vector<44x64xf32> -> vector<44x64xf32>
    %78 = arith.addf %72, %77 : vector<44x64xf32>
    %c0_84 = arith.constant 0 : index
    %c0_85 = arith.constant 0 : index
    %c34 = arith.constant 34 : index
    %c0_86 = arith.constant 0 : index
    %79 = vector.load %arg2[%c0_84, %c0_85, %c34, %c0_86] : memref<1x1x88x12xbf16, #tpu.memory_space<vmem>>, vector<1x1x44x12xbf16>
    %80 = vector.shape_cast %79 : vector<1x1x44x12xbf16> to vector<44x12xbf16>
    %c13_87 = arith.constant 13 : index
    %c0_88 = arith.constant 0 : index
    %c0_89 = arith.constant 0 : index
    %81 = vector.load %arg3[%c13_87, %c0_88, %c0_89] : memref<16x12x64xbf16, #tpu.memory_space<vmem>>, vector<1x12x64xbf16>
    %82 = vector.shape_cast %81 : vector<1x12x64xbf16> to vector<12x64xbf16>
    %cst_90 = arith.constant dense<0.000000e+00> : vector<44x64xf32>
    %83 = tpu.matmul %80, %82, %cst_90 {dimension_numbers = #tpu.dot_dimension_numbers<[1], [0], [0], [1], [0, 0, 1, 1], [], []>} : vector<44x12xbf16>, vector<12x64xbf16>, vector<44x64xf32> -> vector<44x64xf32>
    %84 = arith.addf %78, %83 : vector<44x64xf32>
    %c0_91 = arith.constant 0 : index
    %c0_92 = arith.constant 0 : index
    %c35 = arith.constant 35 : index
    %c0_93 = arith.constant 0 : index
    %85 = vector.load %arg2[%c0_91, %c0_92, %c35, %c0_93] : memref<1x1x88x12xbf16, #tpu.memory_space<vmem>>, vector<1x1x44x12xbf16>
    %86 = vector.shape_cast %85 : vector<1x1x44x12xbf16> to vector<44x12xbf16>
    %c14_94 = arith.constant 14 : index
    %c0_95 = arith.constant 0 : index
    %c0_96 = arith.constant 0 : index
    %87 = vector.load %arg3[%c14_94, %c0_95, %c0_96] : memref<16x12x64xbf16, #tpu.memory_space<vmem>>, vector<1x12x64xbf16>
    %88 = vector.shape_cast %87 : vector<1x12x64xbf16> to vector<12x64xbf16>
    %cst_97 = arith.constant dense<0.000000e+00> : vector<44x64xf32>
    %89 = tpu.matmul %86, %88, %cst_97 {dimension_numbers = #tpu.dot_dimension_numbers<[1], [0], [0], [1], [0, 0, 1, 1], [], []>} : vector<44x12xbf16>, vector<12x64xbf16>, vector<44x64xf32> -> vector<44x64xf32>
    %90 = arith.addf %84, %89 : vector<44x64xf32>
    %c0_98 = arith.constant 0 : index
    %c0_99 = arith.constant 0 : index
    %c36 = arith.constant 36 : index
    %c0_100 = arith.constant 0 : index
    %91 = vector.load %arg2[%c0_98, %c0_99, %c36, %c0_100] : memref<1x1x88x12xbf16, #tpu.memory_space<vmem>>, vector<1x1x44x12xbf16>
    %92 = vector.shape_cast %91 : vector<1x1x44x12xbf16> to vector<44x12xbf16>
    %c15 = arith.constant 15 : index
    %c0_101 = arith.constant 0 : index
    %c0_102 = arith.constant 0 : index
    %93 = vector.load %arg3[%c15, %c0_101, %c0_102] : memref<16x12x64xbf16, #tpu.memory_space<vmem>>, vector<1x12x64xbf16>
    %94 = vector.shape_cast %93 : vector<1x12x64xbf16> to vector<12x64xbf16>
    %cst_103 = arith.constant dense<0.000000e+00> : vector<44x64xf32>
    %95 = tpu.matmul %92, %94, %cst_103 {dimension_numbers = #tpu.dot_dimension_numbers<[1], [0], [0], [1], [0, 0, 1, 1], [], []>} : vector<44x12xbf16>, vector<12x64xbf16>, vector<44x64xf32> -> vector<44x64xf32>
    %96 = arith.addf %90, %95 : vector<44x64xf32>
    %c0_104 = arith.constant 0 : index
    %c0_105 = arith.constant 0 : index
    %97 = vector.load %arg4[%c0_104, %c0_105] : memref<1x64xf32, #tpu.memory_space<vmem>>, vector<1x64xf32>
    %98 = vector.broadcast %97 : vector<1x64xf32> to vector<44x64xf32>
    %99 = arith.mulf %96, %98 : vector<44x64xf32>
    %c0_106 = arith.constant 0 : index
    %c0_107 = arith.constant 0 : index
    %100 = vector.load %arg5[%c0_106, %c0_107] : memref<1x64xf32, #tpu.memory_space<vmem>>, vector<1x64xf32>
    %101 = vector.broadcast %100 : vector<1x64xf32> to vector<44x64xf32>
    %102 = arith.addf %99, %101 : vector<44x64xf32>
    %cst_108 = arith.constant 0.000000e+00 : f32
    %103 = vector.broadcast %cst_108 : f32 to vector<44x64xf32>
    %104 = arith.maximumf %102, %103 : vector<44x64xf32>
    %105 = arith.truncf %104 : vector<44x64xf32> to vector<44x64xbf16>
    %c0_109 = arith.constant 0 : index
    %c0_110 = arith.constant 0 : index
    %c0_111 = arith.constant 0 : index
    %c0_112 = arith.constant 0 : index
    %106 = vector.load %arg6[%c0_109, %c0_110, %c0_111, %c0_112] : memref<1x1x44x64xbf16, #tpu.memory_space<vmem>>, vector<1x1x44x64xbf16>
    %107 = vector.shape_cast %106 : vector<1x1x44x64xbf16> to vector<44x64xbf16>
    %108 = vector.shape_cast %105 : vector<44x64xbf16> to vector<1x1x44x64xbf16>
    tpu.vector_store %arg6[%c0_109, %c0_110, %c0_111, %c0_112], %108 {strides = array<i32>} : memref<1x1x44x64xbf16, #tpu.memory_space<vmem>>, vector<1x1x44x64xbf16>,
    return
  }
  func.func @transform_0(%arg0: i32, %arg1: i32) -> (i32, i32, i32, i32) {
    %c0_i32 = arith.constant 0 : i32
    %c0_i32_0 = arith.constant 0 : i32
    %c0_i32_1 = arith.constant 0 : i32
    return %arg0, %arg1, %c0_i32, %c0_i32_0 : i32, i32, i32, i32
  }
  func.func @transform_1(%arg0: i32, %arg1: i32) -> (i32, i32, i32) {
    %c0_i32 = arith.constant 0 : i32
    %c0_i32_0 = arith.constant 0 : i32
    %c0_i32_1 = arith.constant 0 : i32
    %c0_i32_2 = arith.constant 0 : i32
    return %c0_i32, %c0_i32_0, %c0_i32_1 : i32, i32, i32
  }
  func.func @transform_2(%arg0: i32, %arg1: i32) -> (i32, i32) {
    %c0_i32 = arith.constant 0 : i32
    %c0_i32_0 = arith.constant 0 : i32
    %c0_i32_1 = arith.constant 0 : i32
    return %c0_i32, %c0_i32_0 : i32, i32
  }
  func.func @transform_3(%arg0: i32, %arg1: i32) -> (i32, i32) {
    %c0_i32 = arith.constant 0 : i32
    %c0_i32_0 = arith.constant 0 : i32
    %c0_i32_1 = arith.constant 0 : i32
    return %c0_i32, %c0_i32_0 : i32, i32
  }
  func.func @transform_4(%arg0: i32, %arg1: i32) -> (i32, i32, i32, i32) {
    %c0_i32 = arith.constant 0 : i32
    %c0_i32_0 = arith.constant 0 : i32
    %c0_i32_1 = arith.constant 0 : i32
    return %arg0, %arg1, %c0_i32, %c0_i32_0 : i32, i32, i32, i32
  }
}

module attributes {stable_mosaic.version = 11 : i64} {
  func.func @kernel(%arg0: i32, %arg1: i32, %arg2: memref<1x1x4x5x5x64xbf16, #tpu.memory_space<vmem>>, %arg3: memref<1x4x4x64xbf16, #tpu.memory_space<vmem>>) attributes {dimension_semantics = [#tpu.dimension_semantics<parallel>, #tpu.dimension_semantics<parallel>], iteration_bounds = array<i64: 2, 1>, scalar_prefetch = 0 : i64, scratch_operands = 0 : i64, tpu.core_type = #tpu.core_type<tc>, window_params = [{transform_indices = @transform_0, window_bounds = array<i64: 1, 1, 4, 5, 5, 64>}, {transform_indices = @transform_1, window_bounds = array<i64: 1, 4, 4, 64>}]} {
    %c0 = arith.constant 0 : index
    %c0_0 = arith.constant 0 : index
    %c0_1 = arith.constant 0 : index
    %c0_2 = arith.constant 0 : index
    %c0_3 = arith.constant 0 : index
    %c0_4 = arith.constant 0 : index
    %0 = vector.load %arg2[%c0, %c0_0, %c0_1, %c0_2, %c0_3, %c0_4] : memref<1x1x4x5x5x64xbf16, #tpu.memory_space<vmem>>, vector<1x1x1x5x5x64xbf16>
    %1 = vector.shape_cast %0 : vector<1x1x1x5x5x64xbf16> to vector<5x5x64xbf16>
    %c0_5 = arith.constant 0 : index
    %c0_6 = arith.constant 0 : index
    %c1 = arith.constant 1 : index
    %c0_7 = arith.constant 0 : index
    %c0_8 = arith.constant 0 : index
    %c0_9 = arith.constant 0 : index
    %2 = vector.load %arg2[%c0_5, %c0_6, %c1, %c0_7, %c0_8, %c0_9] : memref<1x1x4x5x5x64xbf16, #tpu.memory_space<vmem>>, vector<1x1x1x5x5x64xbf16>
    %3 = vector.shape_cast %2 : vector<1x1x1x5x5x64xbf16> to vector<5x5x64xbf16>
    %c0_10 = arith.constant 0 : index
    %c0_11 = arith.constant 0 : index
    %c2 = arith.constant 2 : index
    %c0_12 = arith.constant 0 : index
    %c0_13 = arith.constant 0 : index
    %c0_14 = arith.constant 0 : index
    %4 = vector.load %arg2[%c0_10, %c0_11, %c2, %c0_12, %c0_13, %c0_14] : memref<1x1x4x5x5x64xbf16, #tpu.memory_space<vmem>>, vector<1x1x1x5x5x64xbf16>
    %5 = vector.shape_cast %4 : vector<1x1x1x5x5x64xbf16> to vector<5x5x64xbf16>
    %c0_15 = arith.constant 0 : index
    %c0_16 = arith.constant 0 : index
    %c3 = arith.constant 3 : index
    %c0_17 = arith.constant 0 : index
    %c0_18 = arith.constant 0 : index
    %c0_19 = arith.constant 0 : index
    %6 = vector.load %arg2[%c0_15, %c0_16, %c3, %c0_17, %c0_18, %c0_19] : memref<1x1x4x5x5x64xbf16, #tpu.memory_space<vmem>>, vector<1x1x1x5x5x64xbf16>
    %7 = vector.shape_cast %6 : vector<1x1x1x5x5x64xbf16> to vector<5x5x64xbf16>
    %8 = vector.extract_strided_slice %1 {offsets = [0, 0, 0], sizes = [4, 4, 64], strides = [1, 1, 1]} : vector<5x5x64xbf16> to vector<4x4x64xbf16>
    %9 = vector.extract_strided_slice %1 {offsets = [0, 1, 0], sizes = [4, 4, 64], strides = [1, 1, 1]} : vector<5x5x64xbf16> to vector<4x4x64xbf16>
    %10 = arith.maximumf %8, %9 : vector<4x4x64xbf16>
    %11 = vector.extract_strided_slice %1 {offsets = [1, 0, 0], sizes = [4, 4, 64], strides = [1, 1, 1]} : vector<5x5x64xbf16> to vector<4x4x64xbf16>
    %12 = arith.maximumf %10, %11 : vector<4x4x64xbf16>
    %13 = vector.extract_strided_slice %1 {offsets = [1, 1, 0], sizes = [4, 4, 64], strides = [1, 1, 1]} : vector<5x5x64xbf16> to vector<4x4x64xbf16>
    %14 = arith.maximumf %12, %13 : vector<4x4x64xbf16>
    %15 = vector.extract_strided_slice %3 {offsets = [0, 0, 0], sizes = [4, 4, 64], strides = [1, 1, 1]} : vector<5x5x64xbf16> to vector<4x4x64xbf16>
    %16 = arith.maximumf %14, %15 : vector<4x4x64xbf16>
    %17 = vector.extract_strided_slice %3 {offsets = [1, 0, 0], sizes = [4, 4, 64], strides = [1, 1, 1]} : vector<5x5x64xbf16> to vector<4x4x64xbf16>
    %18 = arith.maximumf %16, %17 : vector<4x4x64xbf16>
    %19 = vector.extract_strided_slice %5 {offsets = [0, 0, 0], sizes = [4, 4, 64], strides = [1, 1, 1]} : vector<5x5x64xbf16> to vector<4x4x64xbf16>
    %20 = arith.maximumf %18, %19 : vector<4x4x64xbf16>
    %21 = vector.extract_strided_slice %5 {offsets = [0, 1, 0], sizes = [4, 4, 64], strides = [1, 1, 1]} : vector<5x5x64xbf16> to vector<4x4x64xbf16>
    %22 = arith.maximumf %20, %21 : vector<4x4x64xbf16>
    %23 = vector.extract_strided_slice %7 {offsets = [0, 0, 0], sizes = [4, 4, 64], strides = [1, 1, 1]} : vector<5x5x64xbf16> to vector<4x4x64xbf16>
    %24 = arith.maximumf %22, %23 : vector<4x4x64xbf16>
    %c0_20 = arith.constant 0 : index
    %c0_21 = arith.constant 0 : index
    %c0_22 = arith.constant 0 : index
    %c0_23 = arith.constant 0 : index
    %25 = vector.load %arg3[%c0_20, %c0_21, %c0_22, %c0_23] : memref<1x4x4x64xbf16, #tpu.memory_space<vmem>>, vector<1x4x4x64xbf16>
    %26 = vector.shape_cast %25 : vector<1x4x4x64xbf16> to vector<4x4x64xbf16>
    %27 = vector.shape_cast %24 : vector<4x4x64xbf16> to vector<1x4x4x64xbf16>
    tpu.vector_store %arg3[%c0_20, %c0_21, %c0_22, %c0_23], %27 {strides = array<i32>} : memref<1x4x4x64xbf16, #tpu.memory_space<vmem>>, vector<1x4x4x64xbf16>,
    return
  }
  func.func @transform_0(%arg0: i32, %arg1: i32) -> (i32, i32, i32, i32, i32, i32) {
    %c0_i32 = arith.constant 0 : i32
    %c0_i32_0 = arith.constant 0 : i32
    %c0_i32_1 = arith.constant 0 : i32
    %c0_i32_2 = arith.constant 0 : i32
    %c0_i32_3 = arith.constant 0 : i32
    return %arg0, %arg1, %c0_i32, %c0_i32_0, %c0_i32_1, %c0_i32_2 : i32, i32, i32, i32, i32, i32
  }
  func.func @transform_1(%arg0: i32, %arg1: i32) -> (i32, i32, i32, i32) {
    %c0_i32 = arith.constant 0 : i32
    %c0_i32_0 = arith.constant 0 : i32
    %c0_i32_1 = arith.constant 0 : i32
    return %arg0, %arg1, %c0_i32, %c0_i32_0 : i32, i32, i32, i32
  }
}

module attributes {stable_mosaic.version = 11 : i64} {
  func.func @kernel(%arg0: i32, %arg1: i32, %arg2: memref<1x1x42x64xbf16, #tpu.memory_space<vmem>>, %arg3: memref<9x64x64xbf16, #tpu.memory_space<vmem>>, %arg4: memref<1x64xf32, #tpu.memory_space<vmem>>, %arg5: memref<1x64xf32, #tpu.memory_space<vmem>>, %arg6: memref<1x1x24x64xbf16, #tpu.memory_space<vmem>>) attributes {dimension_semantics = [#tpu.dimension_semantics<parallel>, #tpu.dimension_semantics<parallel>], iteration_bounds = array<i64: 2, 1>, scalar_prefetch = 0 : i64, scratch_operands = 0 : i64, tpu.core_type = #tpu.core_type<tc>, window_params = [{transform_indices = @transform_0, window_bounds = array<i64: 1, 1, 42, 64>}, {pipeline_mode = #tpu.pipeline_mode<synchronous>, transform_indices = @transform_1, window_bounds = array<i64: 9, 64, 64>}, {pipeline_mode = #tpu.pipeline_mode<synchronous>, transform_indices = @transform_2, window_bounds = array<i64: 1, 64>}, {pipeline_mode = #tpu.pipeline_mode<synchronous>, transform_indices = @transform_3, window_bounds = array<i64: 1, 64>}, {transform_indices = @transform_4, window_bounds = array<i64: 1, 1, 24, 64>}]} {
    %cst = arith.constant 0.000000e+00 : f32
    %0 = vector.broadcast %cst : f32 to vector<24x64xf32>
    %c0 = arith.constant 0 : index
    %c0_0 = arith.constant 0 : index
    %c0_1 = arith.constant 0 : index
    %c0_2 = arith.constant 0 : index
    %1 = vector.load %arg2[%c0, %c0_0, %c0_1, %c0_2] : memref<1x1x42x64xbf16, #tpu.memory_space<vmem>>, vector<1x1x24x64xbf16>
    %2 = vector.shape_cast %1 : vector<1x1x24x64xbf16> to vector<24x64xbf16>
    %c0_3 = arith.constant 0 : index
    %c0_4 = arith.constant 0 : index
    %c0_5 = arith.constant 0 : index
    %3 = vector.load %arg3[%c0_3, %c0_4, %c0_5] : memref<9x64x64xbf16, #tpu.memory_space<vmem>>, vector<1x64x64xbf16>
    %4 = vector.shape_cast %3 : vector<1x64x64xbf16> to vector<64x64xbf16>
    %cst_6 = arith.constant dense<0.000000e+00> : vector<24x64xf32>
    %5 = tpu.matmul %2, %4, %cst_6 {dimension_numbers = #tpu.dot_dimension_numbers<[1], [0], [0], [1], [0, 0, 1, 1], [], []>} : vector<24x64xbf16>, vector<64x64xbf16>, vector<24x64xf32> -> vector<24x64xf32>
    %6 = arith.addf %0, %5 : vector<24x64xf32>
    %c0_7 = arith.constant 0 : index
    %c0_8 = arith.constant 0 : index
    %c1 = arith.constant 1 : index
    %c0_9 = arith.constant 0 : index
    %7 = vector.load %arg2[%c0_7, %c0_8, %c1, %c0_9] : memref<1x1x42x64xbf16, #tpu.memory_space<vmem>>, vector<1x1x24x64xbf16>
    %8 = vector.shape_cast %7 : vector<1x1x24x64xbf16> to vector<24x64xbf16>
    %c1_10 = arith.constant 1 : index
    %c0_11 = arith.constant 0 : index
    %c0_12 = arith.constant 0 : index
    %9 = vector.load %arg3[%c1_10, %c0_11, %c0_12] : memref<9x64x64xbf16, #tpu.memory_space<vmem>>, vector<1x64x64xbf16>
    %10 = vector.shape_cast %9 : vector<1x64x64xbf16> to vector<64x64xbf16>
    %cst_13 = arith.constant dense<0.000000e+00> : vector<24x64xf32>
    %11 = tpu.matmul %8, %10, %cst_13 {dimension_numbers = #tpu.dot_dimension_numbers<[1], [0], [0], [1], [0, 0, 1, 1], [], []>} : vector<24x64xbf16>, vector<64x64xbf16>, vector<24x64xf32> -> vector<24x64xf32>
    %12 = arith.addf %6, %11 : vector<24x64xf32>
    %c0_14 = arith.constant 0 : index
    %c0_15 = arith.constant 0 : index
    %c2 = arith.constant 2 : index
    %c0_16 = arith.constant 0 : index
    %13 = vector.load %arg2[%c0_14, %c0_15, %c2, %c0_16] : memref<1x1x42x64xbf16, #tpu.memory_space<vmem>>, vector<1x1x24x64xbf16>
    %14 = vector.shape_cast %13 : vector<1x1x24x64xbf16> to vector<24x64xbf16>
    %c2_17 = arith.constant 2 : index
    %c0_18 = arith.constant 0 : index
    %c0_19 = arith.constant 0 : index
    %15 = vector.load %arg3[%c2_17, %c0_18, %c0_19] : memref<9x64x64xbf16, #tpu.memory_space<vmem>>, vector<1x64x64xbf16>
    %16 = vector.shape_cast %15 : vector<1x64x64xbf16> to vector<64x64xbf16>
    %cst_20 = arith.constant dense<0.000000e+00> : vector<24x64xf32>
    %17 = tpu.matmul %14, %16, %cst_20 {dimension_numbers = #tpu.dot_dimension_numbers<[1], [0], [0], [1], [0, 0, 1, 1], [], []>} : vector<24x64xbf16>, vector<64x64xbf16>, vector<24x64xf32> -> vector<24x64xf32>
    %18 = arith.addf %12, %17 : vector<24x64xf32>
    %c0_21 = arith.constant 0 : index
    %c0_22 = arith.constant 0 : index
    %c6 = arith.constant 6 : index
    %c0_23 = arith.constant 0 : index
    %19 = vector.load %arg2[%c0_21, %c0_22, %c6, %c0_23] : memref<1x1x42x64xbf16, #tpu.memory_space<vmem>>, vector<1x1x24x64xbf16>
    %20 = vector.shape_cast %19 : vector<1x1x24x64xbf16> to vector<24x64xbf16>
    %c3 = arith.constant 3 : index
    %c0_24 = arith.constant 0 : index
    %c0_25 = arith.constant 0 : index
    %21 = vector.load %arg3[%c3, %c0_24, %c0_25] : memref<9x64x64xbf16, #tpu.memory_space<vmem>>, vector<1x64x64xbf16>
    %22 = vector.shape_cast %21 : vector<1x64x64xbf16> to vector<64x64xbf16>
    %cst_26 = arith.constant dense<0.000000e+00> : vector<24x64xf32>
    %23 = tpu.matmul %20, %22, %cst_26 {dimension_numbers = #tpu.dot_dimension_numbers<[1], [0], [0], [1], [0, 0, 1, 1], [], []>} : vector<24x64xbf16>, vector<64x64xbf16>, vector<24x64xf32> -> vector<24x64xf32>
    %24 = arith.addf %18, %23 : vector<24x64xf32>
    %c0_27 = arith.constant 0 : index
    %c0_28 = arith.constant 0 : index
    %c7 = arith.constant 7 : index
    %c0_29 = arith.constant 0 : index
    %25 = vector.load %arg2[%c0_27, %c0_28, %c7, %c0_29] : memref<1x1x42x64xbf16, #tpu.memory_space<vmem>>, vector<1x1x24x64xbf16>
    %26 = vector.shape_cast %25 : vector<1x1x24x64xbf16> to vector<24x64xbf16>
    %c4 = arith.constant 4 : index
    %c0_30 = arith.constant 0 : index
    %c0_31 = arith.constant 0 : index
    %27 = vector.load %arg3[%c4, %c0_30, %c0_31] : memref<9x64x64xbf16, #tpu.memory_space<vmem>>, vector<1x64x64xbf16>
    %28 = vector.shape_cast %27 : vector<1x64x64xbf16> to vector<64x64xbf16>
    %cst_32 = arith.constant dense<0.000000e+00> : vector<24x64xf32>
    %29 = tpu.matmul %26, %28, %cst_32 {dimension_numbers = #tpu.dot_dimension_numbers<[1], [0], [0], [1], [0, 0, 1, 1], [], []>} : vector<24x64xbf16>, vector<64x64xbf16>, vector<24x64xf32> -> vector<24x64xf32>
    %30 = arith.addf %24, %29 : vector<24x64xf32>
    %c0_33 = arith.constant 0 : index
    %c0_34 = arith.constant 0 : index
    %c8 = arith.constant 8 : index
    %c0_35 = arith.constant 0 : index
    %31 = vector.load %arg2[%c0_33, %c0_34, %c8, %c0_35] : memref<1x1x42x64xbf16, #tpu.memory_space<vmem>>, vector<1x1x24x64xbf16>
    %32 = vector.shape_cast %31 : vector<1x1x24x64xbf16> to vector<24x64xbf16>
    %c5 = arith.constant 5 : index
    %c0_36 = arith.constant 0 : index
    %c0_37 = arith.constant 0 : index
    %33 = vector.load %arg3[%c5, %c0_36, %c0_37] : memref<9x64x64xbf16, #tpu.memory_space<vmem>>, vector<1x64x64xbf16>
    %34 = vector.shape_cast %33 : vector<1x64x64xbf16> to vector<64x64xbf16>
    %cst_38 = arith.constant dense<0.000000e+00> : vector<24x64xf32>
    %35 = tpu.matmul %32, %34, %cst_38 {dimension_numbers = #tpu.dot_dimension_numbers<[1], [0], [0], [1], [0, 0, 1, 1], [], []>} : vector<24x64xbf16>, vector<64x64xbf16>, vector<24x64xf32> -> vector<24x64xf32>
    %36 = arith.addf %30, %35 : vector<24x64xf32>
    %c0_39 = arith.constant 0 : index
    %c0_40 = arith.constant 0 : index
    %c12 = arith.constant 12 : index
    %c0_41 = arith.constant 0 : index
    %37 = vector.load %arg2[%c0_39, %c0_40, %c12, %c0_41] : memref<1x1x42x64xbf16, #tpu.memory_space<vmem>>, vector<1x1x24x64xbf16>
    %38 = vector.shape_cast %37 : vector<1x1x24x64xbf16> to vector<24x64xbf16>
    %c6_42 = arith.constant 6 : index
    %c0_43 = arith.constant 0 : index
    %c0_44 = arith.constant 0 : index
    %39 = vector.load %arg3[%c6_42, %c0_43, %c0_44] : memref<9x64x64xbf16, #tpu.memory_space<vmem>>, vector<1x64x64xbf16>
    %40 = vector.shape_cast %39 : vector<1x64x64xbf16> to vector<64x64xbf16>
    %cst_45 = arith.constant dense<0.000000e+00> : vector<24x64xf32>
    %41 = tpu.matmul %38, %40, %cst_45 {dimension_numbers = #tpu.dot_dimension_numbers<[1], [0], [0], [1], [0, 0, 1, 1], [], []>} : vector<24x64xbf16>, vector<64x64xbf16>, vector<24x64xf32> -> vector<24x64xf32>
    %42 = arith.addf %36, %41 : vector<24x64xf32>
    %c0_46 = arith.constant 0 : index
    %c0_47 = arith.constant 0 : index
    %c13 = arith.constant 13 : index
    %c0_48 = arith.constant 0 : index
    %43 = vector.load %arg2[%c0_46, %c0_47, %c13, %c0_48] : memref<1x1x42x64xbf16, #tpu.memory_space<vmem>>, vector<1x1x24x64xbf16>
    %44 = vector.shape_cast %43 : vector<1x1x24x64xbf16> to vector<24x64xbf16>
    %c7_49 = arith.constant 7 : index
    %c0_50 = arith.constant 0 : index
    %c0_51 = arith.constant 0 : index
    %45 = vector.load %arg3[%c7_49, %c0_50, %c0_51] : memref<9x64x64xbf16, #tpu.memory_space<vmem>>, vector<1x64x64xbf16>
    %46 = vector.shape_cast %45 : vector<1x64x64xbf16> to vector<64x64xbf16>
    %cst_52 = arith.constant dense<0.000000e+00> : vector<24x64xf32>
    %47 = tpu.matmul %44, %46, %cst_52 {dimension_numbers = #tpu.dot_dimension_numbers<[1], [0], [0], [1], [0, 0, 1, 1], [], []>} : vector<24x64xbf16>, vector<64x64xbf16>, vector<24x64xf32> -> vector<24x64xf32>
    %48 = arith.addf %42, %47 : vector<24x64xf32>
    %c0_53 = arith.constant 0 : index
    %c0_54 = arith.constant 0 : index
    %c14 = arith.constant 14 : index
    %c0_55 = arith.constant 0 : index
    %49 = vector.load %arg2[%c0_53, %c0_54, %c14, %c0_55] : memref<1x1x42x64xbf16, #tpu.memory_space<vmem>>, vector<1x1x24x64xbf16>
    %50 = vector.shape_cast %49 : vector<1x1x24x64xbf16> to vector<24x64xbf16>
    %c8_56 = arith.constant 8 : index
    %c0_57 = arith.constant 0 : index
    %c0_58 = arith.constant 0 : index
    %51 = vector.load %arg3[%c8_56, %c0_57, %c0_58] : memref<9x64x64xbf16, #tpu.memory_space<vmem>>, vector<1x64x64xbf16>
    %52 = vector.shape_cast %51 : vector<1x64x64xbf16> to vector<64x64xbf16>
    %cst_59 = arith.constant dense<0.000000e+00> : vector<24x64xf32>
    %53 = tpu.matmul %50, %52, %cst_59 {dimension_numbers = #tpu.dot_dimension_numbers<[1], [0], [0], [1], [0, 0, 1, 1], [], []>} : vector<24x64xbf16>, vector<64x64xbf16>, vector<24x64xf32> -> vector<24x64xf32>
    %54 = arith.addf %48, %53 : vector<24x64xf32>
    %c0_60 = arith.constant 0 : index
    %c0_61 = arith.constant 0 : index
    %55 = vector.load %arg4[%c0_60, %c0_61] : memref<1x64xf32, #tpu.memory_space<vmem>>, vector<1x64xf32>
    %56 = vector.broadcast %55 : vector<1x64xf32> to vector<24x64xf32>
    %57 = arith.mulf %54, %56 : vector<24x64xf32>
    %c0_62 = arith.constant 0 : index
    %c0_63 = arith.constant 0 : index
    %58 = vector.load %arg5[%c0_62, %c0_63] : memref<1x64xf32, #tpu.memory_space<vmem>>, vector<1x64xf32>
    %59 = vector.broadcast %58 : vector<1x64xf32> to vector<24x64xf32>
    %60 = arith.addf %57, %59 : vector<24x64xf32>
    %cst_64 = arith.constant 0.000000e+00 : f32
    %61 = vector.broadcast %cst_64 : f32 to vector<24x64xf32>
    %62 = arith.maximumf %60, %61 : vector<24x64xf32>
    %63 = arith.truncf %62 : vector<24x64xf32> to vector<24x64xbf16>
    %c0_65 = arith.constant 0 : index
    %c0_66 = arith.constant 0 : index
    %c0_67 = arith.constant 0 : index
    %c0_68 = arith.constant 0 : index
    %64 = vector.load %arg6[%c0_65, %c0_66, %c0_67, %c0_68] : memref<1x1x24x64xbf16, #tpu.memory_space<vmem>>, vector<1x1x24x64xbf16>
    %65 = vector.shape_cast %64 : vector<1x1x24x64xbf16> to vector<24x64xbf16>
    %66 = vector.shape_cast %63 : vector<24x64xbf16> to vector<1x1x24x64xbf16>
    tpu.vector_store %arg6[%c0_65, %c0_66, %c0_67, %c0_68], %66 {strides = array<i32>} : memref<1x1x24x64xbf16, #tpu.memory_space<vmem>>, vector<1x1x24x64xbf16>,
    return
  }
  func.func @transform_0(%arg0: i32, %arg1: i32) -> (i32, i32, i32, i32) {
    %c0_i32 = arith.constant 0 : i32
    %c0_i32_0 = arith.constant 0 : i32
    %c0_i32_1 = arith.constant 0 : i32
    return %arg0, %arg1, %c0_i32, %c0_i32_0 : i32, i32, i32, i32
  }
  func.func @transform_1(%arg0: i32, %arg1: i32) -> (i32, i32, i32) {
    %c0_i32 = arith.constant 0 : i32
    %c0_i32_0 = arith.constant 0 : i32
    %c0_i32_1 = arith.constant 0 : i32
    %c0_i32_2 = arith.constant 0 : i32
    return %c0_i32, %c0_i32_0, %c0_i32_1 : i32, i32, i32
  }
  func.func @transform_2(%arg0: i32, %arg1: i32) -> (i32, i32) {
    %c0_i32 = arith.constant 0 : i32
    %c0_i32_0 = arith.constant 0 : i32
    %c0_i32_1 = arith.constant 0 : i32
    return %c0_i32, %c0_i32_0 : i32, i32
  }
  func.func @transform_3(%arg0: i32, %arg1: i32) -> (i32, i32) {
    %c0_i32 = arith.constant 0 : i32
    %c0_i32_0 = arith.constant 0 : i32
    %c0_i32_1 = arith.constant 0 : i32
    return %c0_i32, %c0_i32_0 : i32, i32
  }
  func.func @transform_4(%arg0: i32, %arg1: i32) -> (i32, i32, i32, i32) {
    %c0_i32 = arith.constant 0 : i32
    %c0_i32_0 = arith.constant 0 : i32
    %c0_i32_1 = arith.constant 0 : i32
    return %arg0, %arg1, %c0_i32, %c0_i32_0 : i32, i32, i32, i32
  }
}

module attributes {stable_mosaic.version = 11 : i64} {
  func.func @kernel(%arg0: i32, %arg1: i32, %arg2: memref<1x1x42x64xbf16, #tpu.memory_space<vmem>>, %arg3: memref<9x64x64xbf16, #tpu.memory_space<vmem>>, %arg4: memref<1x64xf32, #tpu.memory_space<vmem>>, %arg5: memref<1x64xf32, #tpu.memory_space<vmem>>, %arg6: memref<1x1x24x64xbf16, #tpu.memory_space<vmem>>, %arg7: memref<1x1x24x64xbf16, #tpu.memory_space<vmem>>) attributes {dimension_semantics = [#tpu.dimension_semantics<parallel>, #tpu.dimension_semantics<parallel>], iteration_bounds = array<i64: 2, 1>, scalar_prefetch = 0 : i64, scratch_operands = 0 : i64, tpu.core_type = #tpu.core_type<tc>, window_params = [{transform_indices = @transform_0, window_bounds = array<i64: 1, 1, 42, 64>}, {pipeline_mode = #tpu.pipeline_mode<synchronous>, transform_indices = @transform_1, window_bounds = array<i64: 9, 64, 64>}, {pipeline_mode = #tpu.pipeline_mode<synchronous>, transform_indices = @transform_2, window_bounds = array<i64: 1, 64>}, {pipeline_mode = #tpu.pipeline_mode<synchronous>, transform_indices = @transform_3, window_bounds = array<i64: 1, 64>}, {transform_indices = @transform_4, window_bounds = array<i64: 1, 1, 24, 64>}, {transform_indices = @transform_5, window_bounds = array<i64: 1, 1, 24, 64>}]} {
    %cst = arith.constant 0.000000e+00 : f32
    %0 = vector.broadcast %cst : f32 to vector<24x64xf32>
    %c0 = arith.constant 0 : index
    %c0_0 = arith.constant 0 : index
    %c0_1 = arith.constant 0 : index
    %c0_2 = arith.constant 0 : index
    %1 = vector.load %arg2[%c0, %c0_0, %c0_1, %c0_2] : memref<1x1x42x64xbf16, #tpu.memory_space<vmem>>, vector<1x1x24x64xbf16>
    %2 = vector.shape_cast %1 : vector<1x1x24x64xbf16> to vector<24x64xbf16>
    %c0_3 = arith.constant 0 : index
    %c0_4 = arith.constant 0 : index
    %c0_5 = arith.constant 0 : index
    %3 = vector.load %arg3[%c0_3, %c0_4, %c0_5] : memref<9x64x64xbf16, #tpu.memory_space<vmem>>, vector<1x64x64xbf16>
    %4 = vector.shape_cast %3 : vector<1x64x64xbf16> to vector<64x64xbf16>
    %cst_6 = arith.constant dense<0.000000e+00> : vector<24x64xf32>
    %5 = tpu.matmul %2, %4, %cst_6 {dimension_numbers = #tpu.dot_dimension_numbers<[1], [0], [0], [1], [0, 0, 1, 1], [], []>} : vector<24x64xbf16>, vector<64x64xbf16>, vector<24x64xf32> -> vector<24x64xf32>
    %6 = arith.addf %0, %5 : vector<24x64xf32>
    %c0_7 = arith.constant 0 : index
    %c0_8 = arith.constant 0 : index
    %c1 = arith.constant 1 : index
    %c0_9 = arith.constant 0 : index
    %7 = vector.load %arg2[%c0_7, %c0_8, %c1, %c0_9] : memref<1x1x42x64xbf16, #tpu.memory_space<vmem>>, vector<1x1x24x64xbf16>
    %8 = vector.shape_cast %7 : vector<1x1x24x64xbf16> to vector<24x64xbf16>
    %c1_10 = arith.constant 1 : index
    %c0_11 = arith.constant 0 : index
    %c0_12 = arith.constant 0 : index
    %9 = vector.load %arg3[%c1_10, %c0_11, %c0_12] : memref<9x64x64xbf16, #tpu.memory_space<vmem>>, vector<1x64x64xbf16>
    %10 = vector.shape_cast %9 : vector<1x64x64xbf16> to vector<64x64xbf16>
    %cst_13 = arith.constant dense<0.000000e+00> : vector<24x64xf32>
    %11 = tpu.matmul %8, %10, %cst_13 {dimension_numbers = #tpu.dot_dimension_numbers<[1], [0], [0], [1], [0, 0, 1, 1], [], []>} : vector<24x64xbf16>, vector<64x64xbf16>, vector<24x64xf32> -> vector<24x64xf32>
    %12 = arith.addf %6, %11 : vector<24x64xf32>
    %c0_14 = arith.constant 0 : index
    %c0_15 = arith.constant 0 : index
    %c2 = arith.constant 2 : index
    %c0_16 = arith.constant 0 : index
    %13 = vector.load %arg2[%c0_14, %c0_15, %c2, %c0_16] : memref<1x1x42x64xbf16, #tpu.memory_space<vmem>>, vector<1x1x24x64xbf16>
    %14 = vector.shape_cast %13 : vector<1x1x24x64xbf16> to vector<24x64xbf16>
    %c2_17 = arith.constant 2 : index
    %c0_18 = arith.constant 0 : index
    %c0_19 = arith.constant 0 : index
    %15 = vector.load %arg3[%c2_17, %c0_18, %c0_19] : memref<9x64x64xbf16, #tpu.memory_space<vmem>>, vector<1x64x64xbf16>
    %16 = vector.shape_cast %15 : vector<1x64x64xbf16> to vector<64x64xbf16>
    %cst_20 = arith.constant dense<0.000000e+00> : vector<24x64xf32>
    %17 = tpu.matmul %14, %16, %cst_20 {dimension_numbers = #tpu.dot_dimension_numbers<[1], [0], [0], [1], [0, 0, 1, 1], [], []>} : vector<24x64xbf16>, vector<64x64xbf16>, vector<24x64xf32> -> vector<24x64xf32>
    %18 = arith.addf %12, %17 : vector<24x64xf32>
    %c0_21 = arith.constant 0 : index
    %c0_22 = arith.constant 0 : index
    %c6 = arith.constant 6 : index
    %c0_23 = arith.constant 0 : index
    %19 = vector.load %arg2[%c0_21, %c0_22, %c6, %c0_23] : memref<1x1x42x64xbf16, #tpu.memory_space<vmem>>, vector<1x1x24x64xbf16>
    %20 = vector.shape_cast %19 : vector<1x1x24x64xbf16> to vector<24x64xbf16>
    %c3 = arith.constant 3 : index
    %c0_24 = arith.constant 0 : index
    %c0_25 = arith.constant 0 : index
    %21 = vector.load %arg3[%c3, %c0_24, %c0_25] : memref<9x64x64xbf16, #tpu.memory_space<vmem>>, vector<1x64x64xbf16>
    %22 = vector.shape_cast %21 : vector<1x64x64xbf16> to vector<64x64xbf16>
    %cst_26 = arith.constant dense<0.000000e+00> : vector<24x64xf32>
    %23 = tpu.matmul %20, %22, %cst_26 {dimension_numbers = #tpu.dot_dimension_numbers<[1], [0], [0], [1], [0, 0, 1, 1], [], []>} : vector<24x64xbf16>, vector<64x64xbf16>, vector<24x64xf32> -> vector<24x64xf32>
    %24 = arith.addf %18, %23 : vector<24x64xf32>
    %c0_27 = arith.constant 0 : index
    %c0_28 = arith.constant 0 : index
    %c7 = arith.constant 7 : index
    %c0_29 = arith.constant 0 : index
    %25 = vector.load %arg2[%c0_27, %c0_28, %c7, %c0_29] : memref<1x1x42x64xbf16, #tpu.memory_space<vmem>>, vector<1x1x24x64xbf16>
    %26 = vector.shape_cast %25 : vector<1x1x24x64xbf16> to vector<24x64xbf16>
    %c4 = arith.constant 4 : index
    %c0_30 = arith.constant 0 : index
    %c0_31 = arith.constant 0 : index
    %27 = vector.load %arg3[%c4, %c0_30, %c0_31] : memref<9x64x64xbf16, #tpu.memory_space<vmem>>, vector<1x64x64xbf16>
    %28 = vector.shape_cast %27 : vector<1x64x64xbf16> to vector<64x64xbf16>
    %cst_32 = arith.constant dense<0.000000e+00> : vector<24x64xf32>
    %29 = tpu.matmul %26, %28, %cst_32 {dimension_numbers = #tpu.dot_dimension_numbers<[1], [0], [0], [1], [0, 0, 1, 1], [], []>} : vector<24x64xbf16>, vector<64x64xbf16>, vector<24x64xf32> -> vector<24x64xf32>
    %30 = arith.addf %24, %29 : vector<24x64xf32>
    %c0_33 = arith.constant 0 : index
    %c0_34 = arith.constant 0 : index
    %c8 = arith.constant 8 : index
    %c0_35 = arith.constant 0 : index
    %31 = vector.load %arg2[%c0_33, %c0_34, %c8, %c0_35] : memref<1x1x42x64xbf16, #tpu.memory_space<vmem>>, vector<1x1x24x64xbf16>
    %32 = vector.shape_cast %31 : vector<1x1x24x64xbf16> to vector<24x64xbf16>
    %c5 = arith.constant 5 : index
    %c0_36 = arith.constant 0 : index
    %c0_37 = arith.constant 0 : index
    %33 = vector.load %arg3[%c5, %c0_36, %c0_37] : memref<9x64x64xbf16, #tpu.memory_space<vmem>>, vector<1x64x64xbf16>
    %34 = vector.shape_cast %33 : vector<1x64x64xbf16> to vector<64x64xbf16>
    %cst_38 = arith.constant dense<0.000000e+00> : vector<24x64xf32>
    %35 = tpu.matmul %32, %34, %cst_38 {dimension_numbers = #tpu.dot_dimension_numbers<[1], [0], [0], [1], [0, 0, 1, 1], [], []>} : vector<24x64xbf16>, vector<64x64xbf16>, vector<24x64xf32> -> vector<24x64xf32>
    %36 = arith.addf %30, %35 : vector<24x64xf32>
    %c0_39 = arith.constant 0 : index
    %c0_40 = arith.constant 0 : index
    %c12 = arith.constant 12 : index
    %c0_41 = arith.constant 0 : index
    %37 = vector.load %arg2[%c0_39, %c0_40, %c12, %c0_41] : memref<1x1x42x64xbf16, #tpu.memory_space<vmem>>, vector<1x1x24x64xbf16>
    %38 = vector.shape_cast %37 : vector<1x1x24x64xbf16> to vector<24x64xbf16>
    %c6_42 = arith.constant 6 : index
    %c0_43 = arith.constant 0 : index
    %c0_44 = arith.constant 0 : index
    %39 = vector.load %arg3[%c6_42, %c0_43, %c0_44] : memref<9x64x64xbf16, #tpu.memory_space<vmem>>, vector<1x64x64xbf16>
    %40 = vector.shape_cast %39 : vector<1x64x64xbf16> to vector<64x64xbf16>
    %cst_45 = arith.constant dense<0.000000e+00> : vector<24x64xf32>
    %41 = tpu.matmul %38, %40, %cst_45 {dimension_numbers = #tpu.dot_dimension_numbers<[1], [0], [0], [1], [0, 0, 1, 1], [], []>} : vector<24x64xbf16>, vector<64x64xbf16>, vector<24x64xf32> -> vector<24x64xf32>
    %42 = arith.addf %36, %41 : vector<24x64xf32>
    %c0_46 = arith.constant 0 : index
    %c0_47 = arith.constant 0 : index
    %c13 = arith.constant 13 : index
    %c0_48 = arith.constant 0 : index
    %43 = vector.load %arg2[%c0_46, %c0_47, %c13, %c0_48] : memref<1x1x42x64xbf16, #tpu.memory_space<vmem>>, vector<1x1x24x64xbf16>
    %44 = vector.shape_cast %43 : vector<1x1x24x64xbf16> to vector<24x64xbf16>
    %c7_49 = arith.constant 7 : index
    %c0_50 = arith.constant 0 : index
    %c0_51 = arith.constant 0 : index
    %45 = vector.load %arg3[%c7_49, %c0_50, %c0_51] : memref<9x64x64xbf16, #tpu.memory_space<vmem>>, vector<1x64x64xbf16>
    %46 = vector.shape_cast %45 : vector<1x64x64xbf16> to vector<64x64xbf16>
    %cst_52 = arith.constant dense<0.000000e+00> : vector<24x64xf32>
    %47 = tpu.matmul %44, %46, %cst_52 {dimension_numbers = #tpu.dot_dimension_numbers<[1], [0], [0], [1], [0, 0, 1, 1], [], []>} : vector<24x64xbf16>, vector<64x64xbf16>, vector<24x64xf32> -> vector<24x64xf32>
    %48 = arith.addf %42, %47 : vector<24x64xf32>
    %c0_53 = arith.constant 0 : index
    %c0_54 = arith.constant 0 : index
    %c14 = arith.constant 14 : index
    %c0_55 = arith.constant 0 : index
    %49 = vector.load %arg2[%c0_53, %c0_54, %c14, %c0_55] : memref<1x1x42x64xbf16, #tpu.memory_space<vmem>>, vector<1x1x24x64xbf16>
    %50 = vector.shape_cast %49 : vector<1x1x24x64xbf16> to vector<24x64xbf16>
    %c8_56 = arith.constant 8 : index
    %c0_57 = arith.constant 0 : index
    %c0_58 = arith.constant 0 : index
    %51 = vector.load %arg3[%c8_56, %c0_57, %c0_58] : memref<9x64x64xbf16, #tpu.memory_space<vmem>>, vector<1x64x64xbf16>
    %52 = vector.shape_cast %51 : vector<1x64x64xbf16> to vector<64x64xbf16>
    %cst_59 = arith.constant dense<0.000000e+00> : vector<24x64xf32>
    %53 = tpu.matmul %50, %52, %cst_59 {dimension_numbers = #tpu.dot_dimension_numbers<[1], [0], [0], [1], [0, 0, 1, 1], [], []>} : vector<24x64xbf16>, vector<64x64xbf16>, vector<24x64xf32> -> vector<24x64xf32>
    %54 = arith.addf %48, %53 : vector<24x64xf32>
    %c0_60 = arith.constant 0 : index
    %c0_61 = arith.constant 0 : index
    %55 = vector.load %arg4[%c0_60, %c0_61] : memref<1x64xf32, #tpu.memory_space<vmem>>, vector<1x64xf32>
    %56 = vector.broadcast %55 : vector<1x64xf32> to vector<24x64xf32>
    %57 = arith.mulf %54, %56 : vector<24x64xf32>
    %c0_62 = arith.constant 0 : index
    %c0_63 = arith.constant 0 : index
    %58 = vector.load %arg5[%c0_62, %c0_63] : memref<1x64xf32, #tpu.memory_space<vmem>>, vector<1x64xf32>
    %59 = vector.broadcast %58 : vector<1x64xf32> to vector<24x64xf32>
    %60 = arith.addf %57, %59 : vector<24x64xf32>
    %c0_64 = arith.constant 0 : index
    %c0_65 = arith.constant 0 : index
    %c0_66 = arith.constant 0 : index
    %c0_67 = arith.constant 0 : index
    %61 = vector.load %arg6[%c0_64, %c0_65, %c0_66, %c0_67] : memref<1x1x24x64xbf16, #tpu.memory_space<vmem>>, vector<1x1x24x64xbf16>
    %62 = vector.shape_cast %61 : vector<1x1x24x64xbf16> to vector<24x64xbf16>
    %63 = arith.extf %62 : vector<24x64xbf16> to vector<24x64xf32>
    %64 = arith.addf %60, %63 : vector<24x64xf32>
    %cst_68 = arith.constant 0.000000e+00 : f32
    %65 = vector.broadcast %cst_68 : f32 to vector<24x64xf32>
    %66 = arith.maximumf %64, %65 : vector<24x64xf32>
    %67 = arith.truncf %66 : vector<24x64xf32> to vector<24x64xbf16>
    %c0_69 = arith.constant 0 : index
    %c0_70 = arith.constant 0 : index
    %c0_71 = arith.constant 0 : index
    %c0_72 = arith.constant 0 : index
    %68 = vector.load %arg7[%c0_69, %c0_70, %c0_71, %c0_72] : memref<1x1x24x64xbf16, #tpu.memory_space<vmem>>, vector<1x1x24x64xbf16>
    %69 = vector.shape_cast %68 : vector<1x1x24x64xbf16> to vector<24x64xbf16>
    %70 = vector.shape_cast %67 : vector<24x64xbf16> to vector<1x1x24x64xbf16>
    tpu.vector_store %arg7[%c0_69, %c0_70, %c0_71, %c0_72], %70 {strides = array<i32>} : memref<1x1x24x64xbf16, #tpu.memory_space<vmem>>, vector<1x1x24x64xbf16>,
    return
  }
  func.func @transform_0(%arg0: i32, %arg1: i32) -> (i32, i32, i32, i32) {
    %c0_i32 = arith.constant 0 : i32
    %c0_i32_0 = arith.constant 0 : i32
    %c0_i32_1 = arith.constant 0 : i32
    return %arg0, %arg1, %c0_i32, %c0_i32_0 : i32, i32, i32, i32
  }
  func.func @transform_1(%arg0: i32, %arg1: i32) -> (i32, i32, i32) {
    %c0_i32 = arith.constant 0 : i32
    %c0_i32_0 = arith.constant 0 : i32
    %c0_i32_1 = arith.constant 0 : i32
    %c0_i32_2 = arith.constant 0 : i32
    return %c0_i32, %c0_i32_0, %c0_i32_1 : i32, i32, i32
  }
  func.func @transform_2(%arg0: i32, %arg1: i32) -> (i32, i32) {
    %c0_i32 = arith.constant 0 : i32
    %c0_i32_0 = arith.constant 0 : i32
    %c0_i32_1 = arith.constant 0 : i32
    return %c0_i32, %c0_i32_0 : i32, i32
  }
  func.func @transform_3(%arg0: i32, %arg1: i32) -> (i32, i32) {
    %c0_i32 = arith.constant 0 : i32
    %c0_i32_0 = arith.constant 0 : i32
    %c0_i32_1 = arith.constant 0 : i32
    return %c0_i32, %c0_i32_0 : i32, i32
  }
  func.func @transform_4(%arg0: i32, %arg1: i32) -> (i32, i32, i32, i32) {
    %c0_i32 = arith.constant 0 : i32
    %c0_i32_0 = arith.constant 0 : i32
    %c0_i32_1 = arith.constant 0 : i32
    return %arg0, %arg1, %c0_i32, %c0_i32_0 : i32, i32, i32, i32
  }
  func.func @transform_5(%arg0: i32, %arg1: i32) -> (i32, i32, i32, i32) {
    %c0_i32 = arith.constant 0 : i32
    %c0_i32_0 = arith.constant 0 : i32
    %c0_i32_1 = arith.constant 0 : i32
    return %arg0, %arg1, %c0_i32, %c0_i32_0 : i32, i32, i32, i32
  }
}

module attributes {stable_mosaic.version = 11 : i64} {
  func.func @kernel(%arg0: i32, %arg1: i32, %arg2: memref<1x4x8x64xbf16, #tpu.memory_space<vmem>>, %arg3: memref<1x4x4x64xbf16, #tpu.memory_space<vmem>>, %arg4: memref<1x4x4xbf16, #tpu.memory_space<vmem>>, %arg5: memref<8x4xbf16, #tpu.memory_space<vmem>>, %arg6: memref<1x4x8x128xf32, #tpu.memory_space<vmem>>) attributes {dimension_semantics = [#tpu.dimension_semantics<parallel>, #tpu.dimension_semantics<parallel>], iteration_bounds = array<i64: 2, 2>, scalar_prefetch = 0 : i64, scratch_operands = 0 : i64, tpu.core_type = #tpu.core_type<tc>, window_params = [{transform_indices = @transform_0, window_bounds = array<i64: 1, 4, 8, 64>}, {transform_indices = @transform_1, window_bounds = array<i64: 1, 4, 4, 64>}, {transform_indices = @transform_2, window_bounds = array<i64: 1, 4, 4>}, {pipeline_mode = #tpu.pipeline_mode<synchronous>, transform_indices = @transform_3, window_bounds = array<i64: 8, 4>}, {transform_indices = @transform_4, window_bounds = array<i64: 1, 4, 8, 128>}]} {
    %c0 = arith.constant 0 : index
    %c0_0 = arith.constant 0 : index
    %c0_1 = arith.constant 0 : index
    %0 = vector.load %arg4[%c0, %c0_0, %c0_1] : memref<1x4x4xbf16, #tpu.memory_space<vmem>>, vector<1x4x4xbf16>
    %1 = vector.shape_cast %0 : vector<1x4x4xbf16> to vector<4x4xbf16>
    %c0_2 = arith.constant 0 : index
    %c0_3 = arith.constant 0 : index
    %c0_4 = arith.constant 0 : index
    %c0_5 = arith.constant 0 : index
    %2 = vector.load %arg3[%c0_2, %c0_3, %c0_4, %c0_5] : memref<1x4x4x64xbf16, #tpu.memory_space<vmem>>, vector<1x4x4x64xbf16>
    %3 = vector.shape_cast %2 : vector<1x4x4x64xbf16> to vector<4x4x64xbf16>
    "tpu.trace_start"() <{level = 10 : i32, message = "th,hwc->twc"}> : () -> ()
    %cst = arith.constant dense<0.000000e+00> : vector<4x4x64xf32>
    %4 = tpu.matmul %1, %3, %cst {dimension_numbers = #tpu.dot_dimension_numbers<[1], [0], [0], [1, 2], [0, 0, 1, 1, 1, 2], [], []>} : vector<4x4xbf16>, vector<4x4x64xbf16>, vector<4x4x64xf32> -> vector<4x4x64xf32>
    "tpu.trace_stop"() : () -> ()
    %c0_6 = arith.constant 0 : index
    %c0_7 = arith.constant 0 : index
    %5 = vector.load %arg5[%c0_6, %c0_7] : memref<8x4xbf16, #tpu.memory_space<vmem>>, vector<8x4xbf16>
    %6 = arith.truncf %4 : vector<4x4x64xf32> to vector<4x4x64xbf16>
    "tpu.trace_start"() <{level = 10 : i32, message = "vw,twc->tvc"}> : () -> ()
    %cst_8 = arith.constant dense<0.000000e+00> : vector<4x64x8xf32>
    %7 = tpu.matmul %6, %5, %cst_8 {dimension_numbers = #tpu.dot_dimension_numbers<[1], [1], [0, 2], [0], [0, 0, 0, 2, 1, 0], [], []>} : vector<4x4x64xbf16>, vector<8x4xbf16>, vector<4x64x8xf32> -> vector<4x64x8xf32>
    %8 = tpu.transpose %7, [0, 2, 1] : vector<4x64x8xf32> -> vector<4x8x64xf32>
    "tpu.trace_stop"() : () -> ()
    %c0_9 = arith.constant 0 : index
    %c0_10 = arith.constant 0 : index
    %c0_11 = arith.constant 0 : index
    %c0_12 = arith.constant 0 : index
    %9 = vector.load %arg2[%c0_9, %c0_10, %c0_11, %c0_12] : memref<1x4x8x64xbf16, #tpu.memory_space<vmem>>, vector<1x4x8x64xbf16>
    %10 = vector.shape_cast %9 : vector<1x4x8x64xbf16> to vector<4x8x64xbf16>
    %11 = arith.extf %10 : vector<4x8x64xbf16> to vector<4x8x64xf32>
    %c0_13 = arith.constant 0 : index
    %c0_14 = arith.constant 0 : index
    %c0_15 = arith.constant 0 : index
    %c0_16 = arith.constant 0 : index
    %12 = vector.load %arg6[%c0_13, %c0_14, %c0_15, %c0_16] : memref<1x4x8x128xf32, #tpu.memory_space<vmem>>, vector<1x4x8x64xf32>
    %13 = vector.shape_cast %12 : vector<1x4x8x64xf32> to vector<4x8x64xf32>
    %14 = vector.shape_cast %11 : vector<4x8x64xf32> to vector<1x4x8x64xf32>
    tpu.vector_store %arg6[%c0_13, %c0_14, %c0_15, %c0_16], %14 {strides = array<i32>} : memref<1x4x8x128xf32, #tpu.memory_space<vmem>>, vector<1x4x8x64xf32>,
    %c0_17 = arith.constant 0 : index
    %c0_18 = arith.constant 0 : index
    %c0_19 = arith.constant 0 : index
    %c64 = arith.constant 64 : index
    %15 = vector.load %arg6[%c0_17, %c0_18, %c0_19, %c64] : memref<1x4x8x128xf32, #tpu.memory_space<vmem>>, vector<1x4x8x64xf32>
    %16 = vector.shape_cast %15 : vector<1x4x8x64xf32> to vector<4x8x64xf32>
    %17 = vector.shape_cast %8 : vector<4x8x64xf32> to vector<1x4x8x64xf32>
    tpu.vector_store %arg6[%c0_17, %c0_18, %c0_19, %c64], %17 {strides = array<i32>} : memref<1x4x8x128xf32, #tpu.memory_space<vmem>>, vector<1x4x8x64xf32>,
    return
  }
  func.func @transform_0(%arg0: i32, %arg1: i32) -> (i32, i32, i32, i32) {
    %c0_i32 = arith.constant 0 : i32
    %c0_i32_0 = arith.constant 0 : i32
    %c0_i32_1 = arith.constant 0 : i32
    return %arg0, %arg1, %c0_i32, %c0_i32_0 : i32, i32, i32, i32
  }
  func.func @transform_1(%arg0: i32, %arg1: i32) -> (i32, i32, i32, i32) {
    %c0_i32 = arith.constant 0 : i32
    %c0_i32_0 = arith.constant 0 : i32
    %c0_i32_1 = arith.constant 0 : i32
    %c0_i32_2 = arith.constant 0 : i32
    return %arg0, %c0_i32, %c0_i32_0, %c0_i32_1 : i32, i32, i32, i32
  }
  func.func @transform_2(%arg0: i32, %arg1: i32) -> (i32, i32, i32) {
    %c0_i32 = arith.constant 0 : i32
    %c0_i32_0 = arith.constant 0 : i32
    %c0_i32_1 = arith.constant 0 : i32
    return %arg1, %c0_i32, %c0_i32_0 : i32, i32, i32
  }
  func.func @transform_3(%arg0: i32, %arg1: i32) -> (i32, i32) {
    %c0_i32 = arith.constant 0 : i32
    %c0_i32_0 = arith.constant 0 : i32
    %c0_i32_1 = arith.constant 0 : i32
    return %c0_i32, %c0_i32_0 : i32, i32
  }
  func.func @transform_4(%arg0: i32, %arg1: i32) -> (i32, i32, i32, i32) {
    %c0_i32 = arith.constant 0 : i32
    %c0_i32_0 = arith.constant 0 : i32
    %c0_i32_1 = arith.constant 0 : i32
    return %arg0, %arg1, %c0_i32, %c0_i32_0 : i32, i32, i32, i32
  }
}

</mosaic_0001>

<bundles_post_ra>
// kernel: spatial_encoder_forward.8
= control target key start
LH: loop header
LB: loop body
LE: loop exit
PB: predicated region body
PF: predicated region fallthrough
CT: control target
= control target key end

     0   :  { %s475_s6 = smov 0   ;;  %s477_s7 = smov 0   ;;  %s551_s0 = inlined_call_operand.vmem [shape: bf16[2,1,4,5,5,64], index: 0, kind: input, shape index: {}]   ;;  %s552_s1 = inlined_call_operand.vmem [shape: bf16[2,4,4,64], index: 1, kind: output, shape index: {}]  }
   0x1   :  { %s479_s8 = smov 0  }
   0x2 LB: > { %s23_s9 = sadd.s32 1, %s459_s7  ;;  %p396_p0 = scmp.ge.s32.totalorder %s463_s8, 1  ;;  %s463_s8 = sphi %s479_s8, %s11_s8   ;;  %s459_s7 = sphi %s477_s7, %s554_s7   ;;  %s455_s6 = sphi %s475_s6, %s553_s6  }
   0x3   : > { %p25_p1 = scmp.ge.s32.totalorder %s23_s9, 2  ;;  %p107_p2 = scmp.lt.s32.totalorder %s463_s8, 3 }
   0x5   : > { %s556_s9 = smov (%p25_p1, %s23_s9), 0  ;;  %p108_p3 = pnand %p396_p0, %p107_p2 }
   0x6   : > { %p135_p4 = scmp.lt.s32.totalorder (!%p108_p3), %s455_s6, 1 }
   0x7   : > { %111 = sbr.rel (%p108_p3) target bundleno = 49 (0x31), region = 24 }
   0xc   : > { %s558_s6 = smov (!%p135_p4, %s455_s6), 1  ;;  %vm297_vm0 = vcmask 517120  }
   0xd   : > { %s416_s10 = smul.u32 80, %s558_s6  ;;  %s415_s14 = sshll.u32 %s558_s6, 3 }
   0xe   : > { %s152_s17 = scalar_lea.vmem %s552_s1, %s415_s14 }
   0xf   : > { %s499_s13 = scalar_lea.vmem %s551_s0, %s416_s10 }
  0x10   : > { %v154_v0 = vld [vmem:[%s499_s13] sm:$0x7]  ;;  %v155_v1 = vld [vmem:[%s499_s13 + $0x4] sm:$0x7]  ;;  %v504_v2 = vld [vmem:[%s499_s13 + $0x28] sm:$0x7] }
  0x11   : > { %v176_v3 = vshrl.u32 %v154_v0, 16  ;;  %v179_v4 = vshll.u32 %v154_v0, 16  ;;  %v185_v5 = vshrl.u32 %v155_v1, 16  ;;  %v188_v6 = vshll.u32 %v155_v1, 16  ;;  %v156_v7 = vld [vmem:[%s499_s13 + $0x8] sm:$0x7] }
  0x12   : > { %v250_v8 = vshrl.u32 %v504_v2, 16  ;;  %v253_v9 = vshll.u32 %v504_v2, 16  ;;  %v510_v10 = vld [vmem:[%s499_s13 + $0x2c] sm:$0x7]  ;;  %v194_v17 = vshrl.u32 %v156_v7, 16  ;;  %v197_v18 = vshll.u32 %v156_v7, 16 }
  0x13   : > { %v178_v11 = vrot.slane %v176_v3, 4  ;;  %v181_v12 = vrot.slane %v179_v4, 5  ;;  %v187_v13 = vrot.slane %v185_v5, 4  ;;  %v190_v14 = vrot.slane %v188_v6, 5  ;;  %v157_v19 = vld [vmem:[%s499_s13 + $0xc] sm:$0x7] }
  0x14   : > { %v252_v15 = vrot.slane %v250_v8, 4  ;;  %v255_v16 = vrot.slane %v253_v9, 5  ;;  %v259_v22 = vshrl.u32 %v510_v10, 16  ;;  %v262_v23 = vshll.u32 %v510_v10, 16  ;;  %v516_v26 = vld [vmem:[%s499_s13 + $0x30] sm:$0x7] }
  0x15   : > { %v182_v20 = vor.u32 %v181_v12, %v178_v11  ;;  %v191_v21 = vor.u32 %v190_v14, %v187_v13  ;;  %v196_v24 = vrot.slane %v194_v17, 4  ;;  %v199_v25 = vrot.slane %v197_v18, 5  ;;  %v158_v32 = vld [vmem:[%s499_s13 + $0x10] sm:$0x7]  ;;  %v408_v43 = vld [vmem:[%s499_s13 + $0x34] sm:$0x7] }
  0x16   : > { %v203_v27 = vshrl.u32 %v157_v19, 16  ;;  %v261_v30 = vrot.slane %v259_v22, 4  ;;  %v264_v31 = vrot.slane %v262_v23, 5  ;;  %v206_v35 = vshll.u32 %v157_v19, 16  ;;  %v400_v49 = vld [vmem:[%s499_s13 + $0x14] sm:$0x7] }
  0x17   : > { %v183_v28 = vrot.slane %v182_v20, 4  ;;  %v192_v29 = vrot.slane %v191_v21, 4  ;;  %v200_v33 = vor.u32 %v199_v25, %v196_v24  ;;  %v256_v37 = vor.u32 %v255_v16, %v252_v15  ;;  %v401_v50 = vld [vmem:[%s499_s13 + $0x18] sm:$0x7]  ;;  %v403_v18 = vld [vmem:[%s499_s13 + $0x20] sm:$0x7] }
  0x18   : > { %v205_v34 = vrot.slane %v203_v27, 4  ;;  %v268_v39 = vshrl.u32 %v516_v26, 16  ;;  %v208_v41 = vrot.slane %v206_v35, 5  ;;  %v271_v42 = vshll.u32 %v516_v26, 16  ;;  %v409_v21 = vld [vmem:[%s499_s13 + $0x3c] sm:$0x7] }
  0x19   : > { %v215_v36 = vmax.bf16 %v183_v28, %v154_v0  ;;  %v216_v38 = vmax.bf16 %v192_v29, %v155_v1  ;;  %v201_v40 = vrot.slane %v200_v33, 4  ;;  %v224_v44 = vshrl.u32 %v158_v32, 16  ;;  %v402_v0 = vld [vmem:[%s499_s13 + $0x1c] sm:$0x7]  ;;  %v410_v22 = vld [vmem:[%s499_s13 + $0x40] sm:$0x7] }
  0x1a   : > { %v265_v47 = vor.u32 %v264_v31, %v261_v30  ;;  %v270_v48 = vrot.slane %v268_v39, 4  ;;  %v209_v51 = vor.u32 %v208_v41, %v205_v34  ;;  %v273_v53 = vrot.slane %v271_v42, 5  ;;  %v411_v31 = vld [vmem:[%s499_s13 + $0x44] sm:$0x7] }
  0x1b   : > { %v219_v45 = vmax.bf16 %v215_v36, %v155_v1  ;;  %v220_v46 = vmax.bf16 %v216_v38, %v156_v7  ;;  %v217_v52 = vmax.bf16 %v201_v40, %v156_v7  ;;  %v226_v54 = vrot.slane %v224_v44, 4  ;;  %v412_v38 = vld [vmem:[%s499_s13 + $0x48] sm:$0x7] }
  0x1c   : > { %v227_v57 = vshll.u32 %v158_v32, 16  ;;  %v277_v58 = vshrl.u32 %v408_v43, 16  ;;  %v257_v59 = vrot.slane %v256_v37, 4  ;;  %v210_v60 = vrot.slane %v209_v51, 4 }
  0x1d   : > { %v233_v55 = vmax.bf16 %v219_v45, %v192_v29  ;;  %v234_v56 = vmax.bf16 %v220_v46, %v201_v40  ;;  %v221_v61 = vmax.bf16 %v217_v52, %v157_v19  ;;  %v280_v62 = vshll.u32 %v408_v43, 16 }
  0x1e   : > { %v266_v3 = vrot.slane %v265_v47, 4  ;;  %v229_v4 = vrot.slane %v227_v57, 5  ;;  %v274_v6 = vor.u32 %v273_v53, %v270_v48  ;;  %v218_v7 = vmax.bf16 %v210_v60, %v157_v19 }
  0x1f   : > { %v237_v63 = vmax.bf16 %v400_v49, %v233_v55  ;;  %v238_v1 = vmax.bf16 %v401_v50, %v234_v56  ;;  %v235_v5 = vmax.bf16 %v221_v61, %v210_v60  ;;  %v279_v8 = vrot.slane %v277_v58, 4 }
  0x20   : > { %v230_v12 = vor.u32 %v229_v4, %v226_v54  ;;  %v282_v13 = vrot.slane %v280_v62, 5  ;;  %v222_v15 = vmax.bf16 %v218_v7, %v158_v32  ;;  %v275_v19 = vrot.slane %v274_v6, 4 }
  0x21   : > { %v241_v9 = vmax.bf16 %v401_v50, %v237_v63  ;;  %v242_v11 = vmax.bf16 %v402_v0, %v238_v1  ;;  %v239_v14 = vmax.bf16 %v402_v0, %v235_v5 }
  0x22   : > { %v231_v20 = vrot.slane %v230_v12, 4  ;;  %v283_v28 = vor.u32 %v282_v13, %v279_v8 }
  0x23   : > { %v245_v16 = vmax.bf16 %v504_v2, %v241_v9  ;;  %v246_v17 = vmax.bf16 %v510_v10, %v242_v11  ;;  %v243_v23 = vmax.bf16 %v403_v18, %v239_v14  ;;  %v404_v10 = vld [vmem:[%s499_s13 + $0x24] sm:$0x7] }
  0x24   : > { %v236_v27 = vmax.bf16 %v231_v20, %v222_v15  ;;  %v284_v35 = vrot.slane %v283_v28, 4 }
  0x25   : > { %v289_v24 = vmax.bf16 %v257_v59, %v245_v16  ;;  %v290_v25 = vmax.bf16 %v266_v3, %v246_v17  ;;  %v247_v2 = vmax.bf16 %v516_v26, %v243_v23 }
  0x26   : > { %v240_v32 = vmax.bf16 %v403_v18, %v236_v27 }
  0x27   : > { %v293_v29 = vmax.bf16 %v409_v21, %v289_v24  ;;  %v294_v30 = vmax.bf16 %v410_v22, %v290_v25  ;;  %v291_v33 = vmax.bf16 %v275_v19, %v247_v2 }
  0x28   : > { %v244_v34 = vmax.bf16 %v404_v10, %v240_v32 }
  0x29   : > { %298 = vst.msk [vmem:[%s152_s17] sm:$0x3] %vm297_vm0, %v293_v29  ;;  %299 = vst.msk [vmem:[%s152_s17 + $0x2] sm:$0x3] %vm297_vm0, %v294_v30  ;;  %v295_v36 = vmax.bf16 %v411_v31, %v291_v33 }
  0x2a   : > { %v248_v37 = vmax.bf16 %v408_v43, %v244_v34 }
  0x2b   : > { %300 = vst.msk [vmem:[%s152_s17 + $0x4] sm:$0x3] %vm297_vm0, %v295_v36 }
  0x2c   : > { %v292_v39 = vmax.bf16 %v284_v35, %v248_v37 }
  0x2e   : > { %v296_v40 = vmax.bf16 %v412_v38, %v292_v39 }
  0x30   : > { %301 = vst.msk [vmem:[%s152_s17 + $0x6] sm:$0x3] %vm297_vm0, %v296_v40 }
  0x31 PF: > { %s11_s8 = sadd.s32 1, %s463_s8   ;;  %s553_s6 = smov %s459_s7 }
  0x32   : > { %p8_p5 = scmp.ge.s32.totalorder %s11_s8, 4   ;;  %s554_s7 = smov %s556_s9 }
  0x34   :  { %10 = sbr.rel (!%p8_p5) target bundleno = 2 (0x2), region = 57 }

// kernel: spatial_encoder_forward.7
= control target key start
LH: loop header
LB: loop body
LE: loop exit
PB: predicated region body
PF: predicated region fallthrough
CT: control target
= control target key end

     0   :  { %s2701_s15 = smov 0   ;;  %s2703_s16 = smov 0   ;;  %s3273_s0 = inlined_call_operand.vmem [shape: bf16[2,2,88,12], index: 0, kind: input, shape index: {}]   ;;  %s3274_s1 = inlined_call_operand.vmem [shape: bf16[16,12,64], index: 1, kind: input, shape index: {}]   ;;  %s3275_s2 = inlined_call_operand.vmem [shape: f32[1,64], index: 2, kind: input, shape index: {}]   ;;  %s3276_s3 = inlined_call_operand.vmem [shape: f32[1,64], index: 3, kind: input, shape index: {}]   ;;  %s3277_s4 = inlined_call_operand.vmem [shape: bf16[2,2,44,64], index: 4, kind: output, shape index: {}]  }
   0x1   :  { %s2705_s17 = smov 0   ;;  %s2707_s18 = smov 0  }
   0x2   :  { %s2709_s19 = smov 0  }
   0x3 LB: > { %s23_s20 = sadd.s32 1, %s2664_s17  ;;  %s26_s21 = sadd.s32 1, %s2668_s18  ;;  %s2672_s19 = sphi %s2709_s19, %s14_s19   ;;  %s2668_s18 = sphi %s2707_s18, %s3281_s18   ;;  %s2664_s17 = sphi %s2705_s17, %s3280_s17   ;;  %s2660_s16 = sphi %s2703_s16, %s3279_s16   ;;  %s2656_s15 = sphi %s2701_s15, %s3278_s15  }
   0x4   : > { %p24_p0 = scmp.ge.s32.totalorder %s23_s20, 2  ;;  %p2111_p1 = scmp.ge.s32.totalorder %s2672_s19, 1 }
   0x5   : > { %p182_p2 = scmp.lt.s32.totalorder %s2672_s19, 5 }
   0x6   : > { %s3283_s20 = smov (%p24_p0, %s23_s20), 0  ;;  %s3285_s21 = smov (!%p24_p0, %s26_s21), %s2668_s18 }
   0x7   : > { %p183_p3 = pnand %p2111_p1, %p182_p2  ;;  %p28_p4 = scmp.ge.s32.totalorder %s3285_s21, 2 }
   0x8   : > { %p216_p5 = scmp.lt.s32.totalorder (!%p183_p3), %s2660_s16, 1  ;;  %p218_p6 = scmp.lt.s32.totalorder (!%p183_p3), %s2656_s15, 1 }
   0x9   : > { %s3287_s21 = smov (%p28_p4, %s3285_s21), 0  ;;  %186 = sbr.rel (%p183_p3) target bundleno = 425 (0x1a9), region = 36 }
   0xe   : > { %vm301_vm0 = vcmask 1045504   ;;  %v2674_v0 = vmov 0.0   ;;  %v2588_v1 = vld [vmem:[%s3274_s1] sm:$0x3f]   ;;  %vm2675_vm1 = vmmov 0   ;;  %s3289_s16 = smov (!%p216_p5, %s2660_s16), 1 }
   0xf   : > { %2332 = vmatprep.subr.bf16.mxu1 %v2674_v0  ;;  %2318 = vmatprep.subr.bf16.mxu0 %v2674_v0  ;;  %v2589_v2 = vld [vmem:[%s3274_s1 + $0x8] sm:$0x3f]   ;;  %v378_v3 = vsel %vm301_vm0, %v2588_v1, 0  ;;  %s3291_s15 = smov (!%p218_p6, %s2656_s15), 1  ;;  %s2543_s26 = smul.u32 22, %s3289_s16  ;;  %vm291_vm2 = vcmask 97280  }
  0x10   : > { %2334 = vmatprep.mubr.msk.bf16.mxu1 %vm2675_vm1, %v2674_v0  ;;  %2320 = vmatprep.mubr.msk.bf16.mxu0 %vm2675_vm1, %v2674_v0  ;;  %v303_v4 = vsel %vm301_vm0, %v2589_v2, 0  ;;  %s2542_s27 = smul.u32 11, %s3291_s15  ;;  %v2594_v5 = vld [vmem:[%s3274_s1 + $0x18] sm:$0x3f]   ;;  %v2593_v17 = vld [vmem:[%s3274_s1 + $0x10] sm:$0x3f]  }
  0x11   : > { %2333 = vmatpush3.bf16.msra.mxu1 %v378_v3  ;;  %2319 = vmatpush3.bf16.msra.mxu0 %v303_v4  ;;  %v574_v10 = vsel %vm301_vm0, %v2594_v5, 0  ;;  %vm262_vm3 = vsmask.f32 7424  ;;  %v465_v25 = vsel %vm301_vm0, %v2593_v17, 0  ;;  %vm537_vm4 = vsmask.f32 6400 }
  0x12   : > { %2360 = vmatprep.subr.bf16.mxu1 %v2674_v0  ;;  %2346 = vmatprep.subr.bf16.mxu0 %v2674_v0  ;;  %s222_s28 = sadd.s32 %s2543_s26, %s2542_s27  ;;  %v2598_v45 = vld [vmem:[%s3274_s1 + $0x28] sm:$0x3f]   ;;  %vm444_vm5 = vcmask 1046528   ;;  %v2597_v55 = vld [vmem:[%s3274_s1 + $0x20] sm:$0x3f]   ;;  %vm1009_vm6 = vcmask 1044480  }
  0x13   : > { %s2112_s5 = sshll.u32 %s222_s28, 2  ;;  %v797_v50 = vsel %vm301_vm0, %v2598_v45, 0  ;;  %v704_v4 = vsel %vm301_vm0, %v2597_v55, 0  ;;  %vm890_vm7 = vsmask.f32 5376  ;;  %s2544_s23 = smul.u32 6, %s3291_s15 }
  0x14   : > { %s2763_s8 = scalar_lea.vmem %s3273_s0, %s2112_s5  ;;  %vm1219_vm8 = vsmask.f32 4352  ;;  %s2545_s24 = smul.u32 12, %s3289_s16  ;;  %vm2004_vm9 = vcmask 519168   ;;  %vm2010_vm10 = vcmask 517120  }
  0x15   : > { %v235_v6 = vld [vmem:[%s2763_s8] sm:$0xf]  ;;  %v236_v7 = vld [vmem:[%s2763_s8 + $0x4] sm:$0xf]  ;;  %v2768_v9 = vld [vmem:[%s2763_s8 + $0x8] sm:$0xff]  }
  0x16   : > { %v2116_v8 = vcombine.low %v235_v6, %v236_v7  ;;  %v239_v11 = vld [vmem:[%s2763_s8 + $0x10] sm:$0xf]  ;;  %v243_v12 = vld [vmem:[%s2763_s8 + $0x14] sm:$0x7]  ;;  %v437_v15 = vld [vmem:[%s2763_s8] sm:$0xe]  ;;  %s231_s15 = sadd.s32 %s2545_s24, %s2544_s23 }
  0x17   : > { %v271_v16 = vshll.u32 %v2768_v9, 16  ;;  %v2781_v18 = vcombine.low %v239_v11, %v243_v12  ;;  %v2130_v21 = vcombine.low %v437_v15, %v236_v7  ;;  %v275_v23 = vshrl.u32 %v2768_v9, 16  ;;  %v240_v31 = vld [vmem:[%s2763_s8 + $0x14] sm:$0x3]  ;;  %v639_v53 = vld [vmem:[%s2763_s8 + $0x4] sm:$0xe] }
  0x18   : > { %2335 = vmatmul.mubr.msk.bf16.vlgmr.msra.gmra.mxu1 %vm291_vm2, %v2116_v8  ;;  %v264_v13 = vshrl.u32 %v2116_v8, 16  ;;  %v266_v14 = vshll.u32 %v2116_v8, 16  ;;  %v530_v32 = vld [vmem:[%s2763_s8 + $0x14] sm:$0xf]  ;;  %v2123_v35 = vcombine.low %v239_v11, %v240_v31  ;;  %v446_v52 = vrot.slane %v2768_v9, 1  ;;  %v2825_v58 = vld [vmem:[%s2763_s8 + $0xc] sm:$0xff]  }
  0x19   : > { %2361 = vmatpush3.bf16.msra.mxu1 %v574_v10  ;;  %2338 = vmatprep.mubr.msk.bf16.mxu1 %vm2675_vm1, %v2674_v0  ;;  %v273_v20 = vrot.slane %v271_v16, 1  ;;  %v279_v24 = vshll.u32 %v2781_v18, 16  ;;  %v539_v27 = vshrl.u32 %v2130_v21, 16  ;;  %v542_v30 = vshll.u32 %v2130_v21, 16  ;;  %v640_v54 = vld [vmem:[%s2763_s8 + $0x8] sm:$0xf] }
  0x1a   : > { %v268_v19 = vrot.slane %v266_v14, 1  ;;  %2388 = vmatprep.subr.bf16.mxu1 %v2674_v0  ;;  %v547_v37 = vrot.slane %v271_v16, 2  ;;  %v546_v38 = vrot.slane %v275_v23, 1  ;;  %v2137_v39 = vcombine.low %v239_v11, %v530_v32  ;;  %v769_v57 = vld [vmem:[%s2763_s8 + $0x4] sm:$0xc]  ;;  %v2860_v16 = vld [vmem:[%s2763_s8 + $0x18] sm:$0xff]  }
  0x1b   : > { %v277_v28 = vor.u32 %v275_v23, %v273_v20  ;;  %v281_v29 = vrot.slane %v279_v24, 1  ;;  %v541_v33 = vrot.slane %v539_v27, 1  ;;  %v544_v36 = vrot.slane %v542_v30, 2  ;;  %v2829_v59 = vld [vmem:[%s2763_s8 + $0xc] sm:$0xf]  ;;  %s2113_s28 = sshll.u32 %s231_s15, 2 }
  0x1c   : > { %v269_v22 = vor.u32 %v268_v19, %v264_v13  ;;  %v283_v40 = vshrl.u32 %v2781_v18, 16  ;;  %v548_v42 = vor.u32 %v547_v37, %v546_v38  ;;  %v551_v43 = vshrl.u32 %v2137_v39, 16  ;;  %v2832_v61 = vld [vmem:[%s2763_s8 + $0x10] sm:$0xf]  ;;  %v2836_v1 = vld [vmem:[%s2763_s8 + $0x14] sm:$0xf]  ;;  %s3232_s5 = scalar_lea.vmem %s3277_s4, %s2113_s28 }
  0x1d   : > { %v282_v34 = vsel %vm262_vm3, %v277_v28, %v281_v29  ;;  %v545_v41 = vor.u32 %v544_v36, %v541_v33  ;;  %v554_v44 = vshll.u32 %v2137_v39, 16  ;;  %v445_v51 = vrot.slane %v2130_v21, 1  ;;  %v2839_v2 = vld [vmem:[%s2763_s8 + $0x18] sm:$0xf]  ;;  %v1421_v15 = vld [vmem:[%s2763_s8 + $0x20] sm:$0x7] }
  0x1e   : > { %v274_v26 = vsel %vm262_vm3, %v269_v22, %v273_v20  ;;  %v285_v46 = vor.u32 %v283_v40, %v281_v29  ;;  %v553_v48 = vrot.slane %v551_v43, 1  ;;  %v2144_v60 = vcombine.low %v639_v53, %v640_v54  ;;  %v2868_v19 = vld [vmem:[%s2763_s8 + $0x1c] sm:$0xf]  ;;  %v1530_v21 = vld [vmem:[%s2763_s8 + $0x14] sm:$0xf] }
  0x1f   : > { %2321 = vmatmul.mubr.msk.bf16.vlgmr.msra.gmra.mxu0 %vm291_vm2, %v274_v26  ;;  %v549_v47 = vsel %vm537_vm4, %v545_v41, %v548_v42  ;;  %v556_v49 = vrot.slane %v554_v44, 2  ;;  %v447_v62 = vsel %vm444_vm5, %v445_v51, %v446_v52  ;;  %v2153_v63 = vcombine.low %v769_v57, %v640_v54  ;;  %v2604_v22 = vld [vmem:[%s3274_s1 + $0x38] sm:$0x3f]   ;;  %v1656_v28 = vld [vmem:[%s2763_s8 + $0x10] sm:$0xe] }
  0x20   : > { %2347 = vmatpush3.bf16.msra.mxu0 %v465_v25  ;;  %2339 = vmatmul.mubr.msk.bf16.gmra.mxu1 %vm291_vm2, %v2768_v9  ;;  %v2843_v3 = vcombine.low %v2829_v59, %v2832_v61  ;;  %v2849_v6 = vcombine.low %v2836_v1, %v2839_v2  ;;  %v448_v7 = vrot.slane %v2781_v18, 1  ;;  %v778_v8 = vrot.slane %v2825_v58, 2  ;;  %v1529_v29 = vld [vmem:[%s2763_s8 + $0x10] sm:$0xf]  ;;  %v1533_v45 = vld [vmem:[%s2763_s8 + $0x20] sm:$0xf] }
  0x21   : > { %2324 = vmatprep.mubr.msk.bf16.mxu0 %vm2675_vm1, %v2674_v0  ;;  %2342 = vmatprep.mubr.msk.bf16.mxu1 %vm2675_vm1, %v2674_v0  ;;  %v557_v56 = vor.u32 %v556_v49, %v553_v48  ;;  %v664_v9 = vshrl.u32 %v2144_v60, 16  ;;  %v667_v10 = vshll.u32 %v2144_v60, 16  ;;  %v672_v11 = vshrl.u32 %v2825_v58, 16  ;;  %v1534_v51 = vld [vmem:[%s2763_s8 + $0x24] sm:$0x7] }
  0x22   : > { %2374 = vmatprep.subr.bf16.mxu0 %v2674_v0  ;;  %v777_v12 = vrot.slane %v2153_v63, 2  ;;  %v1428_v13 = vshrl.u32 %v2843_v3, 16  ;;  %v1430_v14 = vshll.u32 %v2843_v3, 16  ;;  %v675_v17 = vshll.u32 %v2825_v58, 16  ;;  %v863_v58 = vld [vmem:[%s2763_s8 + $0x8] sm:$0xf] }
  0x23   : > { %v558_v5 = vsel %vm537_vm4, %v548_v42, %v557_v56  ;;  %v1434_v20 = vshll.u32 %v2849_v6, 16  ;;  %v2877_v24 = vcombine.low %v2868_v19, %v1421_v15  ;;  %v1438_v25 = vshrl.u32 %v2849_v6, 16 }
  0x24   : > { %v1432_v23 = vrot.slane %v1430_v14, 1  ;;  %v2880_v26 = vrot.slane %v664_v9, 1  ;;  %v449_v30 = vsel %vm444_vm5, %v446_v52, %v448_v7  ;;  %v1664_v33 = vrot.slane %v2860_v16, 1  ;;  %v1856_v52 = vld [vmem:[%s2763_s8 + $0x10] sm:$0xc] }
  0x25   : > { %v1436_v27 = vrot.slane %v1434_v20, 1  ;;  %v1442_v32 = vshll.u32 %v2877_v24, 16  ;;  %v2210_v36 = vcombine.low %v1529_v29, %v1530_v21  ;;  %v1561_v37 = vshll.u32 %v2860_v16, 16 }
  0x26   : > { %v1433_v31 = vor.u32 %v1432_v23, %v1428_v13  ;;  %v2890_v38 = vrot.slane %v667_v10, 2  ;;  %v674_v39 = vrot.slane %v672_v11, 1  ;;  %v677_v48 = vrot.slane %v675_v17, 2 }
  0x27   : > { %2325 = vmatmul.mubr.msk.bf16.gmra.mxu0 %vm291_vm2, %v282_v34  ;;  %v1440_v34 = vor.u32 %v1438_v25, %v1436_v27  ;;  %v2895_v41 = vrot.slane %v1442_v32, 1  ;;  %v1554_v43 = vshrl.u32 %v2210_v36, 16  ;;  %v1556_v44 = vshll.u32 %v2210_v36, 16 }
  0x28   : > { %2343 = vmatmul.mubr.msk.bf16.gmra.mxu1 %vm291_vm2, %v2123_v35  ;;  %2328 = vmatprep.mubr.msk.bf16.mxu0 %vm2675_vm1, %v2674_v0  ;;  %v2219_v35 = vcombine.low %v1656_v28, %v1530_v21  ;;  %v2893_v40 = vsel %vm262_vm3, %v1433_v31, %v1436_v27  ;;  %v1032_v49 = vsel %vm301_vm0, %v2604_v22, 0  ;;  %v1563_v55 = vrot.slane %v1561_v37, 1  ;;  %v1748_v22 = vld [vmem:[%s2763_s8 + $0x24] sm:$0xf] }
  0x29   : > { %2362 = vmatprep.mubr.msk.bf16.mxu1 %vm2675_vm1, %v2674_v0  ;;  %v1558_v54 = vrot.slane %v1556_v44, 1  ;;  %v2233_v60 = vcombine.low %v1856_v52, %v1530_v21  ;;  %v1764_v15 = vrot.slane %v1561_v37, 2  ;;  %v670_v17 = vor.u32 %v2890_v38, %v2880_v26  ;;  %v1002_v52 = vld [vmem:[%s2763_s8 + $0x4] sm:$0x8] }
  0x2a   : > { %v1663_v42 = vrot.slane %v2219_v35, 1  ;;  %v1756_v63 = vshrl.u32 %v2219_v35, 16  ;;  %v1759_v14 = vshll.u32 %v2219_v35, 16  ;;  %v2940_v28 = vcombine.low %v1533_v45, %v1748_v22 }
  0x2b   : > { %v678_v26 = vor.u32 %v677_v48, %v674_v39 }
  0x2c   : > { %v2916_v53 = vsel %vm444_vm5, %v1663_v42, %v1664_v33  ;;  %v1758_v13 = vrot.slane %v1756_v63, 1  ;;  %v1761_v25 = vrot.slane %v1759_v14, 2  ;;  %v1771_v18 = vshll.u32 %v2940_v28, 16 }
  0x2d   : > { %v679_v42 = vsel %vm537_vm4, %v670_v17, %v678_v26  ;;  %v2611_v17 = vld [vmem:[%s2763_s8 + $0x14] sm:$0xff]  }
  0x2e   : > { %v1762_v32 = vor.u32 %v1761_v25, %v1758_v13  ;;  %v1773_v39 = vrot.slane %v1771_v18, 2  ;;  %v1097_v18 = vld [vmem:[%s2763_s8 + $0x8] sm:$0x8] }
  0x2f   : > { %2329 = vmatmul.mubr.msk.bf16.gmra.mxu0 %vm291_vm2, %v285_v46  ;;  %v1565_v46 = vshrl.u32 %v2860_v16, 16 }
  0x30   : > { %2363 = vmatmul.mubr.msk.bf16.vlgmr.msra.gmra.mxu1 %vm291_vm2, %v549_v47  ;;  %2348 = vmatprep.mubr.msk.bf16.mxu0 %vm2675_vm1, %v2674_v0  ;;  %v779_v47 = vsel %vm301_vm0, %v777_v12, %v778_v8  ;;  %v1863_v12 = vrot.slane %v2233_v60, 2 }
  0x31   : > { %2389 = vmatpush3.bf16.msra.mxu1 %v797_v50  ;;  %2366 = vmatprep.mubr.msk.bf16.mxu1 %vm2675_vm1, %v2674_v0  ;;  %v2909_v50 = vsel %vm262_vm3, %v1440_v34, %v2895_v41  ;;  %v1763_v57 = vrot.slane %v1565_v46, 1  ;;  %v1567_v10 = vor.u32 %v1565_v46, %v1563_v55  ;;  %v1768_v34 = vshrl.u32 %v2940_v28, 16 }
  0x32   : > { %2416 = vmatprep.subr.bf16.mxu1 %v2674_v0 }
  0x33   : > { %v1765_v27 = vor.u32 %v1764_v15, %v1763_v57  ;;  %v1770_v38 = vrot.slane %v1768_v34, 1  ;;  %v2170_v57 = vcombine.low %v1002_v52, %v863_v58  ;;  %v1013_v34 = vrot.slane %v2611_v17, 3 }
  0x35   : > { %v2962_v36 = vsel %vm537_vm4, %v1762_v32, %v1765_v27  ;;  %v912_v32 = vshll.u32 %v2611_v17, 16 }
  0x37   : > { %2349 = vmatmul.mubr.msk.bf16.vlgmr.msra.gmra.mxu0 %vm291_vm2, %v447_v62  ;;  %v1864_v62 = vrot.slane %v2860_v16, 2 }
  0x38   : > { %2375 = vmatpush3.bf16.msra.mxu0 %v704_v4  ;;  %2367 = vmatmul.mubr.msk.bf16.gmra.mxu1 %vm291_vm2, %v558_v5  ;;  %v2605_v4 = vld [vmem:[%s2763_s8 + $0x14] sm:$0xff]   ;;  %v1559_v5 = vor.u32 %v1558_v54, %v1554_v43 }
  0x39   : > { %2352 = vmatprep.mubr.msk.bf16.mxu0 %vm2675_vm1, %v2674_v0  ;;  %2370 = vmatprep.mubr.msk.bf16.mxu1 %vm2675_vm1, %v2674_v0  ;;  %v2938_v23 = vsel %vm301_vm0, %v1863_v12, %v1864_v62  ;;  %v681_v29 = vshrl.u32 %v2605_v4, 16  ;;  %v780_v35 = vrot.slane %v2605_v4, 2 }
  0x3a   : > { %2402 = vmatprep.subr.bf16.mxu0 %v2674_v0  ;;  %v2927_v20 = vsel %vm262_vm3, %v1559_v5, %v1563_v55  ;;  %v2607_v55 = vld [vmem:[%s2763_s8 + $0xc] sm:$0xff]   ;;  %v1010_v5 = vrot.slane %v2170_v57, 3 }
  0x3b   : > { %v683_v43 = vrot.slane %v681_v29, 1  ;;  %v900_v63 = vshrl.u32 %v2607_v55, 16  ;;  %v2609_v29 = vld [vmem:[%s3274_s1 + $0x40] sm:$0x3f]  }
  0x3d   : > { %v902_v14 = vrot.slane %v900_v63, 2 }
  0x3f   : > { %2353 = vmatmul.mubr.msk.bf16.gmra.mxu0 %vm291_vm2, %v449_v30  ;;  %v684_v30 = vshll.u32 %v2605_v4, 16  ;;  %v903_v4 = vshll.u32 %v2607_v55, 16 }
  0x40   : > { %2371 = vmatmul.mubr.msk.bf16.gmra.mxu1 %vm291_vm2, %v557_v56  ;;  %2356 = vmatprep.mubr.msk.bf16.mxu0 %vm2675_vm1, %v2674_v0  ;;  %v2918_v56 = vcombine.low %v1533_v45, %v1534_v51  ;;  %v2970_v45 = vor.u32 %v1773_v39, %v1770_v38  ;;  %v862_v51 = vld [vmem:[%s2763_s8 + $0x4] sm:$0xc]  ;;  %v914_v38 = vrot.slane %v912_v32, 3  ;;  %v2612_v39 = vld [vmem:[%s2763_s8 + $0x1c] ss:$0 sps:$4 sm:$0x11]  }
  0x41   : > { %2390 = vmatprep.mubr.msk.bf16.mxu1 %vm2675_vm1, %v2674_v0  ;;  %v686_v44 = vrot.slane %v684_v30, 2  ;;  %v2160_v54 = vcombine.low %v862_v51, %v863_v58  ;;  %v905_v15 = vrot.slane %v903_v4, 3  ;;  %v909_v30 = vshrl.u32 %v2611_v17, 16 }
  0x42   : > { %v1666_v9 = vrot.slane %v2918_v56, 1  ;;  %v1569_v11 = vshll.u32 %v2918_v56, 16  ;;  %v2978_v48 = vsel %vm537_vm4, %v1765_v27, %v2970_v45 }
  0x43   : > { %v892_v60 = vshrl.u32 %v2160_v54, 16 }
  0x44   : > { %v2932_v16 = vsel %vm444_vm5, %v1664_v33, %v1666_v9  ;;  %v2934_v21 = vrot.slane %v1569_v11, 1  ;;  %v1866_v33 = vrot.slane %v2940_v28, 2  ;;  %v2610_v11 = vld [vmem:[%s3274_s1 + $0x48] sm:$0x3f]  }
  0x45   : > { %v894_v12 = vrot.slane %v892_v60, 2  ;;  %v1270_v25 = vsel %vm301_vm0, %v2610_v11, 0 }
  0x46   : > { %v2947_v31 = vsel %vm262_vm3, %v1567_v10, %v2934_v21  ;;  %v2967_v37 = vsel %vm301_vm0, %v1864_v62, %v1866_v33  ;;  %v895_v62 = vshll.u32 %v2160_v54, 16  ;;  %v1011_v10 = vrot.slane %v2607_v55, 3 }
  0x47   : > { %2357 = vmatmul.mubr.msk.bf16.gmra.mxu0 %vm291_vm2, %v448_v7  ;;  %v2603_v7 = vld [vmem:[%s3274_s1 + $0x30] sm:$0x3f]  }
  0x48   : > { %2391 = vmatmul.mubr.msk.bf16.vlgmr.msra.gmra.mxu1 %vm291_vm2, %v779_v47  ;;  %2376 = vmatprep.mubr.msk.bf16.mxu0 %vm2675_vm1, %v2674_v0  ;;  %v937_v46 = vsel %vm301_vm0, %v2603_v7, 0  ;;  %v781_v47 = vsel %vm301_vm0, %v778_v8, %v780_v35  ;;  %v897_v13 = vrot.slane %v895_v62, 3  ;;  %v1012_v22 = vsel %vm1009_vm6, %v1010_v5, %v1011_v10 }
  0x49   : > { %2417 = vmatpush3.bf16.msra.mxu1 %v1032_v49  ;;  %2394 = vmatprep.mubr.msk.bf16.mxu1 %vm2675_vm1, %v2674_v0  ;;  %v687_v49 = vor.u32 %v686_v44, %v683_v43  ;;  %v1147_v43 = vsel %vm301_vm0, %v2609_v29, 0  ;;  %v1014_v44 = vsel %vm1009_vm6, %v1011_v10, %v1013_v34  ;;  %v2179_v62 = vcombine.low %v2839_v2, %v2868_v19  ;;  %v2616_v2 = vld [vmem:[%s3274_s1 + $0x58] sm:$0x3f]   ;;  %v2615_v29 = vld [vmem:[%s3274_s1 + $0x50] sm:$0x3f]  }
  0x4a   : > { %2444 = vmatprep.subr.bf16.mxu1 %v2674_v0  ;;  %v898_v27 = vor.u32 %v897_v13, %v894_v12  ;;  %v3047_v12 = vld [vmem:[%s2763_s8 + $0x20] sm:$0x3] }
  0x4b   : > { %v688_v8 = vsel %vm537_vm4, %v678_v26, %v687_v49  ;;  %v906_v26 = vor.u32 %v905_v15, %v902_v14  ;;  %v1238_v10 = vshrl.u32 %v2179_v62, 16  ;;  %v1241_v11 = vshll.u32 %v2179_v62, 16 }
  0x4d   : > { %v907_v7 = vsel %vm890_vm7, %v898_v27, %v906_v26  ;;  %v1240_v15 = vrot.slane %v1238_v10, 3  ;;  %v1243_v17 = vrot.slane %v1241_v11, 4 }
  0x4f   : > { %2377 = vmatmul.mubr.msk.bf16.vlgmr.msra.gmra.mxu0 %vm291_vm2, %v679_v42  ;;  %v2177_v42 = vcombine.low %v1097_v18, %v2829_v59 }
  0x50   : > { %2403 = vmatpush3.bf16.msra.mxu0 %v937_v46  ;;  %2395 = vmatmul.mubr.msk.bf16.gmra.mxu1 %vm291_vm2, %v781_v47  ;;  %v3022_v46 = vcombine.low %v2832_v61, %v2836_v1 }
  0x51   : > { %2380 = vmatprep.mubr.msk.bf16.mxu0 %vm2675_vm1, %v2674_v0  ;;  %2398 = vmatprep.mubr.msk.bf16.mxu1 %vm2675_vm1, %v2674_v0  ;;  %v1221_v51 = vshrl.u32 %v2177_v42, 16  ;;  %v1224_v59 = vshll.u32 %v2177_v42, 16  ;;  %v1125_v27 = vrot.slane %v2177_v42, 3  ;;  %v1128_v42 = vrot.slane %v2179_v62, 3 }
  0x52   : > { %2430 = vmatprep.subr.bf16.mxu0 %v2674_v0  ;;  %v1229_v58 = vshrl.u32 %v3022_v46, 16  ;;  %v1232_v61 = vshll.u32 %v3022_v46, 16 }
  0x53   : > { %v1223_v54 = vrot.slane %v1221_v51, 3  ;;  %v1226_v55 = vrot.slane %v1224_v59, 4  ;;  %v2623_v51 = vld [vmem:[%s3274_s1 + $0x68] sm:$0x3f]  }
  0x54   : > { %v1231_v57 = vrot.slane %v1229_v58, 3  ;;  %v1234_v60 = vrot.slane %v1232_v61, 4  ;;  %v1683_v58 = vsel %vm301_vm0, %v2623_v51, 0  ;;  %v2622_v61 = vld [vmem:[%s3274_s1 + $0x60] sm:$0x3f]  }
  0x55   : > { %v1227_v4 = vor.u32 %v1226_v55, %v1223_v54 }
  0x56   : > { %v1235_v5 = vor.u32 %v1234_v60, %v1231_v57 }
  0x57   : > { %2381 = vmatmul.mubr.msk.bf16.gmra.mxu0 %vm291_vm2, %v688_v8  ;;  %v918_v8 = vshll.u32 %v2612_v39, 16 }
  0x58   : > { %2399 = vmatmul.mubr.msk.bf16.gmra.mxu1 %vm291_vm2, %v780_v35  ;;  %2384 = vmatprep.mubr.msk.bf16.mxu0 %vm2675_vm1, %v2674_v0  ;;  %v911_v35 = vrot.slane %v909_v30, 2  ;;  %v1236_v14 = vsel %vm1219_vm8, %v1227_v4, %v1235_v5  ;;  %v1244_v30 = vor.u32 %v1243_v17, %v1240_v15 }
  0x59   : > { %2418 = vmatprep.mubr.msk.bf16.mxu1 %vm2675_vm1, %v2674_v0  ;;  %v920_v63 = vrot.slane %v918_v8, 3 }
  0x5a   : > { %v915_v47 = vor.u32 %v914_v38, %v911_v35  ;;  %v1245_v35 = vsel %vm1219_vm8, %v1235_v5, %v1244_v30 }
  0x5c   : > { %v916_v1 = vsel %vm890_vm7, %v906_v26, %v915_v47  ;;  %v921_v13 = vsel %vm890_vm7, %v915_v47, %v920_v63  ;;  %v1126_v26 = vrot.slane %v3022_v46, 3  ;;  %v2620_v46 = vld [vmem:[%s2763_s8 + $0x20] ss:$0 sps:$4 sm:$0x11]  }
  0x5e   : > { %v1127_v18 = vsel %vm1009_vm6, %v1125_v27, %v1126_v26 }
  0x5f   : > { %2385 = vmatmul.mubr.msk.bf16.gmra.mxu0 %vm291_vm2, %v687_v49  ;;  %v1015_v49 = vrot.slane %v2612_v39, 3 }
  0x60   : > { %2419 = vmatmul.mubr.msk.bf16.vlgmr.msra.gmra.mxu1 %vm291_vm2, %v1012_v22  ;;  %2404 = vmatprep.mubr.msk.bf16.mxu0 %vm2675_vm1, %v2674_v0  ;;  %v2187_v22 = vcombine.low %v3047_v12, %v3047_v12 }
  0x61   : > { %2445 = vmatpush3.bf16.msra.mxu1 %v1270_v25  ;;  %2422 = vmatprep.mubr.msk.bf16.mxu1 %vm2675_vm1, %v2674_v0  ;;  %v1016_v52 = vsel %vm1009_vm6, %v1013_v34, %v1015_v49  ;;  %v1464_v25 = vsel %vm301_vm0, %v2616_v2, 0  ;;  %v1130_v49 = vrot.slane %v2620_v46, 3 }
  0x62   : > { %2472 = vmatprep.subr.bf16.mxu1 %v2674_v0  ;;  %v1247_v32 = vshrl.u32 %v2187_v22, 16  ;;  %v1250_v34 = vshll.u32 %v2187_v22, 16 }
  0x63   : > { %v1131_v59 = vsel %vm1009_vm6, %v1128_v42, %v1130_v49 }
  0x64   : > { %v1249_v38 = vrot.slane %v1247_v32, 3  ;;  %v1252_v39 = vrot.slane %v1250_v34, 4 }
  0x67   : > { %2405 = vmatmul.mubr.msk.bf16.vlgmr.msra.gmra.mxu0 %vm291_vm2, %v907_v7  ;;  %v1356_v7 = vsel %vm301_vm0, %v2615_v29, 0 }
  0x68   : > { %2431 = vmatpush3.bf16.msra.mxu0 %v1147_v43  ;;  %2423 = vmatmul.mubr.msk.bf16.gmra.mxu1 %vm291_vm2, %v1014_v44  ;;  %v1253_v43 = vor.u32 %v1252_v39, %v1249_v38  ;;  %v1129_v44 = vsel %vm1009_vm6, %v1126_v26, %v1128_v42 }
  0x69   : > { %2408 = vmatprep.mubr.msk.bf16.mxu0 %vm2675_vm1, %v2674_v0  ;;  %2426 = vmatprep.mubr.msk.bf16.mxu1 %vm2675_vm1, %v2674_v0 }
  0x6a   : > { %2458 = vmatprep.subr.bf16.mxu0 %v2674_v0  ;;  %v1254_v47 = vsel %vm1219_vm8, %v1244_v30, %v1253_v43 }
  0x6f   : > { %2409 = vmatmul.mubr.msk.bf16.gmra.mxu0 %vm291_vm2, %v916_v1  ;;  %v1591_v1 = vsel %vm301_vm0, %v2622_v61, 0 }
  0x70   : > { %2427 = vmatmul.mubr.msk.bf16.gmra.mxu1 %vm291_vm2, %v1016_v52  ;;  %2412 = vmatprep.mubr.msk.bf16.mxu0 %vm2675_vm1, %v2674_v0 }
  0x71   : > { %2446 = vmatprep.mubr.msk.bf16.mxu1 %vm2675_vm1, %v2674_v0 }
  0x77   : > { %2413 = vmatmul.mubr.msk.bf16.gmra.mxu0 %vm291_vm2, %v921_v13 }
  0x78   : > { %2447 = vmatmul.mubr.msk.bf16.vlgmr.msra.gmra.mxu1 %vm291_vm2, %v1236_v14  ;;  %2432 = vmatprep.mubr.msk.bf16.mxu0 %vm2675_vm1, %v2674_v0 }
  0x79   : > { %2473 = vmatpush3.bf16.msra.mxu1 %v1464_v25  ;;  %2450 = vmatprep.mubr.msk.bf16.mxu1 %vm2675_vm1, %v2674_v0 }
  0x7a   : > { %2500 = vmatprep.subr.bf16.mxu1 %v2674_v0 }
  0x7f   : > { %2433 = vmatmul.mubr.msk.bf16.vlgmr.msra.gmra.mxu0 %vm291_vm2, %v1127_v18 }
  0x80   : > { %2459 = vmatpush3.bf16.msra.mxu0 %v1356_v7  ;;  %2451 = vmatmul.mubr.msk.bf16.gmra.mxu1 %vm291_vm2, %v1245_v35 }
  0x81   : > { %2436 = vmatprep.mubr.msk.bf16.mxu0 %vm2675_vm1, %v2674_v0  ;;  %2454 = vmatprep.mubr.msk.bf16.mxu1 %vm2675_vm1, %v2674_v0 }
  0x82   : > { %2486 = vmatprep.subr.bf16.mxu0 %v2674_v0 }
  0x87   : > { %2437 = vmatmul.mubr.msk.bf16.gmra.mxu0 %vm291_vm2, %v1129_v44 }
  0x88   : > { %2455 = vmatmul.mubr.msk.bf16.gmra.mxu1 %vm291_vm2, %v1254_v47  ;;  %2440 = vmatprep.mubr.msk.bf16.mxu0 %vm2675_vm1, %v2674_v0 }
  0x89   : > { %2474 = vmatprep.mubr.msk.bf16.mxu1 %vm2675_vm1, %v2674_v0 }
  0x8f   : > { %2441 = vmatmul.mubr.msk.bf16.gmra.mxu0 %vm291_vm2, %v1131_v59 }
  0x90   : > { %2475 = vmatmul.mubr.msk.bf16.vlgmr.msra.gmra.mxu1 %vm291_vm2, %v2893_v40  ;;  %2460 = vmatprep.mubr.msk.bf16.mxu0 %vm2675_vm1, %v2674_v0  ;;  %v1446_v40 = vshrl.u32 %v2877_v24, 16  ;;  %v2196_v24 = vcombine.low %v2868_v19, %v3047_v12 }
  0x91   : > { %2501 = vmatpush3.bf16.msra.mxu1 %v1683_v58  ;;  %2478 = vmatprep.mubr.msk.bf16.mxu1 %vm2675_vm1, %v2674_v0 }
  0x92   : > { %2528 = vmatprep.subr.bf16.mxu1 %v2674_v0  ;;  %v1448_v52 = vor.u32 %v1446_v40, %v2895_v41 }
  0x97   : > { %2461 = vmatmul.mubr.msk.bf16.vlgmr.msra.gmra.mxu0 %vm291_vm2, %v2843_v3  ;;  %v2630_v3 = vld [vmem:[%s3274_s1 + $0x78] sm:$0x3f]  }
  0x98   : > { %2487 = vmatpush3.bf16.msra.mxu0 %v1591_v1  ;;  %2479 = vmatmul.mubr.msk.bf16.gmra.mxu1 %vm291_vm2, %v2909_v50  ;;  %v1883_v41 = vsel %vm301_vm0, %v2630_v3, 0  ;;  %v1573_v50 = vshrl.u32 %v2918_v56, 16 }
  0x99   : > { %2464 = vmatprep.mubr.msk.bf16.mxu0 %vm2675_vm1, %v2674_v0  ;;  %2482 = vmatprep.mubr.msk.bf16.mxu1 %vm2675_vm1, %v2674_v0 }
  0x9a   : > { %2514 = vmatprep.subr.bf16.mxu0 %v2674_v0 }
  0x9f   : > { %2465 = vmatmul.mubr.msk.bf16.gmra.mxu0 %vm291_vm2, %v2849_v6  ;;  %v2629_v6 = vld [vmem:[%s3274_s1 + $0x70] sm:$0x3f]  }
  0xa0   : > { %2483 = vmatmul.mubr.msk.bf16.gmra.mxu1 %vm291_vm2, %v1448_v52  ;;  %2468 = vmatprep.mubr.msk.bf16.mxu0 %vm2675_vm1, %v2674_v0  ;;  %v1791_v19 = vsel %vm301_vm0, %v2629_v6, 0 }
  0xa1   : > { %2502 = vmatprep.mubr.msk.bf16.mxu1 %vm2675_vm1, %v2674_v0 }
  0xa7   : > { %2469 = vmatmul.mubr.msk.bf16.gmra.mxu0 %vm291_vm2, %v2196_v24 }
  0xa8   : > { %2503 = vmatmul.mubr.msk.bf16.vlgmr.msra.gmra.mxu1 %vm291_vm2, %v2916_v53  ;;  %2488 = vmatprep.mubr.msk.bf16.mxu0 %vm2675_vm1, %v2674_v0  ;;  %v1575_v53 = vor.u32 %v1573_v50, %v2934_v21 }
  0xa9   : > { %2529 = vmatpush3.bf16.msra.mxu1 %v1883_v41  ;;  %2506 = vmatprep.mubr.msk.bf16.mxu1 %vm2675_vm1, %v2674_v0 }
  0xaf   : > { %2489 = vmatmul.mubr.msk.bf16.vlgmr.msra.gmra.mxu0 %vm291_vm2, %v2927_v20 }
  0xb0   : > { %2515 = vmatpush3.bf16.msra.mxu0 %v1791_v19  ;;  %2507 = vmatmul.mubr.msk.bf16.gmra.mxu1 %vm291_vm2, %v2932_v16 }
  0xb1   : > { %2492 = vmatprep.mubr.msk.bf16.mxu0 %vm2675_vm1, %v2674_v0  ;;  %2510 = vmatprep.mubr.msk.bf16.mxu1 %vm2675_vm1, %v2674_v0 }
  0xb7   : > { %2493 = vmatmul.mubr.msk.bf16.gmra.mxu0 %vm291_vm2, %v2947_v31 }
  0xb8   : > { %2511 = vmatmul.mubr.msk.bf16.gmra.mxu1 %vm291_vm2, %v1666_v9  ;;  %2496 = vmatprep.mubr.msk.bf16.mxu0 %vm2675_vm1, %v2674_v0 }
  0xb9   : > { %2530 = vmatprep.mubr.msk.bf16.mxu1 %vm2675_vm1, %v2674_v0 }
  0xbf   : > { %2497 = vmatmul.mubr.msk.bf16.gmra.mxu0 %vm291_vm2, %v1575_v53 }
  0xc0   : > { %2531 = vmatmul.mubr.msk.bf16.vlgmr.msra.gmra.mxu1 %vm291_vm2, %v2938_v23  ;;  %2516 = vmatprep.mubr.msk.bf16.mxu0 %vm2675_vm1, %v2674_v0 }
  0xc1   : > { %2534 = vmatprep.mubr.msk.bf16.mxu1 %vm2675_vm1, %v2674_v0 }
  0xc7   : > { %2517 = vmatmul.mubr.msk.bf16.vlgmr.msra.gmra.mxu0 %vm291_vm2, %v2962_v36 }
  0xc8   : > { %2535 = vmatmul.mubr.msk.bf16.gmra.mxu1 %vm291_vm2, %v2967_v37  ;;  %2520 = vmatprep.mubr.msk.bf16.mxu0 %vm2675_vm1, %v2674_v0 }
  0xc9   : > { %2538 = vmatprep.mubr.msk.bf16.mxu1 %vm2675_vm1, %v2674_v0 }
  0xcf   : > { %2521 = vmatmul.mubr.msk.bf16.gmra.mxu0 %vm291_vm2, %v2978_v48 }
  0xd0   : > { %2539 = vmatmul.mubr.msk.bf16.gmra.mxu1 %vm291_vm2, %v1866_v33  ;;  %2524 = vmatprep.mubr.msk.bf16.mxu0 %vm2675_vm1, %v2674_v0 }
  0xd7   : > { %2525 = vmatmul.mubr.msk.bf16.gmra.mxu0 %vm291_vm2, %v2970_v45 }
  0xd8   : > { %v414_v56 = vpop.f32.mrf.mxu1 }
  0xda   : > { %v2336_v9 = vpop.f32.mrf.mxu1 }
  0xdc   : > { %v417_v20 = vpop.f32.mrf.mxu1 }
  0xde   : > { %v2337_v16 = vpop.f32.mrf.mxu1 }
  0xdf   : > { %v339_v21 = vpop.f32.mrf.mxu0 }
  0xe0   : > { %v415_v23 = vadd.f32 %v414_v56, %v339_v21  ;;  %v422_v31 = vpop.f32.mrf.mxu1 }
  0xe1   : > { %v2322_v36 = vpop.f32.mrf.mxu0 }
  0xe2   : > { %v2340_v37 = vpop.f32.mrf.mxu1 }
  0xe3   : > { %v342_v48 = vpop.f32.mrf.mxu0 }
  0xe4   : > { %v418_v8 = vadd.f32 %v417_v20, %v342_v48  ;;  %v425_v28 = vpop.f32.mrf.mxu1 }
  0xe5   : > { %v2323_v54 = vpop.f32.mrf.mxu0 }
  0xe6   : > { %v2341_v33 = vpop.f32.mrf.mxu1 }
  0xe7   : > { %v347_v55 = vpop.f32.mrf.mxu0 }
  0xe8   : > { %v423_v57 = vadd.f32 %v422_v31, %v347_v55  ;;  %v430_v0 = vpop.f32.mrf.mxu1 }
  0xe9   : > { %v2326_v60 = vpop.f32.mrf.mxu0 }
  0xea   : > { %v2344_v62 = vpop.f32.mrf.mxu1 }
  0xeb   : > { %v350_v45 = vpop.f32.mrf.mxu0 }
  0xec   : > { %v426_v63 = vadd.f32 %v425_v28, %v350_v45  ;;  %v433_v4 = vpop.f32.mrf.mxu1 }
  0xed   : > { %v2327_v5 = vpop.f32.mrf.mxu0 }
  0xee   : > { %v2345_v10 = vpop.f32.mrf.mxu1 }
  0xef   : > { %v355_v11 = vpop.f32.mrf.mxu0 }
  0xf0   : > { %v431_v2 = vadd.f32 %v430_v0, %v355_v11  ;;  %v610_v12 = vpop.f32.mrf.mxu1 }
  0xf1   : > { %v2330_v13 = vpop.f32.mrf.mxu0 }
  0xf2   : > { %v2364_v14 = vpop.f32.mrf.mxu1 }
  0xf3   : > { %v358_v15 = vpop.f32.mrf.mxu0 }
  0xf4   : > { %v434_v17 = vadd.f32 %v433_v4, %v358_v15  ;;  %v613_v22 = vpop.f32.mrf.mxu1 }
  0xf5   : > { %v2331_v25 = vpop.f32.mrf.mxu0 }
  0xf6   : > { %v2365_v27 = vpop.f32.mrf.mxu1 }
  0xf7   : > { %v501_v26 = vpop.f32.mrf.mxu0 }
  0xf8   : > { %v524_v29 = vadd.f32 %v501_v26, %v415_v23  ;;  %v618_v30 = vpop.f32.mrf.mxu1 }
  0xf9   : > { %v2350_v32 = vpop.f32.mrf.mxu0 }
  0xfa   : > { %v2368_v34 = vpop.f32.mrf.mxu1  ;;  %v633_v18 = vadd.f32 %v610_v12, %v524_v29 }
  0xfb   : > { %v504_v7 = vpop.f32.mrf.mxu0 }
  0xfc   : > { %v525_v35 = vadd.f32 %v504_v7, %v418_v8  ;;  %v621_v38 = vpop.f32.mrf.mxu1 }
  0xfd   : > { %v2351_v39 = vpop.f32.mrf.mxu0 }
  0xfe   : > { %v2369_v42 = vpop.f32.mrf.mxu1  ;;  %v634_v43 = vadd.f32 %v613_v22, %v525_v35 }
  0xff   : > { %v509_v44 = vpop.f32.mrf.mxu0 }
 0x100   : > { %v526_v46 = vadd.f32 %v509_v44, %v423_v57  ;;  %v626_v47 = vpop.f32.mrf.mxu1 }
 0x101   : > { %v2354_v49 = vpop.f32.mrf.mxu0 }
 0x102   : > { %v2372_v51 = vpop.f32.mrf.mxu1  ;;  %v635_v59 = vadd.f32 %v618_v30, %v526_v46 }
 0x103   : > { %v512_v58 = vpop.f32.mrf.mxu0 }
 0x104   : > { %v527_v61 = vadd.f32 %v512_v58, %v426_v63  ;;  %v629_v1 = vpop.f32.mrf.mxu1 }
 0x105   : > { %v2355_v40 = vpop.f32.mrf.mxu0 }
 0x106   : > { %v2373_v52 = vpop.f32.mrf.mxu1  ;;  %v636_v3 = vadd.f32 %v621_v38, %v527_v61 }
 0x107   : > { %v517_v24 = vpop.f32.mrf.mxu0 }
 0x108   : > { %v528_v41 = vadd.f32 %v517_v24, %v431_v2  ;;  %v833_v6 = vpop.f32.mrf.mxu1 }
 0x109   : > { %v2358_v19 = vpop.f32.mrf.mxu0 }
 0x10a   : > { %v2392_v50 = vpop.f32.mrf.mxu1  ;;  %v637_v53 = vadd.f32 %v626_v47, %v528_v41 }
 0x10b   : > { %v520_v56 = vpop.f32.mrf.mxu0 }
 0x10c   : > { %v529_v9 = vadd.f32 %v520_v56, %v434_v17  ;;  %v836_v20 = vpop.f32.mrf.mxu1 }
 0x10d   : > { %v2359_v16 = vpop.f32.mrf.mxu0 }
 0x10e   : > { %v2393_v21 = vpop.f32.mrf.mxu1  ;;  %v638_v23 = vadd.f32 %v629_v1, %v529_v9 }
 0x10f   : > { %v740_v31 = vpop.f32.mrf.mxu0 }
 0x110   : > { %v763_v36 = vadd.f32 %v740_v31, %v633_v18  ;;  %v841_v37 = vpop.f32.mrf.mxu1 }
 0x111   : > { %v2378_v48 = vpop.f32.mrf.mxu0 }
 0x112   : > { %v2396_v8 = vpop.f32.mrf.mxu1  ;;  %v856_v28 = vadd.f32 %v833_v6, %v763_v36 }
 0x113   : > { %v743_v54 = vpop.f32.mrf.mxu0 }
 0x114   : > { %v764_v33 = vadd.f32 %v743_v54, %v634_v43  ;;  %v844_v55 = vpop.f32.mrf.mxu1 }
 0x115   : > { %v2379_v57 = vpop.f32.mrf.mxu0 }
 0x116   : > { %v2397_v0 = vpop.f32.mrf.mxu1  ;;  %v857_v60 = vadd.f32 %v836_v20, %v764_v33 }
 0x117   : > { %v748_v62 = vpop.f32.mrf.mxu0 }
 0x118   : > { %v765_v45 = vadd.f32 %v748_v62, %v635_v59  ;;  %v849_v63 = vpop.f32.mrf.mxu1 }
 0x119   : > { %v2382_v4 = vpop.f32.mrf.mxu0 }
 0x11a   : > { %v2400_v5 = vpop.f32.mrf.mxu1  ;;  %v858_v10 = vadd.f32 %v841_v37, %v765_v45 }
 0x11b   : > { %v751_v11 = vpop.f32.mrf.mxu0 }
 0x11c   : > { %v766_v2 = vadd.f32 %v751_v11, %v636_v3  ;;  %v852_v12 = vpop.f32.mrf.mxu1 }
 0x11d   : > { %v2383_v13 = vpop.f32.mrf.mxu0 }
 0x11e   : > { %v2401_v14 = vpop.f32.mrf.mxu1  ;;  %v859_v15 = vadd.f32 %v844_v55, %v766_v2 }
 0x11f   : > { %v756_v17 = vpop.f32.mrf.mxu0 }
 0x120   : > { %v767_v22 = vadd.f32 %v756_v17, %v637_v53  ;;  %v1068_v25 = vpop.f32.mrf.mxu1 }
 0x121   : > { %v2386_v27 = vpop.f32.mrf.mxu0 }
 0x122   : > { %v2420_v26 = vpop.f32.mrf.mxu1  ;;  %v860_v29 = vadd.f32 %v849_v63, %v767_v22 }
 0x123   : > { %v759_v30 = vpop.f32.mrf.mxu0 }
 0x124   : > { %v768_v32 = vadd.f32 %v759_v30, %v638_v23  ;;  %v1071_v34 = vpop.f32.mrf.mxu1 }
 0x125   : > { %v2387_v18 = vpop.f32.mrf.mxu0 }
 0x126   : > { %v2421_v7 = vpop.f32.mrf.mxu1  ;;  %v861_v35 = vadd.f32 %v852_v12, %v768_v32 }
 0x127   : > { %v973_v38 = vpop.f32.mrf.mxu0 }
 0x128   : > { %v996_v39 = vadd.f32 %v973_v38, %v856_v28  ;;  %v1076_v42 = vpop.f32.mrf.mxu1 }
 0x129   : > { %v2406_v43 = vpop.f32.mrf.mxu0 }
 0x12a   : > { %v2424_v44 = vpop.f32.mrf.mxu1  ;;  %v1091_v46 = vadd.f32 %v1068_v25, %v996_v39 }
 0x12b   : > { %v976_v47 = vpop.f32.mrf.mxu0 }
 0x12c   : > { %v997_v49 = vadd.f32 %v976_v47, %v857_v60  ;;  %v1079_v51 = vpop.f32.mrf.mxu1 }
 0x12d   : > { %v2407_v59 = vpop.f32.mrf.mxu0 }
 0x12e   : > { %v2425_v58 = vpop.f32.mrf.mxu1  ;;  %v1092_v61 = vadd.f32 %v1071_v34, %v997_v49 }
 0x12f   : > { %v981_v1 = vpop.f32.mrf.mxu0 }
 0x130   : > { %v998_v40 = vadd.f32 %v981_v1, %v858_v10  ;;  %v1084_v52 = vpop.f32.mrf.mxu1 }
 0x131   : > { %v2410_v3 = vpop.f32.mrf.mxu0 }
 0x132   : > { %v2428_v24 = vpop.f32.mrf.mxu1  ;;  %v1093_v41 = vadd.f32 %v1076_v42, %v998_v40 }
 0x133   : > { %v984_v6 = vpop.f32.mrf.mxu0 }
 0x134   : > { %v999_v19 = vadd.f32 %v984_v6, %v859_v15  ;;  %v1087_v50 = vpop.f32.mrf.mxu1 }
 0x135   : > { %v2411_v53 = vpop.f32.mrf.mxu0 }
 0x136   : > { %v2429_v56 = vpop.f32.mrf.mxu1  ;;  %v1094_v9 = vadd.f32 %v1079_v51, %v999_v19 }
 0x137   : > { %v989_v20 = vpop.f32.mrf.mxu0 }
 0x138   : > { %v1000_v16 = vadd.f32 %v989_v20, %v860_v29  ;;  %v1306_v21 = vpop.f32.mrf.mxu1 }
 0x139   : > { %v2414_v23 = vpop.f32.mrf.mxu0 }
 0x13a   : > { %v2448_v31 = vpop.f32.mrf.mxu1  ;;  %v1095_v36 = vadd.f32 %v1084_v52, %v1000_v16 }
 0x13b   : > { %v992_v37 = vpop.f32.mrf.mxu0 }
 0x13c   : > { %v1001_v48 = vadd.f32 %v992_v37, %v861_v35  ;;  %v1309_v8 = vpop.f32.mrf.mxu1 }
 0x13d   : > { %v2415_v28 = vpop.f32.mrf.mxu0 }
 0x13e   : > { %v2449_v54 = vpop.f32.mrf.mxu1  ;;  %v1096_v33 = vadd.f32 %v1087_v50, %v1001_v48 }
 0x13f   : > { %v1183_v55 = vpop.f32.mrf.mxu0 }
 0x140   : > { %v1206_v57 = vadd.f32 %v1183_v55, %v1091_v46  ;;  %v1314_v0 = vpop.f32.mrf.mxu1 }
 0x141   : > { %v2434_v60 = vpop.f32.mrf.mxu0 }
 0x142   : > { %v2452_v62 = vpop.f32.mrf.mxu1  ;;  %v3179_v45 = vadd.f32 %v1306_v21, %v1206_v57 }
 0x143   : > { %v1186_v63 = vpop.f32.mrf.mxu0 }
 0x144   : > { %v1207_v4 = vadd.f32 %v1186_v63, %v1092_v61  ;;  %v1317_v5 = vpop.f32.mrf.mxu1 }
 0x145   : > { %v2435_v10 = vpop.f32.mrf.mxu0 }
 0x146   : > { %v2453_v11 = vpop.f32.mrf.mxu1  ;;  %v3181_v2 = vadd.f32 %v1309_v8, %v1207_v4 }
 0x147   : > { %v1191_v12 = vpop.f32.mrf.mxu0 }
 0x148   : > { %v1208_v13 = vadd.f32 %v1191_v12, %v1093_v41  ;;  %v1322_v14 = vpop.f32.mrf.mxu1 }
 0x149   : > { %v2438_v15 = vpop.f32.mrf.mxu0 }
 0x14a   : > { %v2456_v17 = vpop.f32.mrf.mxu1  ;;  %v3183_v22 = vadd.f32 %v1314_v0, %v1208_v13 }
 0x14b   : > { %v1194_v25 = vpop.f32.mrf.mxu0 }
 0x14c   : > { %v1209_v27 = vadd.f32 %v1194_v25, %v1094_v9  ;;  %v1325_v26 = vpop.f32.mrf.mxu1 }
 0x14d   : > { %v2439_v29 = vpop.f32.mrf.mxu0 }
 0x14e   : > { %v2457_v30 = vpop.f32.mrf.mxu1  ;;  %v3185_v32 = vadd.f32 %v1317_v5, %v1209_v27 }
 0x14f   : > { %v1199_v34 = vpop.f32.mrf.mxu0 }
 0x150   : > { %v1210_v18 = vadd.f32 %v1199_v34, %v1095_v36  ;;  %v1500_v7 = vpop.f32.mrf.mxu1 }
 0x151   : > { %v2442_v35 = vpop.f32.mrf.mxu0 }
 0x152   : > { %v2476_v38 = vpop.f32.mrf.mxu1  ;;  %v3187_v39 = vadd.f32 %v1322_v14, %v1210_v18 }
 0x153   : > { %v1202_v42 = vpop.f32.mrf.mxu0 }
 0x154   : > { %v1211_v43 = vadd.f32 %v1202_v42, %v1096_v33  ;;  %v1503_v44 = vpop.f32.mrf.mxu1 }
 0x155   : > { %v2443_v46 = vpop.f32.mrf.mxu0 }
 0x156   : > { %v2477_v47 = vpop.f32.mrf.mxu1  ;;  %v3189_v49 = vadd.f32 %v1325_v26, %v1211_v43 }
 0x157   : > { %v1392_v51 = vpop.f32.mrf.mxu0 }
 0x158   : > { %v1508_v59 = vpop.f32.mrf.mxu1  ;;  %v1415_v11 = vadd.f32 %v1392_v51, %v3179_v45 }
 0x159   : > { %v2462_v58 = vpop.f32.mrf.mxu0 }
 0x15a   : > { %v2480_v61 = vpop.f32.mrf.mxu1  ;;  %v1523_v25 = vadd.f32 %v1500_v7, %v1415_v11 }
 0x15b   : > { %v1395_v1 = vpop.f32.mrf.mxu0  ;;  %v3214_v61 = vld [vmem:[%s3275_s2] ss:$0 sm:$0xff] }
 0x15c   : > { %v3191_v40 = vpop.f32.mrf.mxu1  ;;  %v1416_v17 = vadd.f32 %v1395_v1, %v3181_v2 }
 0x15d   : > { %v2463_v52 = vpop.f32.mrf.mxu0 }
 0x15e   : > { %v2481_v3 = vpop.f32.mrf.mxu1  ;;  %v1524_v35 = vadd.f32 %v1503_v44, %v1416_v17 }
 0x15f   : > { %v1400_v24 = vpop.f32.mrf.mxu0 }
 0x160   : > { %v3193_v41 = vpop.f32.mrf.mxu1  ;;  %v1417_v18 = vadd.f32 %v1400_v24, %v3183_v22 }
 0x161   : > { %v2466_v6 = vpop.f32.mrf.mxu0 }
 0x162   : > { %v2484_v19 = vpop.f32.mrf.mxu1  ;;  %v1525_v2 = vadd.f32 %v1508_v59, %v1417_v18 }
 0x163   : > { %v1403_v50 = vpop.f32.mrf.mxu0 }
 0x164   : > { %v3195_v53 = vpop.f32.mrf.mxu1  ;;  %v1418_v51 = vadd.f32 %v1403_v50, %v3185_v32  ;;  %v3220_v32 = vld [vmem:[%s3276_s3] ss:$0 sm:$0xff] }
 0x165   : > { %v2467_v56 = vpop.f32.mrf.mxu0 }
 0x166   : > { %v2485_v9 = vpop.f32.mrf.mxu1  ;;  %v1526_v6 = vadd.f32 %v3191_v40, %v1418_v51 }
 0x167   : > { %v1408_v20 = vpop.f32.mrf.mxu0 }
 0x168   : > { %v1719_v16 = vpop.f32.mrf.mxu1  ;;  %v1419_v24 = vadd.f32 %v1408_v20, %v3187_v39 }
 0x169   : > { %v2470_v21 = vpop.f32.mrf.mxu0 }
 0x16a   : > { %v2504_v23 = vpop.f32.mrf.mxu1 }
 0x16b   : > { %v3197_v31 = vpop.f32.mrf.mxu0 }
 0x16c   : > { %v1722_v36 = vpop.f32.mrf.mxu1 }
 0x16d   : > { %v2471_v37 = vpop.f32.mrf.mxu0 }
 0x16e   : > { %v2505_v48 = vpop.f32.mrf.mxu1 }
 0x16f   : > { %v1627_v8 = vpop.f32.mrf.mxu0  ;;  %v1420_v48 = vadd.f32 %v3197_v31, %v3189_v49 }
 0x170   : > { %v1727_v28 = vpop.f32.mrf.mxu1  ;;  %v1650_v29 = vadd.f32 %v1627_v8, %v1523_v25 }
 0x171   : > { %v2490_v54 = vpop.f32.mrf.mxu0 }
 0x172   : > { %v2508_v33 = vpop.f32.mrf.mxu1  ;;  %v1742_v43 = vadd.f32 %v1719_v16, %v1650_v29 }
 0x173   : > { %v1630_v55 = vpop.f32.mrf.mxu0 }
 0x174   : > { %v3199_v57 = vpop.f32.mrf.mxu1  ;;  %v1651_v42 = vadd.f32 %v1630_v55, %v1524_v35 }
 0x175   : > { %v2491_v0 = vpop.f32.mrf.mxu0 }
 0x176   : > { %v2509_v60 = vpop.f32.mrf.mxu1  ;;  %v1743_v52 = vadd.f32 %v1722_v36, %v1651_v42  ;;  %v1527_v36 = vadd.f32 %v3193_v41, %v1419_v24 }
 0x177   : > { %v1635_v62 = vpop.f32.mrf.mxu0 }
 0x178   : > { %v3201_v63 = vpop.f32.mrf.mxu1  ;;  %v1652_v44 = vadd.f32 %v1635_v62, %v1525_v2 }
 0x179   : > { %v2494_v4 = vpop.f32.mrf.mxu0 }
 0x17a   : > { %v2512_v5 = vpop.f32.mrf.mxu1  ;;  %v1744_v39 = vadd.f32 %v1727_v28, %v1652_v44  ;;  %v1528_v4 = vadd.f32 %v3195_v53, %v1420_v48 }
 0x17b   : > { %v1638_v10 = vpop.f32.mrf.mxu0 }
 0x17c   : > { %v3204_v12 = vpop.f32.mrf.mxu1  ;;  %v1653_v16 = vadd.f32 %v1638_v10, %v1526_v6 }
 0x17d   : > { %v2495_v13 = vpop.f32.mrf.mxu0 }
 0x17e   : > { %v2513_v14 = vpop.f32.mrf.mxu1  ;;  %v1745_v49 = vadd.f32 %v3199_v57, %v1653_v16 }
 0x17f   : > { %v1643_v15 = vpop.f32.mrf.mxu0 }
 0x180   : > { %v1919_v27 = vpop.f32.mrf.mxu1  ;;  %v1654_v55 = vadd.f32 %v1643_v15, %v1527_v36 }
 0x181   : > { %v2498_v26 = vpop.f32.mrf.mxu0 }
 0x182   : > { %v2532_v30 = vpop.f32.mrf.mxu1  ;;  %v1746_v15 = vadd.f32 %v3201_v63, %v1654_v55 }
 0x183   : > { %v1646_v34 = vpop.f32.mrf.mxu0 }
 0x184   : > { %v1922_v38 = vpop.f32.mrf.mxu1  ;;  %v1655_v17 = vadd.f32 %v1646_v34, %v1528_v4 }
 0x185   : > { %v2499_v45 = vpop.f32.mrf.mxu0 }
 0x186   : > { %v2533_v46 = vpop.f32.mrf.mxu1  ;;  %v1747_v34 = vadd.f32 %v3204_v12, %v1655_v17 }
 0x187   : > { %v1827_v47 = vpop.f32.mrf.mxu0 }
 0x188   : > { %v1850_v7 = vadd.f32 %v1827_v47, %v1742_v43  ;;  %v1927_v58 = vpop.f32.mrf.mxu1 }
 0x189   : > { %v2518_v22 = vpop.f32.mrf.mxu0 }
 0x18a   : > { %v1942_v1 = vadd.f32 %v1919_v27, %v1850_v7  ;;  %v2536_v3 = vpop.f32.mrf.mxu1 }
 0x18b   : > { %v1830_v59 = vpop.f32.mrf.mxu0 }
 0x18c   : > { %v1955_v19 = vmul.f32 %v3214_v61, %v1942_v1  ;;  %v1851_v50 = vadd.f32 %v1830_v59, %v1743_v52  ;;  %v1930_v56 = vpop.f32.mrf.mxu1 }
 0x18d   : > { %v2519_v9 = vpop.f32.mrf.mxu0 }
 0x18e   : > { %v1968_v21 = vadd.f32 %v3220_v32, %v1955_v19  ;;  %v1943_v23 = vadd.f32 %v1922_v38, %v1851_v50  ;;  %v2537_v20 = vpop.f32.mrf.mxu1 }
 0x18f   : > { %v1835_v37 = vpop.f32.mrf.mxu0 }
 0x190   : > { %v1974_v8 = vmax.f32 %v1968_v21, 0.0  ;;  %v1956_v40 = vmul.f32 %v3214_v61, %v1943_v23  ;;  %v1852_v54 = vadd.f32 %v1835_v37, %v1744_v39  ;;  %v1935_v33 = vpop.f32.mrf.mxu1 }
 0x191   : > { %v2522_v28 = vpop.f32.mrf.mxu0 }
 0x192   : > { %v2248_v0 = vpack.c.bf16 %v1974_v8, %v1974_v8  ;;  %v1969_v41 = vadd.f32 %v3220_v32, %v1956_v40  ;;  %v1944_v60 = vadd.f32 %v1927_v58, %v1852_v54  ;;  %v2540_v31 = vpop.f32.mrf.mxu1 }
 0x193   : > { %v1838_v62 = vpop.f32.mrf.mxu0 }
 0x194   : > { %2005 = vst.msk [vmem:[%s3232_s5] sm:$0xf] %vm2004_vm9, %v2248_v0  ;;  %v1975_v5 = vmax.f32 %v1969_v41, 0.0  ;;  %v1957_v10 = vmul.f32 %v3214_v61, %v1944_v60  ;;  %v1853_v11 = vadd.f32 %v1838_v62, %v1745_v49  ;;  %v1938_v13 = vpop.f32.mrf.mxu1 }
 0x195   : > { %v2523_v14 = vpop.f32.mrf.mxu0 }
 0x196   : > { %v2249_v25 = vpack.c.bf16 %v1975_v5, %v1975_v5  ;;  %v1970_v57 = vadd.f32 %v3220_v32, %v1957_v10  ;;  %v1945_v27 = vadd.f32 %v1930_v56, %v1853_v11  ;;  %v2541_v26 = vpop.f32.mrf.mxu1 }
 0x197   : > { %v1843_v29 = vpop.f32.mrf.mxu0 }
 0x198   : > { %2006 = vst.msk [vmem:[%s3232_s5 + $0x4] sm:$0xf] %vm2004_vm9, %v2249_v25  ;;  %v1976_v53 = vmax.f32 %v1970_v57, 0.0  ;;  %v1958_v30 = vmul.f32 %v3214_v61, %v1945_v27  ;;  %v1854_v18 = vadd.f32 %v1843_v29, %v1746_v15 }
 0x199   : > { %v2526_v35 = vpop.f32.mrf.mxu0 }
 0x19a   : > { %v2250_v38 = vpack.c.bf16 %v1976_v53, %v1976_v53  ;;  %v1971_v45 = vadd.f32 %v3220_v32, %v1958_v30  ;;  %v1946_v63 = vadd.f32 %v1935_v33, %v1854_v18 }
 0x19b   : > { %v1846_v42 = vpop.f32.mrf.mxu0 }
 0x19c   : > { %2007 = vst.msk [vmem:[%s3232_s5 + $0x8] sm:$0xf] %vm2004_vm9, %v2250_v38  ;;  %v1977_v43 = vmax.f32 %v1971_v45, 0.0  ;;  %v1959_v46 = vmul.f32 %v3214_v61, %v1946_v63  ;;  %v1855_v47 = vadd.f32 %v1846_v42, %v1747_v34 }
 0x19d   : > { %v2527_v51 = vpop.f32.mrf.mxu0 }
 0x19e   : > { %v2251_v2 = vpack.c.bf16 %v1977_v43, %v1977_v43  ;;  %v1972_v7 = vadd.f32 %v3220_v32, %v1959_v46  ;;  %v1947_v58 = vadd.f32 %v1938_v13, %v1855_v47 }
 0x1a0   : > { %2008 = vst.msk [vmem:[%s3232_s5 + $0xc] sm:$0xf] %vm2004_vm9, %v2251_v2  ;;  %v1978_v22 = vmax.f32 %v1972_v7, 0.0  ;;  %v1960_v44 = vmul.f32 %v3214_v61, %v1947_v58 }
 0x1a2   : > { %v2252_v1 = vpack.c.bf16 %v1978_v22, %v1978_v22  ;;  %v1973_v12 = vadd.f32 %v3220_v32, %v1960_v44 }
 0x1a4   : > { %2009 = vst.msk [vmem:[%s3232_s5 + $0x10] sm:$0xf] %vm2004_vm9, %v2252_v1  ;;  %v1979_v52 = vmax.f32 %v1973_v12, 0.0 }
 0x1a6   : > { %v2253_v3 = vpack.c.bf16 %v1979_v52, %v1979_v52 }
 0x1a8   : > { %2011 = vst.msk [vmem:[%s3232_s5 + $0x14] sm:$0x3] %vm2010_vm10, %v2253_v3 }
 0x1a9 PF: > { %s14_s19 = sadd.s32 1, %s2672_s19   ;;  %s3278_s15 = smov %s2664_s17 }
 0x1aa   : > { %p11_p7 = scmp.ge.s32.totalorder %s14_s19, 6   ;;  %s3279_s16 = smov %s2668_s18 }
 0x1ab   : > { %s3280_s17 = smov %s3283_s20  ;;  %s3281_s18 = smov %s3287_s21 }
 0x1ac   :  { %13 = sbr.rel (!%p11_p7) target bundleno = 3 (0x3), region = 81 }

// kernel: spatial_encoder_forward.9
= control target key start
LH: loop header
LB: loop body
LE: loop exit
PB: predicated region body
PF: predicated region fallthrough
CT: control target
= control target key end

     0   :  { %s1726_s15 = smov 0   ;;  %s1728_s16 = smov 0   ;;  %s1948_s0 = inlined_call_operand.vmem [shape: bf16[2,1,42,64], index: 0, kind: input, shape index: {}]   ;;  %s1949_s1 = inlined_call_operand.vmem [shape: bf16[9,64,64], index: 1, kind: input, shape index: {}]   ;;  %s1950_s2 = inlined_call_operand.vmem [shape: f32[1,64], index: 2, kind: input, shape index: {}]   ;;  %s1951_s3 = inlined_call_operand.vmem [shape: f32[1,64], index: 3, kind: input, shape index: {}]   ;;  %s1952_s4 = inlined_call_operand.vmem [shape: bf16[2,1,24,64], index: 4, kind: output, shape index: {}]  }
   0x1   :  { %s1730_s17 = smov 0  }
   0x2 LB: > { %s26_s18 = sadd.s32 1, %s1695_s16  ;;  %p1296_p0 = scmp.ge.s32.totalorder %s1699_s17, 1  ;;  %s1699_s17 = sphi %s1730_s17, %s14_s17   ;;  %s1695_s16 = sphi %s1728_s16, %s1954_s16   ;;  %s1691_s15 = sphi %s1726_s15, %s1953_s15  }
   0x3   : > { %p28_p1 = scmp.ge.s32.totalorder %s26_s18, 2  ;;  %p182_p2 = scmp.lt.s32.totalorder %s1699_s17, 3 }
   0x5   : > { %s1956_s18 = smov (%p28_p1, %s26_s18), 0  ;;  %p183_p3 = pnand %p1296_p0, %p182_p2 }
   0x6   : > { %p216_p4 = scmp.lt.s32.totalorder (!%p183_p3), %s1691_s15, 1 }
   0x7   : > { %186 = sbr.rel (%p183_p3) target bundleno = 303 (0x12f), region = 36 }
   0xc   : > { %v1628_v0 = vld [vmem:[%s1949_s1 + $0x38] sm:$0xff]   ;;  %v1630_v2 = vld [vmem:[%s1949_s1 + $0x30] sm:$0xff]   ;;  %s1958_s15 = smov (!%p216_p4, %s1691_s15), 1  ;;  %v1632_v4 = vld [vmem:[%s1949_s1 + $0x28] sm:$0xff]   ;;  %vm306_vm0 = vcmask 523264   ;;  %vm452_vm2 = vcmask 1046528  }
   0xd   : > { %v1629_v1 = vld [vmem:[%s1949_s1 + $0x18] sm:$0xff]   ;;  %1494 = vmatprep.subr.bf16.mxu0 %v1628_v0  ;;  %v1631_v3 = vld [vmem:[%s1949_s1 + $0x10] sm:$0xff]   ;;  %s1602_s29 = smul.u32 24, %s1958_s15  ;;  %v1633_v5 = vld [vmem:[%s1949_s1 + $0x8] sm:$0xff]   ;;  %vm266_vm1 = vsmask.f32 7424 }
   0xe   : > { %1506 = vmatprep.subr.bf16.mxu1 %v1629_v1  ;;  %1495 = vmatpush3.bf16.msra.mxu0 %v1628_v0  ;;  %v1634_v6 = vld [vmem:[%s1949_s1 + $0x20] sm:$0xff]   ;;  %v1639_v16 = vld [vmem:[%s1949_s1 + $0x58] sm:$0xff]   ;;  %v1641_v25 = vld [vmem:[%s1949_s1 + $0x50] sm:$0xff]   ;;  %vm554_vm3 = vcmask 1044480   ;;  %vm652_vm4 = vsmask.f32 4352 }
   0xf   : > { %1507 = vmatpush3.bf16.msra.mxu1 %v1629_v1  ;;  %1496 = vmatprep.subr.bf16.mxu0 %v1630_v2  ;;  %s1768_s8 = scalar_lea.vmem %s1948_s0, %s1602_s29  ;;  %v1635_v10 = vld [vmem:[%s1949_s1] sm:$0xff]   ;;  %v1640_v20 = vld [vmem:[%s1949_s1 + $0x78] sm:$0xff]   ;;  %v1642_v27 = vld [vmem:[%s1949_s1 + $0x70] sm:$0xff]   ;;  %vm866_vm5 = vcmask 1045504   ;;  %vm964_vm6 = vsmask.f32 5376 }
  0x10   : > { %1508 = vmatprep.subr.bf16.mxu1 %v1631_v3  ;;  %v235_v7 = vld [vmem:[%s1768_s8] sm:$0xf]  ;;  %v1775_v8 = vld [vmem:[%s1768_s8 + $0x4] sm:$0xf]  ;;  %v1778_v9 = vld [vmem:[%s1768_s8 + $0x8] sm:$0xf] }
  0x11   : > { %v246_v11 = vld [vmem:[%s1768_s8 + $0xc] sm:$0x1]  ;;  %v1307_v12 = vcombine.low %v235_v7, %v1775_v8  ;;  %v1315_v23 = vcombine.low %v1778_v9, %v1778_v9  ;;  %v439_v28 = vld [vmem:[%s1768_s8] sm:$0xe]  ;;  %v1648_v46 = vld [vmem:[%s1949_s1 + $0x98] sm:$0xff]   ;;  %v1376_v60 = vcombine.low %v1775_v8, %v1778_v9  ;;  %s1603_s9 = smul.u32 12, %s1958_s15 }
  0x12   : > { %1497 = vmatpush3.bf16.msra.mxu0 %v1630_v2  ;;  %v1786_v13 = vcombine.low %v1778_v9, %v246_v11  ;;  %v1330_v29 = vcombine.low %v439_v28, %v1775_v8  ;;  %v537_v31 = vld [vmem:[%s1768_s8] sm:$0x8]  ;;  %v538_v32 = vld [vmem:[%s1768_s8 + $0xc] sm:$0x7]  ;;  %v1651_v51 = vld [vmem:[%s1949_s1 + $0xb8] sm:$0xff]   ;;  %vm1196_vm7 = vcmask 519168  }
  0x13   : > { %1509 = vmatpush3.bf16.msra.mxu1 %v1631_v3  ;;  %1498 = vmatprep.subr.bf16.mxu0 %v1632_v4  ;;  %v268_v14 = vshrl.u32 %v1307_v12, 16  ;;  %v270_v15 = vshll.u32 %v1307_v12, 16  ;;  %v1643_v33 = vld [vmem:[%s1949_s1 + $0x48] sm:$0xff]   ;;  %v1345_v34 = vcombine.low %v537_v31, %v1775_v8  ;;  %v1346_v35 = vcombine.low %v1778_v9, %v538_v32  ;;  %v1645_v42 = vld [vmem:[%s1949_s1 + $0x40] sm:$0xff]   ;;  %v1652_v54 = vld [vmem:[%s1949_s1 + $0x90] sm:$0xff]   ;;  %s233_s12 = scalar_lea.vmem %s1952_s4, %s1603_s9 }
  0x14   : > { %1510 = vmatprep.subr.bf16.mxu1 %v1633_v5  ;;  %1514 = vmatprep.mubr.msk.bf16.mxu1 %vm306_vm0, %v1307_v12  ;;  %v275_v17 = vshll.u32 %v1786_v13, 16  ;;  %v279_v18 = vshrl.u32 %v1786_v13, 16  ;;  %v454_v30 = vrot.slane %v1786_v13, 1  ;;  %v1644_v36 = vld [vmem:[%s1949_s1 + $0x68] sm:$0xff]   ;;  %v453_v37 = vrot.slane %v1330_v29, 1  ;;  %v1646_v45 = vld [vmem:[%s1949_s1 + $0x60] sm:$0xff]  }
  0x15   : > { %v272_v19 = vrot.slane %v270_v15, 1  ;;  %v555_v38 = vrot.slane %v1345_v34, 3  ;;  %v556_v39 = vrot.slane %v1346_v35, 3  ;;  %v654_v41 = vshrl.u32 %v1345_v34, 16  ;;  %v1836_v47 = vld [vmem:[%s1768_s8 + $0xc] sm:$0xf] }
  0x16   : > { %1499 = vmatpush3.bf16.msra.mxu0 %v1632_v4  ;;  %v277_v21 = vrot.slane %v275_v17, 1  ;;  %v455_v40 = vsel %vm452_vm2, %v453_v37, %v454_v30  ;;  %v657_v44 = vshll.u32 %v1345_v34, 16  ;;  %v1361_v50 = vcombine.low %v1778_v9, %v1836_v47  ;;  %v1653_v55 = vld [vmem:[%s1949_s1 + $0xb0] sm:$0xff]   ;;  %v1654_v61 = vld [vmem:[%s1949_s1 + $0x88] sm:$0xff]   ;;  %v843_v62 = vld [vmem:[%s1768_s8 + $0x4] sm:$0xc] }
  0x17   : > { %1511 = vmatpush3.bf16.msra.mxu1 %v1633_v5  ;;  %1500 = vmatprep.subr.bf16.mxu0 %v1634_v6  ;;  %v273_v22 = vor.u32 %v272_v19, %v268_v14  ;;  %v557_v43 = vsel %vm554_vm3, %v555_v38, %v556_v39  ;;  %v656_v48 = vrot.slane %v654_v41, 3  ;;  %v1655_v63 = vld [vmem:[%s1949_s1 + $0xa8] sm:$0xff]   ;;  %v951_v4 = vld [vmem:[%s1768_s8 + $0x10] sm:$0x7]  ;;  %v1656_v11 = vld [vmem:[%s1949_s1 + $0x80] sm:$0xff]  }
  0x18   : > { %1512 = vmatprep.subr.bf16.mxu1 %v1635_v10  ;;  %v281_v24 = vor.u32 %v279_v18, %v277_v21  ;;  %v659_v49 = vrot.slane %v657_v44, 4  ;;  %v662_v52 = vshrl.u32 %v1361_v50, 16  ;;  %v665_v53 = vshll.u32 %v1361_v50, 16  ;;  %v1861_v1 = vld [vmem:[%s1768_s8 + $0x8] sm:$0xf]  ;;  %v1657_v12 = vld [vmem:[%s1949_s1 + $0xa0] sm:$0xff]  }
  0x19   : > { %v278_v26 = vsel %vm266_vm1, %v273_v22, %v277_v21  ;;  %v845_v2 = vld [vmem:[%s1768_s8 + $0xc] sm:$0xf]  ;;  %v1392_v3 = vcombine.low %v843_v62, %v1861_v1  ;;  %v1659_v18 = vld [vmem:[%s1949_s1 + $0xd8] sm:$0xff]   ;;  %v1063_v31 = vld [vmem:[%s1768_s8 + $0x4] sm:$0x8] }
  0x1a   : > { %1501 = vmatpush3.bf16.msra.mxu0 %v1634_v6  ;;  %1502 = vmatprep.mubr.msk.bf16.mxu0 %vm306_vm0, %v278_v26  ;;  %v660_v56 = vor.u32 %v659_v49, %v656_v48  ;;  %v664_v57 = vrot.slane %v662_v52, 3  ;;  %v667_v58 = vrot.slane %v665_v53, 4  ;;  %v1868_v5 = vcombine.low %v845_v2, %v951_v4  ;;  %v846_v6 = vld [vmem:[%s1768_s8 + $0x10] sm:$0x3]  ;;  %v1662_v19 = vld [vmem:[%s1949_s1 + $0xf8] sm:$0xff]   ;;  %v1665_v29 = vld [vmem:[%s1949_s1 + $0xc8] sm:$0xff]  }
  0x1b   : > { %1513 = vmatpush3.bf16.msra.mxu1 %v1635_v10  ;;  %1518 = vmatprep.subr.bf16.mxu0 %v1639_v16  ;;  %v966_v7 = vshrl.u32 %v1392_v3, 16  ;;  %v969_v8 = vshll.u32 %v1392_v3, 16  ;;  %v1393_v13 = vcombine.low %v845_v2, %v846_v6  ;;  %v867_v21 = vrot.slane %v1392_v3, 2  ;;  %v1664_v26 = vld [vmem:[%s1949_s1 + $0xf0] sm:$0xff]   ;;  %v1667_v32 = vld [vmem:[%s1949_s1 + $0xc0] sm:$0xff]   ;;  %v1672_v35 = vld [vmem:[%s1949_s1 + $0x118] sm:$0xff]  }
  0x1c   : > { %1530 = vmatprep.subr.bf16.mxu1 %v1640_v20  ;;  %v668_v59 = vor.u32 %v667_v58, %v664_v57  ;;  %v974_v9 = vshrl.u32 %v1868_v5, 16  ;;  %v977_v10 = vshll.u32 %v1868_v5, 16  ;;  %v1423_v34 = vcombine.low %v1063_v31, %v1861_v1  ;;  %v1673_v38 = vld [vmem:[%s1949_s1 + $0x110] sm:$0xff]   ;;  %v1675_v41 = vld [vmem:[%s1949_s1 + $0x100] sm:$0xff]  }
  0x1d   : > { %1503 = vmatmul.mubr.msk.bf16.vlgmr.msra.gmra.mxu0 %vm306_vm0, %v281_v24  ;;  %v968_v14 = vrot.slane %v966_v7, 2  ;;  %v971_v15 = vrot.slane %v969_v8, 3  ;;  %v868_v22 = vrot.slane %v1393_v13, 2  ;;  %v1077_v37 = vrot.slane %v1868_v5, 3 }
  0x1e   : > { %1515 = vmatmul.mubr.msk.bf16.vlgmr.msra.gmra.mxu1 %vm306_vm0, %v1315_v23  ;;  %1519 = vmatpush3.bf16.msra.mxu0 %v1639_v16  ;;  %v669_v0 = vsel %vm652_vm4, %v660_v56, %v668_v59  ;;  %v976_v16 = vrot.slane %v974_v9, 2  ;;  %v979_v17 = vrot.slane %v977_v10, 3 }
  0x1f   : > { %1531 = vmatpush3.bf16.msra.mxu1 %v1640_v20  ;;  %1520 = vmatprep.subr.bf16.mxu0 %v1641_v25  ;;  %v1377_v20 = vcombine.low %v1836_v47, %v1836_v47  ;;  %v972_v23 = vor.u32 %v971_v15, %v968_v14 }
  0x20   : > { %1532 = vmatprep.subr.bf16.mxu1 %v1642_v27  ;;  %1526 = vmatprep.mubr.msk.bf16.mxu0 %vm306_vm0, %v455_v40  ;;  %v980_v24 = vor.u32 %v979_v17, %v976_v16  ;;  %v1674_v40 = vld [vmem:[%s1949_s1 + $0x108] sm:$0xff]  }
  0x21   : > { %1538 = vmatprep.mubr.msk.bf16.mxu1 %vm306_vm0, %v557_v43 }
  0x22   : > { %1521 = vmatpush3.bf16.msra.mxu0 %v1641_v25  ;;  %v1663_v25 = vld [vmem:[%s1949_s1 + $0xd0] sm:$0xff]   ;;  %v981_v28 = vsel %vm964_vm6, %v972_v23, %v980_v24 }
  0x23   : > { %1533 = vmatpush3.bf16.msra.mxu1 %v1642_v27  ;;  %1522 = vmatprep.subr.bf16.mxu0 %v1643_v33  ;;  %v869_v27 = vsel %vm866_vm5, %v867_v21, %v868_v22 }
  0x24   : > { %1534 = vmatprep.subr.bf16.mxu1 %v1644_v36 }
  0x26   : > { %1523 = vmatpush3.bf16.msra.mxu0 %v1643_v33  ;;  %v1668_v33 = vld [vmem:[%s1949_s1 + $0xe0] sm:$0xff]  }
  0x27   : > { %1535 = vmatpush3.bf16.msra.mxu1 %v1644_v36  ;;  %1524 = vmatprep.subr.bf16.mxu0 %v1645_v42  ;;  %v1076_v36 = vrot.slane %v1423_v34, 3 }
  0x28   : > { %1536 = vmatprep.subr.bf16.mxu1 %v1646_v45 }
  0x2a   : > { %1525 = vmatpush3.bf16.msra.mxu0 %v1645_v42 }
  0x2b   : > { %1537 = vmatpush3.bf16.msra.mxu1 %v1646_v45  ;;  %1542 = vmatprep.subr.bf16.mxu0 %v1648_v46 }
  0x2c   : > { %1554 = vmatprep.subr.bf16.mxu1 %v1651_v51 }
  0x2d   : > { %1527 = vmatmul.mubr.msk.bf16.vlgmr.msra.gmra.mxu0 %vm306_vm0, %v454_v30  ;;  %v1666_v30 = vld [vmem:[%s1949_s1 + $0xe8] sm:$0xff]  }
  0x2e   : > { %1539 = vmatmul.mubr.msk.bf16.vlgmr.msra.gmra.mxu1 %vm306_vm0, %v556_v39  ;;  %1543 = vmatpush3.bf16.msra.mxu0 %v1648_v46  ;;  %v1078_v39 = vsel %vm554_vm3, %v1076_v36, %v1077_v37 }
  0x2f   : > { %1555 = vmatpush3.bf16.msra.mxu1 %v1651_v51  ;;  %1544 = vmatprep.subr.bf16.mxu0 %v1652_v54 }
  0x30   : > { %1556 = vmatprep.subr.bf16.mxu1 %v1653_v55  ;;  %1550 = vmatprep.mubr.msk.bf16.mxu0 %vm306_vm0, %v669_v0 }
  0x31   : > { %1562 = vmatprep.mubr.msk.bf16.mxu1 %vm306_vm0, %v1376_v60 }
  0x32   : > { %1545 = vmatpush3.bf16.msra.mxu0 %v1652_v54 }
  0x33   : > { %1557 = vmatpush3.bf16.msra.mxu1 %v1653_v55  ;;  %1546 = vmatprep.subr.bf16.mxu0 %v1654_v61 }
  0x34   : > { %1558 = vmatprep.subr.bf16.mxu1 %v1655_v63 }
  0x36   : > { %1547 = vmatpush3.bf16.msra.mxu0 %v1654_v61 }
  0x37   : > { %1559 = vmatpush3.bf16.msra.mxu1 %v1655_v63  ;;  %1548 = vmatprep.subr.bf16.mxu0 %v1656_v11 }
  0x38   : > { %1560 = vmatprep.subr.bf16.mxu1 %v1657_v12 }
  0x3a   : > { %1549 = vmatpush3.bf16.msra.mxu0 %v1656_v11 }
  0x3b   : > { %1561 = vmatpush3.bf16.msra.mxu1 %v1657_v12  ;;  %1566 = vmatprep.subr.bf16.mxu0 %v1659_v18 }
  0x3c   : > { %1578 = vmatprep.subr.bf16.mxu1 %v1662_v19 }
  0x3d   : > { %1551 = vmatmul.mubr.msk.bf16.vlgmr.msra.gmra.mxu0 %vm306_vm0, %v668_v59 }
  0x3e   : > { %1563 = vmatmul.mubr.msk.bf16.vlgmr.msra.gmra.mxu1 %vm306_vm0, %v1377_v20  ;;  %1567 = vmatpush3.bf16.msra.mxu0 %v1659_v18 }
  0x3f   : > { %1579 = vmatpush3.bf16.msra.mxu1 %v1662_v19  ;;  %1568 = vmatprep.subr.bf16.mxu0 %v1663_v25 }
  0x40   : > { %1580 = vmatprep.subr.bf16.mxu1 %v1664_v26  ;;  %1574 = vmatprep.mubr.msk.bf16.mxu0 %vm306_vm0, %v869_v27 }
  0x41   : > { %1586 = vmatprep.mubr.msk.bf16.mxu1 %vm306_vm0, %v981_v28  ;;  %v1430_v28 = vld [vmem:[%s1950_s2] ss:$0 sm:$0xff] }
  0x42   : > { %1569 = vmatpush3.bf16.msra.mxu0 %v1663_v25 }
  0x43   : > { %1581 = vmatpush3.bf16.msra.mxu1 %v1664_v26  ;;  %1570 = vmatprep.subr.bf16.mxu0 %v1665_v29 }
  0x44   : > { %1582 = vmatprep.subr.bf16.mxu1 %v1666_v30 }
  0x46   : > { %1571 = vmatpush3.bf16.msra.mxu0 %v1665_v29 }
  0x47   : > { %1583 = vmatpush3.bf16.msra.mxu1 %v1666_v30  ;;  %1572 = vmatprep.subr.bf16.mxu0 %v1667_v32 }
  0x48   : > { %1584 = vmatprep.subr.bf16.mxu1 %v1668_v33 }
  0x4a   : > { %1573 = vmatpush3.bf16.msra.mxu0 %v1667_v32 }
  0x4b   : > { %1585 = vmatpush3.bf16.msra.mxu1 %v1668_v33  ;;  %1590 = vmatprep.subr.bf16.mxu0 %v1672_v35  ;;  %v1431_v33 = vld [vmem:[%s1951_s3] ss:$0 sm:$0xff] }
  0x4d   : > { %1575 = vmatmul.mubr.msk.bf16.vlgmr.msra.gmra.mxu0 %vm306_vm0, %v868_v22 }
  0x4e   : > { %1587 = vmatmul.mubr.msk.bf16.vlgmr.msra.gmra.mxu1 %vm306_vm0, %v980_v24  ;;  %1591 = vmatpush3.bf16.msra.mxu0 %v1672_v35 }
  0x4f   : > { %1598 = vmatprep.mubr.msk.bf16.mxu0 %vm306_vm0, %v1078_v39  ;;  %1592 = vmatprep.subr.bf16.mxu0 %v1673_v38 }
  0x52   : > { %1593 = vmatpush3.bf16.msra.mxu0 %v1673_v38 }
  0x53   : > { %1594 = vmatprep.subr.bf16.mxu0 %v1674_v40 }
  0x56   : > { %1595 = vmatpush3.bf16.msra.mxu0 %v1674_v40 }
  0x57   : > { %1596 = vmatprep.subr.bf16.mxu0 %v1675_v41 }
  0x5a   : > { %1597 = vmatpush3.bf16.msra.mxu0 %v1675_v41 }
  0x5d   : > { %1599 = vmatmul.mubr.msk.bf16.vlgmr.msra.gmra.mxu0 %vm306_vm0, %v1077_v37 }
  0xdd   : > { %v1504_v42 = vpop.f32.mrf.mxu0 }
  0xde   : > { %v1516_v43 = vpop.f32.mrf.mxu1 }
  0xdf   : > { %v347_v44 = vpop.f32.mrf.mxu0  ;;  %v434_v0 = vadd.f32 %v1516_v43, %v1504_v42 }
  0xe0   : > { %v425_v45 = vpop.f32.mrf.mxu1 }
  0xe1   : > { %v1505_v46 = vpop.f32.mrf.mxu0  ;;  %v426_v3 = vadd.f32 %v425_v45, %v347_v44 }
  0xe2   : > { %v1517_v47 = vpop.f32.mrf.mxu1 }
  0xe3   : > { %v350_v48 = vpop.f32.mrf.mxu0 }
  0xe4   : > { %v428_v49 = vpop.f32.mrf.mxu1 }
  0xe5   : > { %v429_v10 = vadd.f32 %v428_v49, %v350_v48 }
  0xed   : > { %v1528_v50 = vpop.f32.mrf.mxu0 }
  0xee   : > { %v1540_v51 = vpop.f32.mrf.mxu1  ;;  %v536_v4 = vadd.f32 %v1528_v50, %v434_v0 }
  0xef   : > { %v520_v52 = vpop.f32.mrf.mxu0 }
  0xf0   : > { %v622_v53 = vpop.f32.mrf.mxu1  ;;  %v534_v7 = vadd.f32 %v520_v52, %v426_v3  ;;  %v638_v11 = vadd.f32 %v1540_v51, %v536_v4 }
  0xf1   : > { %v1529_v54 = vpop.f32.mrf.mxu0 }
  0xf2   : > { %v1541_v55 = vpop.f32.mrf.mxu1  ;;  %v636_v14 = vadd.f32 %v622_v53, %v534_v7 }
  0xf3   : > { %v523_v56 = vpop.f32.mrf.mxu0 }
  0xf4   : > { %v625_v57 = vpop.f32.mrf.mxu1  ;;  %v535_v15 = vadd.f32 %v523_v56, %v429_v10 }
  0xf6   : > { %v637_v18 = vadd.f32 %v625_v57, %v535_v15 }
  0xfd   : > { %v1552_v58 = vpop.f32.mrf.mxu0 }
  0xfe   : > { %v1564_v59 = vpop.f32.mrf.mxu1  ;;  %v750_v16 = vadd.f32 %v1552_v58, %v638_v11 }
  0xff   : > { %v734_v60 = vpop.f32.mrf.mxu0 }
 0x100   : > { %v826_v61 = vpop.f32.mrf.mxu1  ;;  %v748_v17 = vadd.f32 %v734_v60, %v636_v14  ;;  %v842_v19 = vadd.f32 %v1564_v59, %v750_v16 }
 0x101   : > { %v1553_v62 = vpop.f32.mrf.mxu0 }
 0x102   : > { %v1565_v63 = vpop.f32.mrf.mxu1  ;;  %v840_v20 = vadd.f32 %v826_v61, %v748_v17 }
 0x103   : > { %v737_v1 = vpop.f32.mrf.mxu0 }
 0x104   : > { %v829_v2 = vpop.f32.mrf.mxu1  ;;  %v749_v21 = vadd.f32 %v737_v1, %v637_v18 }
 0x106   : > { %v841_v25 = vadd.f32 %v829_v2, %v749_v21 }
 0x10d   : > { %v1576_v5 = vpop.f32.mrf.mxu0 }
 0x10e   : > { %v1588_v6 = vpop.f32.mrf.mxu1  ;;  %v950_v22 = vadd.f32 %v1576_v5, %v842_v19 }
 0x10f   : > { %v934_v8 = vpop.f32.mrf.mxu0 }
 0x110   : > { %v1046_v9 = vpop.f32.mrf.mxu1  ;;  %v948_v23 = vadd.f32 %v934_v8, %v840_v20  ;;  %v1062_v26 = vadd.f32 %v1588_v6, %v950_v22 }
 0x111   : > { %v1577_v12 = vpop.f32.mrf.mxu0 }
 0x112   : > { %v1589_v13 = vpop.f32.mrf.mxu1  ;;  %v1060_v29 = vadd.f32 %v1046_v9, %v948_v23 }
 0x113   : > { %v937_v24 = vpop.f32.mrf.mxu0 }
 0x114   : > { %v949_v30 = vadd.f32 %v937_v24, %v841_v25  ;;  %v1049_v32 = vpop.f32.mrf.mxu1 }
 0x116   : > { %v1061_v38 = vadd.f32 %v1049_v32, %v949_v30 }
 0x11d   : > { %v1600_v27 = vpop.f32.mrf.mxu0 }
 0x11e   : > { %v1159_v31 = vadd.f32 %v1600_v27, %v1062_v26 }
 0x11f   : > { %v1143_v34 = vpop.f32.mrf.mxu0 }
 0x120   : > { %v1169_v35 = vmul.f32 %v1430_v28, %v1159_v31  ;;  %v1157_v36 = vadd.f32 %v1143_v34, %v1060_v29 }
 0x121   : > { %v1601_v37 = vpop.f32.mrf.mxu0 }
 0x122   : > { %v1179_v39 = vadd.f32 %v1431_v33, %v1169_v35  ;;  %v1167_v40 = vmul.f32 %v1430_v28, %v1157_v36 }
 0x123   : > { %v1146_v41 = vpop.f32.mrf.mxu0 }
 0x124   : > { %v1182_v42 = vmax.f32 %v1179_v39, 0.0  ;;  %v1177_v43 = vadd.f32 %v1431_v33, %v1167_v40  ;;  %v1158_v44 = vadd.f32 %v1146_v41, %v1061_v38 }
 0x126   : > { %v1439_v45 = vpack.c.bf16 %v1182_v42, %v1182_v42  ;;  %v1180_v46 = vmax.f32 %v1177_v43, 0.0  ;;  %v1168_v47 = vmul.f32 %v1430_v28, %v1158_v44 }
 0x128   : > { %1199 = vst.msk [vmem:[%s233_s12 + $0x8] sm:$0xf] %vm1196_vm7, %v1439_v45  ;;  %v1437_v48 = vpack.c.bf16 %v1180_v46, %v1180_v46  ;;  %v1178_v49 = vadd.f32 %v1431_v33, %v1168_v47 }
 0x12a   : > { %1197 = vst.msk [vmem:[%s233_s12] sm:$0xf] %vm1196_vm7, %v1437_v48  ;;  %v1181_v50 = vmax.f32 %v1178_v49, 0.0 }
 0x12c   : > { %v1438_v51 = vpack.c.bf16 %v1181_v50, %v1181_v50 }
 0x12e   : > { %1198 = vst.msk [vmem:[%s233_s12 + $0x4] sm:$0xf] %vm1196_vm7, %v1438_v51 }
 0x12f PF: > { %s14_s17 = sadd.s32 1, %s1699_s17   ;;  %s1953_s15 = smov %s1695_s16 }
 0x130   : > { %p11_p5 = scmp.ge.s32.totalorder %s14_s17, 4   ;;  %s1954_s16 = smov %s1956_s18 }
 0x132   :  { %13 = sbr.rel (!%p11_p5) target bundleno = 2 (0x2), region = 74 }

// kernel: spatial_encoder_forward.13
= control target key start
LH: loop header
LB: loop body
LE: loop exit
PB: predicated region body
PF: predicated region fallthrough
CT: control target
= control target key end

     0   :  { %9 = vsyncpa [#allocation3], 0  ;;  %s1548_s0 = inlined_call_operand.vmem [shape: bf16[2,8,8,64], index: 0, kind: input, shape index: {}]   ;;  %s1549_s1 = inlined_call_operand.vmem [shape: bf16[2,4,4,64], index: 1, kind: input, shape index: {}]   ;;  %s1550_s2 = inlined_call_operand.vmem [shape: bf16[2,4,4], index: 2, kind: input, shape index: {}]   ;;  %s1551_s3 = inlined_call_operand.vmem [shape: bf16[8,4], index: 3, kind: input, shape index: {}]   ;;  %s1552_s4 = inlined_call_operand.hbm [shape: f32[2,8,8,128], index: 4, kind: output, shape index: {}]  }
   0x1   :  { %11 = vsyncpa [#allocation3 + $0x1], 0  ;;  %s1327_s15 = smov 0   ;;  %s1329_s16 = smov 0  }
   0x2   :  { %s1331_s17 = smov 0   ;;  %s1333_s18 = smov 0  }
   0x3   :  { %s1335_s19 = smov 0   ;;  %s1337_s20 = smov 0  }
   0x4   :  { %s1339_s21 = smov 0   ;;  %s1341_s22 = smov 0  }
   0x5 LB: > { %s1017_s23 = sadd.s32 4294967295, %s1292_s22   ;;  %s1018_s24 = sadd.s32 4294967294, %s1292_s22   ;;  %s1292_s22 = sphi %s1341_s22, %s17_s22   ;;  %s1288_s21 = sphi %s1339_s21, %s1561_s21   ;;  %s1284_s20 = sphi %s1337_s20, %s1560_s20   ;;  %s1280_s19 = sphi %s1335_s19, %s1559_s19   ;;  %s1276_s18 = sphi %s1333_s18, %s1558_s18   ;;  %s1272_s17 = sphi %s1331_s17, %s1557_s17   ;;  %s1268_s16 = sphi %s1329_s16, %s1556_s16   ;;  %s1264_s15 = sphi %s1327_s15, %s1555_s15  }
   0x6   : > { %s26_s25 = sadd.s32 1, %s1284_s20  ;;  %s29_s26 = sadd.s32 1, %s1288_s21 }
   0x7   : > { %p27_p0 = scmp.ge.s32.totalorder %s26_s25, 2  ;;  %p149_p1 = scmp.ne.s32.totalorder %s1272_s17, %s1268_s16 }
   0x8   : > { %p150_p2 = scmp.eq.s32.totalorder %s1017_s23, 3  ;;  %p155_p5 = scmp.ne.s32.totalorder %s1268_s16, %s1264_s15 }
   0x9   : > { %s1563_s25 = smov (%p27_p0, %s26_s25), 0  ;;  %s1565_s26 = smov (!%p27_p0, %s29_s26), %s1288_s21 }
   0xa   : > { %s135_s27 = ssub.s32 %s1284_s20, %s1563_s25  ;;  %p1378_p3 = por %p150_p2, %p149_p1 }
   0xb   : > { %p31_p4 = scmp.ge.s32.totalorder %s1565_s26, 2  ;;  %p156_p6 = scmp.eq.s32.totalorder %s1018_s24, 3 }
   0xc   : > { %p1021_p7 = scmp.ge.s32.totalorder %s1292_s22, 1  ;;  %p205_p9 = scmp.lt.s32.totalorder %s1292_s22, 5 }
   0xd   : > { %s1567_s26 = smov (%p31_p4, %s1565_s26), 0  ;;  %p1387_p8 = por %p156_p6, %p155_p5 }
   0xe   : > { %s134_s30 = ssub.s32 %s1288_s21, %s1567_s26  ;;  %s139_s5 = sadd.s32 1, %s1272_s17 }
   0xf   : > { %s136_s6 = sor.u32 %s135_s27, %s134_s30  ;;  %p206_p10 = pnand %p1021_p7, %p205_p9 }
  0x10   : > { %p137_p11 = scmp.eq.s32.totalorder %s136_s6, 0  ;;  %p245_p12 = scmp.lt.s32.totalorder (!%p206_p10), %s1280_s19, 1 }
  0x11   : > { %209 = sbr.rel (%p206_p10) target bundleno = 1080 (0x438), region = 36  ;;  %s1298_s13 = smov (!%p206_p10), 64  }
  0x12   : > { %s1396_s7 = scalar_select %p137_p11, %s1272_s17, %s139_s5  }
  0x13   : > { %p259_p13 = scmp.lt.s32.totalorder (!%p206_p10), %s1276_s18, 1  ;;  %s1467_s10 = sshll.u32 (!%p206_p10), %s1276_s18, 2 }
  0x14   : > { %p247_p0 = scmp.lt.s32.totalorder (!%p206_p10), %s1467_s10, 7  ;;  %s241_s11 = sand.u32 (!%p206_p10), 1, %s1268_s16  }
  0x16   : > { %v274_v0 = vlaneseq  ;;  %v1294_v1 = vmov 1934713408   ;;  %s1400_s8 = scalar_select %p245_p12, %s1280_s19, 1  ;;  %v1295_v4 = vmov 1983009808   ;;  %v1296_v6 = vmov 0  }
  0x17   : > { %v272_v2 = vunpack.c.l.s4 %v1294_v1  ;;  %v301_v5 = vunpack.c.l.s4 %v1295_v4  ;;  %402 = vmatprep.mubr.bf16.mxu0 %v1296_v6  ;;  %v1297_v24 = vmov 0.0   ;;  %s260_s14 = scalar_select %p259_p13, %s1276_s18, 1  ;;  %vm318_vm0 = vcmask 523264   ;;  %v453_v51 = vld [vmem:[%s1551_s3] sm:$0xf] }
  0x18   : > { %v275_v3 = vshrl.u32 %v274_v0, 7  ;;  %s1024_s9 = sshll.u32 %s1400_s8, 3  ;;  %v325_v25 = vcombine.low %v1297_v24, %v1297_v24  ;;  %vm365_vm1 = vcmask 1041408   ;;  %vm361_vm2 = vcmask 31744   ;;  %s1049_s18 = sshll.u32 %s1280_s19, 3 }
  0x19   : > { %v273_v7 = vunpack.c.0.s8 %v272_v2  ;;  %s258_s12 = scalar_lea.vmem %s1549_s1, %s1024_s9  ;;  %v302_v9 = vunpack.c.0.s8 %v301_v5  ;;  %s1028_s23 = sshll.u32 %s260_s14, 1  ;;  %v571_v52 = vsel %vm361_vm2, %v453_v51, 0  ;;  %1117 = vmatprep.subr.msk.bf16.mxu1 %vm361_vm2, %v453_v51  ;;  %vm890_vm3 = vcmask 1048064  }
  0x1a   : > { %v1198_v10 = vld.sshfl [vmem:[%s258_s12] sm:$0x33 pattern:$0x73516240]  ;;  %s262_s30 = scalar_lea.vmem %s1550_s2, %s1028_s23  ;;  %1115 = vmatpush3.bf16.xpose.msra.mxu1 %v571_v52  ;;  %s1022_s14 = sshll.u32 %s241_s11, 5 }
  0x1b   : > { %v1408_v8 = vsub.s32 %v273_v7, %v275_v3  ;;  %v1199_v11 = vld.sshfl [vmem:[%s258_s12 + $0x2] sm:$0x33 pattern:$0x73516240]  ;;  %v1410_v12 = vsub.s32 %v302_v9, %v275_v3  ;;  %v291_v13 = vshrl.u32 %v1198_v10, 16  ;;  %v278_v15 = vcombine.high %v1198_v10, %v1296_v6  ;;  %s248_s12 = scalar_select %p247_p0, %s1467_s10, 7 }
  0x1c   : > { %v292_v14 = vshrl.u32 %v1199_v11, 16  ;;  %v287_v16 = vcombine.high %v1199_v11, %v1296_v6  ;;  %v290_v17 = vpack.i.b16 %v1199_v11, %v1198_v10  ;;  %v265_v39 = vld [vmem:[%s262_s30] sm:$0x3]  ;;  %s243_s6 = scalar_lea.vmem [#allocation2], %s1022_s14  ;;  %s908_s8 = sadd.s32 %s1049_s18, %s1467_s10 }
  0x1d   : > { %v297_v19 = vshrl.u32 %v278_v15, 16  ;;  %v332_v27 = vrot.slane %v325_v25, %v1410_v12  ;;  %s250_s23 = sadd.s32 %s1024_s9, %s248_s12  ;;  %s1050_s9 = sshll.u32 %s908_s8, 7 }
  0x1e   : > { %v293_v18 = vpack.i.b16 %v292_v14, %v291_v13  ;;  %v298_v20 = vshrl.u32 %v287_v16, 16  ;;  %v296_v21 = vpack.i.b16 %v287_v16, %v278_v15  ;;  %s1025_s24 = sshll.u32 %s250_s23, 2  ;;  %s911_s12 = sshll.u32 %s243_s6, 4  ;;  %s1493_s12 = int_to_ptr.vmem [resolvable:$true] %s911_s12 }
  0x1f   : > { %v333_v28 = vcombine.low %v332_v27, %v332_v27  ;;  %v334_v29 = vcombine.high %v332_v27, %v332_v27  ;;  %s252_s5 = scalar_lea.vmem %s1548_s0, %s1025_s24  ;;  %s1491_s24 = scalar_lea.hbm %s1552_s4, %s1050_s9 }
  0x20   : > { %v306_v22 = vrot.slane %v293_v18, %v1410_v12  ;;  %v299_v23 = vpack.i.b16 %v298_v20, %v297_v19  ;;  %s1200_s27 = scalar_lea.vmem %s1493_s12, 512  ;;  %s1299_s19 = smov [#allocation2]  }
  0x21   : > { %v341_v30 = vrot.slane %v333_v28, %v1408_v8  ;;  %v348_v31 = vrot.slane %v334_v29, %v1408_v8  ;;  %p1201_p1 = scmp.ne.s32.totalorder %s1493_s12, %s1200_s27  ;;  %s1204_s10 = sshll.u32 %s1299_s19, 4  ;;  %s1205_s10 = int_to_ptr.vmem [resolvable:$false] %s1204_s10 }
  0x22   : > { %307 = vrot.lane.b32.xlu0 %v306_v22, %s1298_s13  ;;  %v315_v26 = vrot.slane %v299_v23, %v1410_v12  ;;  %s1206_s30 = scalar_lea.vmem %s1205_s10, 1024  ;;  %p1207_p5 = scmp.lt.s32.totalorder %s1493_s12, %s1205_s10 }
  0x23   : > { %v349_v32 = vcombine.high %v341_v30, %v1297_v24  ;;  %v350_v33 = vcombine.high %v348_v31, %v1297_v24  ;;  %p1202_p2 = pnand %p1201_p1, %p1378_p3  ;;  %p1208_p6 = scmp.lt.s32.totalorder %s1206_s30, %s1200_s27 }
  0x25   : > { %352 = vrot.lane.b32.xlu1 %v349_v32, %s1298_s13  ;;  %p1203_p4 = pneg %p1202_p2  ;;  %p1209_p7 = por %p1208_p6, %p1207_p5 }
  0x26   : > { %316 = vrot.lane.b32.xlu0 %v315_v26, %s1298_s13 }
  0x27   : > { %p1210_p9 = pnand %p1209_p7, %p1203_p4 }
  0x29   : > { %356 = vrot.lane.b32.xlu1 %v350_v33, %s1298_s13 }
  0x94   : > { %v308_v34 = vpop.permute.xlu0 %307 }
  0x95   : > { %v321_v35 = vsel %vm318_vm0, %v290_v17, %v308_v34 }
  0x96   : > { %v366_v38 = vsel %vm365_vm1, %v321_v35, 0 }
  0x97   : > { %v353_v40 = vpop.permute.xlu1 %352 }
  0x98   : > { %v317_v36 = vpop.permute.xlu0 %316  ;;  %v359_v42 = vsel %vm318_vm0, %v341_v30, %v353_v40 }
  0x99   : > { %v324_v37 = vsel %vm318_vm0, %v296_v21, %v317_v36 }
  0x9a   : > { %1029 = vmatprep.subr.msk.bf16.mxu0 %vm365_vm1, %v324_v37 }
  0x9b   : > { %385 = vmatpush1.bf16.msra.mxu0 %v366_v38  ;;  %v357_v41 = vpop.permute.xlu1 %356 }
  0x9c   : > { %v360_v44 = vsel %vm318_vm0, %v348_v31, %v357_v41  ;;  %1116 = vmatprep.subr.msk.bf16.mxu0 %vm361_vm2, %v453_v51 }
  0x9e   : > { %1030 = vmatmul.mubr.msk.bf16.vlgmr.msra.gmra.mxu0 %vm361_vm2, %v265_v39 }
  0x9f   : > { %1081 = vmatpush3.bf16.xpose.msra.mxu0 %v571_v52 }
 0x15e   : > { %v404_v43 = vpop.f32.mrf.mxu0 }
 0x15f   : > { %v405_v45 = vadd.f32 %v404_v43, %v359_v42 }
 0x160   : > { %v406_v46 = vpop.f32.mrf.mxu0 }
 0x161   : > { %v407_v47 = vadd.f32 %v406_v46, %v360_v44  ;;  %412 = vrot.lane.b32.xlu0 %v405_v45, %s1298_s13 }
 0x162   : > { %v408_v48 = vpop.f32.mrf.mxu0 }
 0x163   : > { %v419_v49 = vcombine.low %v405_v45, %v407_v47  ;;  %416 = vrot.lane.b32.xlu1 %v407_v47, %s1298_s13 }
 0x164   : > { %v409_v50 = vpop.f32.mrf.mxu0 }
 0x165   : > { %v426_v56 = vrot.slane %v419_v49, %v1410_v12 }
 0x1d3   : > { %v413_v53 = vpop.permute.xlu0 %412 }
 0x1d5   : > { %v417_v54 = vpop.permute.xlu1 %416 }
 0x1d6   : > { %v427_v55 = vcombine.low %v413_v53, %v417_v54  ;;  %v1055_v53 = vld [vmem:[%s252_s5] sm:$0xff]  }
 0x1d7   : > { %v1057_v54 = vunpack.c.h.bf16 %v1055_v53 }
 0x1d8   : > { %v434_v57 = vrot.slane %v427_v55, %v1410_v12  ;;  %v1056_v55 = vunpack.c.l.bf16 %v1055_v53 }
 0x1d9   : > { %871 = vst.msk [vmem:[%s243_s6 + $0x8] sm:$0xff] %vm318_vm0, %v1057_v54 }
 0x1da   : > { %v435_v58 = vcombine.low %v426_v56, %v434_v57  ;;  %v436_v62 = vcombine.high %v426_v56, %v434_v57  ;;  %870 = vst.msk [vmem:[%s243_s6] sm:$0xff] %vm318_vm0, %v1056_v55 }
 0x1dc   : > { %v443_v59 = vrot.slane %v435_v58, %v1408_v8  ;;  %v450_v0 = vrot.slane %v436_v62, %v1408_v8  ;;  %v1062_v58 = vld [vmem:[%s252_s5 + $0x8] sm:$0xff]  }
 0x1de   : > { %v454_v60 = vpack.c.bf16 %v443_v59, %v443_v59  ;;  %v451_v61 = vcombine.high %v443_v59, %v1297_v24  ;;  %v452_v1 = vcombine.high %v450_v0, %v1297_v24  ;;  %v456_v3 = vpack.c.bf16 %v450_v0, %v450_v0 }
 0x1df   : > { %v1061_v59 = vunpack.c.h.bf16 %v1062_v58 }
 0x1e0   : > { %458 = vxpose.xlu1.c.b16.start.end [1/1] (short) (narrow) %v454_v60, 64  ;;  %v455_v63 = vpack.c.bf16 %v451_v61, %v451_v61  ;;  %v457_v2 = vpack.c.bf16 %v452_v1, %v452_v1  ;;  %v1060_v60 = vunpack.c.l.bf16 %v1062_v58 }
 0x1e1   : > { %873 = vst.msk [vmem:[%s243_s6 + $0x18] sm:$0xff] %vm318_vm0, %v1061_v59 }
 0x1e2   : > { %474 = vxpose.xlu0.c.b16.start.end [1/1] (short) (narrow) %v455_v63, 64  ;;  %872 = vst.msk [vmem:[%s243_s6 + $0x10] sm:$0xff] %vm318_vm0, %v1060_v60 }
 0x1ed   : > { %506 = vxpose.xlu1.c.b16.start.end [1/1] (short) (narrow) %v457_v2, 64 }
 0x1ef   : > { %490 = vxpose.xlu0.c.b16.start.end [1/1] (short) (narrow) %v456_v3, 64 }
 0x242   : > { %v466_v4 = vpop.trf.xlu1 }
 0x243   : > { %1082 = vmatprep.mubr.msk.bf16.mxu0 %vm361_vm2, %v466_v4 }
 0x244   : > { %v482_v5 = vpop.trf.xlu0 }
 0x246   : > { %v467_v6 = vpop.trf.xlu1 }
 0x247   : > { %1083 = vmatmul.mubr.msk.bf16.vlgmr.msra.gmra.mxu0 %vm361_vm2, %v467_v6 }
 0x248   : > { %v483_v7 = vpop.trf.xlu0 }
 0x24a   : > { %v468_v9 = vpop.trf.xlu1 }
 0x24b   : > { %1086 = vmatprep.mubr.msk.bf16.mxu0 %vm361_vm2, %v468_v9 }
 0x24c   : > { %v484_v10 = vpop.trf.xlu0 }
 0x24d   : > { %1094 = vmatprep.mubr.msk.bf16.mxu1 %vm361_vm2, %v484_v10 }
 0x24e   : > { %v469_v8 = vpop.trf.xlu1 }
 0x24f   : > { %1087 = vmatmul.mubr.msk.bf16.gmra.mxu0 %vm361_vm2, %v469_v8 }
 0x250   : > { %1090 = vmatprep.mubr.msk.bf16.mxu0 %vm361_vm2, %v482_v5  ;;  %v485_v11 = vpop.trf.xlu0 }
 0x251   : > { %1095 = vmatmul.mubr.msk.bf16.vlgmr.msra.gmra.mxu1 %vm361_vm2, %v485_v11 }
 0x252   : > { %v514_v15 = vpop.trf.xlu1 }
 0x254   : > { %v498_v12 = vpop.trf.xlu0 }
 0x255   : > { %1098 = vmatprep.mubr.msk.bf16.mxu1 %vm361_vm2, %v498_v12 }
 0x256   : > { %v515_v17 = vpop.trf.xlu1 }
 0x257   : > { %1091 = vmatmul.mubr.msk.bf16.gmra.mxu0 %vm361_vm2, %v483_v7 }
 0x258   : > { %v499_v13 = vpop.trf.xlu0 }
 0x259   : > { %1099 = vmatmul.mubr.msk.bf16.gmra.mxu1 %vm361_vm2, %v499_v13 }
 0x25a   : > { %v516_v18 = vpop.trf.xlu1 }
 0x25c   : > { %v500_v14 = vpop.trf.xlu0 }
 0x25d   : > { %1102 = vmatprep.mubr.msk.bf16.mxu1 %vm361_vm2, %v500_v14 }
 0x25e   : > { %v517_v19 = vpop.trf.xlu1 }
 0x260   : > { %v501_v16 = vpop.trf.xlu0 }
 0x261   : > { %1103 = vmatmul.mubr.msk.bf16.gmra.mxu1 %vm361_vm2, %v501_v16 }
 0x262   : > { %1106 = vmatprep.mubr.msk.bf16.mxu1 %vm361_vm2, %v514_v15 }
 0x269   : > { %1107 = vmatmul.mubr.msk.bf16.gmra.mxu1 %vm361_vm2, %v515_v17 }
 0x26a   : > { %1110 = vmatprep.mubr.msk.bf16.mxu1 %vm361_vm2, %v516_v18 }
 0x271   : > { %1111 = vmatmul.mubr.msk.bf16.gmra.mxu1 %vm361_vm2, %v517_v19 }
 0x307   : > { %v1084_v20 = vpop.f32.mrf.mxu0 }
 0x309   : > { %v607_v21 = vpop.f32.mrf.mxu0 }
 0x30a   : > { %734 = vxpose.xlu0.b32.start [1/8] (short) (narrow) %v607_v21, 8 }
 0x30b   : > { %v1085_v22 = vpop.f32.mrf.mxu0 }
 0x30d   : > { %v610_v23 = vpop.f32.mrf.mxu0 }
 0x30e   : > { %735 = vxpose.xlu0.b32.cont [2/8] (short) (narrow) %v610_v23, 8 }
 0x30f   : > { %v1088_v24 = vpop.f32.mrf.mxu0 }
 0x311   : > { %v623_v25 = vpop.f32.mrf.mxu0  ;;  %v1096_v26 = vpop.f32.mrf.mxu1 }
 0x312   : > { %736 = vxpose.xlu0.b32.cont [3/8] (short) (narrow) %v1084_v20, 8 }
 0x313   : > { %v1089_v27 = vpop.f32.mrf.mxu0  ;;  %v655_v28 = vpop.f32.mrf.mxu1 }
 0x315   : > { %v626_v29 = vpop.f32.mrf.mxu0  ;;  %v1097_v30 = vpop.f32.mrf.mxu1 }
 0x316   : > { %737 = vxpose.xlu0.b32.cont [4/8] (short) (narrow) %v1085_v22, 8 }
 0x317   : > { %v1092_v31 = vpop.f32.mrf.mxu0  ;;  %v658_v32 = vpop.f32.mrf.mxu1 }
 0x319   : > { %v639_v33 = vpop.f32.mrf.mxu0  ;;  %v1100_v34 = vpop.f32.mrf.mxu1 }
 0x31a   : > { %738 = vxpose.xlu0.b32.cont [5/8] (short) (narrow) %v623_v25, 8  ;;  %766 = vxpose.xlu1.b32.start [1/8] (short) (narrow) %v639_v33, 8 }
 0x31b   : > { %v1093_v35 = vpop.f32.mrf.mxu0  ;;  %v671_v36 = vpop.f32.mrf.mxu1 }
 0x31d   : > { %v642_v37 = vpop.f32.mrf.mxu0  ;;  %v1101_v38 = vpop.f32.mrf.mxu1 }
 0x31e   : > { %739 = vxpose.xlu0.b32.cont [6/8] (short) (narrow) %v626_v29, 8  ;;  %767 = vxpose.xlu1.b32.cont [2/8] (short) (narrow) %v642_v37, 8 }
 0x31f   : > { %v674_v39 = vpop.f32.mrf.mxu1 }
 0x321   : > { %v1104_v40 = vpop.f32.mrf.mxu1 }
 0x322   : > { %740 = vxpose.xlu0.b32.cont [7/8] (short) (narrow) %v1088_v24, 8  ;;  %768 = vxpose.xlu1.b32.cont [3/8] (short) (narrow) %v1092_v31, 8 }
 0x323   : > { %v687_v41 = vpop.f32.mrf.mxu1 }
 0x325   : > { %v1105_v42 = vpop.f32.mrf.mxu1 }
 0x326   : > { %741 = vxpose.xlu0.b32.end [8/8] (short) (narrow) %v1089_v27, 8  ;;  %769 = vxpose.xlu1.b32.cont [4/8] (short) (narrow) %v1093_v35, 8 }
 0x327   : > { %v690_v43 = vpop.f32.mrf.mxu1 }
 0x329   : > { %v1108_v44 = vpop.f32.mrf.mxu1 }
 0x32a   : > { %770 = vxpose.xlu1.b32.cont [5/8] (short) (narrow) %v655_v28, 8  ;;  %798 = vxpose.xlu0.b32.start [1/8] (short) (narrow) %v671_v36, 8 }
 0x32b   : > { %v703_v45 = vpop.f32.mrf.mxu1 }
 0x32d   : > { %v1109_v46 = vpop.f32.mrf.mxu1 }
 0x32e   : > { %771 = vxpose.xlu1.b32.cont [6/8] (short) (narrow) %v658_v32, 8  ;;  %799 = vxpose.xlu0.b32.cont [2/8] (short) (narrow) %v674_v39, 8 }
 0x32f   : > { %v706_v47 = vpop.f32.mrf.mxu1 }
 0x331   : > { %v1112_v48 = vpop.f32.mrf.mxu1 }
 0x332   : > { %772 = vxpose.xlu1.b32.cont [7/8] (short) (narrow) %v1096_v26, 8  ;;  %800 = vxpose.xlu0.b32.cont [3/8] (short) (narrow) %v1100_v34, 8 }
 0x333   : > { %v719_v49 = vpop.f32.mrf.mxu1 }
 0x335   : > { %v1113_v50 = vpop.f32.mrf.mxu1 }
 0x336   : > { %773 = vxpose.xlu1.b32.end [8/8] (short) (narrow) %v1097_v30, 8  ;;  %801 = vxpose.xlu0.b32.cont [4/8] (short) (narrow) %v1101_v38, 8 }
 0x337   : > { %v722_v51 = vpop.f32.mrf.mxu1 }
 0x33a   : > { %802 = vxpose.xlu0.b32.cont [5/8] (short) (narrow) %v687_v41, 8  ;;  %830 = vxpose.xlu1.b32.start [1/8] (short) (narrow) %v703_v45, 8 }
 0x33e   : > { %803 = vxpose.xlu0.b32.cont [6/8] (short) (narrow) %v690_v43, 8  ;;  %831 = vxpose.xlu1.b32.cont [2/8] (short) (narrow) %v706_v47, 8 }
 0x342   : > { %804 = vxpose.xlu0.b32.cont [7/8] (short) (narrow) %v1104_v40, 8  ;;  %832 = vxpose.xlu1.b32.cont [3/8] (short) (narrow) %v1108_v44, 8 }
 0x346   : > { %805 = vxpose.xlu0.b32.end [8/8] (short) (narrow) %v1105_v42, 8  ;;  %833 = vxpose.xlu1.b32.cont [4/8] (short) (narrow) %v1109_v46, 8 }
 0x34a   : > { %834 = vxpose.xlu1.b32.cont [5/8] (short) (narrow) %v719_v49, 8 }
 0x34e   : > { %835 = vxpose.xlu1.b32.cont [6/8] (short) (narrow) %v722_v51, 8 }
 0x352   : > { %836 = vxpose.xlu1.b32.cont [7/8] (short) (narrow) %v1112_v48, 8 }
 0x356   : > { %837 = vxpose.xlu1.b32.end [8/8] (short) (narrow) %v1113_v50, 8 }
 0x386   : > { %v750_v52 = vpop.trf.xlu0 }
 0x387   : > { %878 = vrot.lane.b32.xlu0 %v750_v52, %s1298_s13 }
 0x396   : > { %v782_v56 = vpop.trf.xlu1 }
 0x397   : > { %880 = vrot.lane.b32.xlu1 %v782_v56, %s1298_s13 }
 0x3a6   : > { %v814_v57 = vpop.trf.xlu0 }
 0x3a7   : > { %882 = vrot.lane.b32.xlu0 %v814_v57, %s1298_s13 }
 0x3b6   : > { %v846_v61 = vpop.trf.xlu1 }
 0x3b7   : > { %884 = vrot.lane.b32.xlu1 %v846_v61, %s1298_s13  ;;  %s1497_s13 = scalar_lea.sflag [#allocation3], %s241_s11 }
 0x3f9   : > { %v879_v62 = vpop.permute.xlu0 %878 }
 0x3fa   : > { %891 = vst.msk [vmem:[%s243_s6] sm:$0xff] %vm890_vm3, %v879_v62 }
 0x409   : > { %v881_v63 = vpop.permute.xlu1 %880 }
 0x40a   : > { %892 = vst.msk [vmem:[%s243_s6 + $0x8] sm:$0xff] %vm890_vm3, %v881_v63 }
 0x419   : > { %v883_v0 = vpop.permute.xlu0 %882 }
 0x41a   : > { %893 = vst.msk [vmem:[%s243_s6 + $0x10] sm:$0xff] %vm890_vm3, %v883_v0 }
 0x429   : > { %v885_v1 = vpop.permute.xlu1 %884 }
 0x42a   : > { %894 = vst.msk [vmem:[%s243_s6 + $0x18] sm:$0xff] %vm890_vm3, %v885_v1 }
 0x42b   : > { %1213 = shalt.err (!%p1210_p9)
}
 0x42c   : > { %s1214_s11 = scalar_lea.hbm %s1491_s24, 512  ;;  %s1218_s18 = scalar_lea.hbm %s1552_s4, 2048 }
 0x42d   : > { %p1215_p10 = scmp.ne.s32.totalorder %s1491_s24, %s1214_s11  ;;  %p1219_p13 = scmp.lt.s32.totalorder %s1491_s24, %s1552_s4 }
 0x42e   : > { %p1220_p0 = scmp.lt.s32.totalorder %s1218_s18, %s1214_s11 }
 0x42f   : > { %p1216_p11 = pnand %p1215_p10, %p1378_p3 }
 0x430   : > { %p1221_p1 = por %p1220_p0, %p1219_p13 }
 0x431   : > { %p1217_p12 = pneg %p1216_p11 }
 0x433   : > { %p1222_p2 = pnand %p1221_p1, %p1217_p12 }
 0x435   : > { %1225 = shalt.err (!%p1222_p2)
}
 0x436   : > { %s1300_s14 = smov 128   ;;  %s1301_s23 = smov 8  }
 0x437   : > { %1118 = dma.vmem_to_hbm [thread:$0]  (%p1378_p3), %s1493_s12, 512, %s1491_s24, %s1497_s13, %s1300_s14, %s1300_s14, %s1301_s23  }
 0x438 PF: > { %p1124_p4 = scmp.ge.s32.totalorder %s1292_s22, 2  ;;  %s926_s27 = sand.u32 1, %s1264_s15  }
 0x439   : > { %s927_s19 = scalar_lea.sflag [#allocation3], %s926_s27 }
 0x43a   : > { %p1121_p5 = pnand %p1124_p4, %p1387_p8 }
 0x43c   : > { %p1122_p6 = pneg %p1121_p5 }
 0x43e   : > { %1259 = dma.done.wait (%p1122_p6), %s927_s19, 512  }
 0x43f   : > { %1261 = vsyncadd (%p1122_p6), %s927_s19, 4294966784  ;;  %s17_s22 = sadd.s32 1, %s1292_s22   ;;  %s1555_s15 = smov %s1268_s16 }
 0x440   : > { %p14_p7 = scmp.ge.s32.totalorder %s17_s22, 6   ;;  %s1556_s16 = smov %s1272_s17 }
 0x441   : > { %s1557_s17 = smov %s1396_s7  ;;  %s1558_s18 = smov %s1284_s20 }
 0x442   : > { %s1559_s19 = smov %s1288_s21  ;;  %s1560_s20 = smov %s1563_s25 }
 0x443   : > { %s1561_s21 = smov %s1567_s26  ;;  %16 = sbr.rel (!%p14_p7) target bundleno = 5 (0x5), region = 77 }
 0x448   :  { %932 = vsyncpa [#allocation3], 1 }
 0x449   :  { %934 = vsyncpa [#allocation3 + $0x1], 1 }

// kernel: spatial_encoder_forward.10
= control target key start
LH: loop header
LB: loop body
LE: loop exit
PB: predicated region body
PF: predicated region fallthrough
CT: control target
= control target key end

     0   :  { %s1827_s18 = smov 0   ;;  %s1829_s19 = smov 0   ;;  %s2056_s0 = inlined_call_operand.vmem [shape: bf16[2,1,42,64], index: 0, kind: input, shape index: {}]   ;;  %s2057_s1 = inlined_call_operand.vmem [shape: bf16[9,64,64], index: 1, kind: input, shape index: {}]   ;;  %s2058_s2 = inlined_call_operand.vmem [shape: f32[1,64], index: 2, kind: input, shape index: {}]   ;;  %s2059_s3 = inlined_call_operand.vmem [shape: f32[1,64], index: 3, kind: input, shape index: {}]   ;;  %s2060_s4 = inlined_call_operand.vmem [shape: bf16[2,1,24,64], index: 4, kind: input, shape index: {}]   ;;  %s2061_s5 = inlined_call_operand.vmem [shape: bf16[2,1,24,64], index: 5, kind: output, shape index: {}]  }
   0x1   :  { %s1831_s20 = smov 0  }
   0x2 LB: > { %s27_s21 = sadd.s32 1, %s1791_s19  ;;  %p1387_p0 = scmp.ge.s32.totalorder %s1795_s20, 1  ;;  %s1795_s20 = sphi %s1831_s20, %s15_s20   ;;  %s1791_s19 = sphi %s1829_s19, %s2063_s19   ;;  %s1787_s18 = sphi %s1827_s18, %s2062_s18  }
   0x3   : > { %p29_p1 = scmp.ge.s32.totalorder %s27_s21, 2  ;;  %p223_p2 = scmp.lt.s32.totalorder %s1795_s20, 3 }
   0x5   : > { %s2065_s21 = smov (%p29_p1, %s27_s21), 0  ;;  %p224_p3 = pnand %p1387_p0, %p223_p2 }
   0x6   : > { %p268_p4 = scmp.lt.s32.totalorder (!%p224_p3), %s1787_s18, 1 }
   0x7   : > { %227 = sbr.rel (%p224_p3) target bundleno = 305 (0x131), region = 40 }
   0xc   : > { %v1724_v0 = vld [vmem:[%s2057_s1 + $0x38] sm:$0xff]   ;;  %v1726_v2 = vld [vmem:[%s2057_s1 + $0x30] sm:$0xff]   ;;  %s2067_s18 = smov (!%p268_p4, %s1787_s18), 1  ;;  %v1728_v4 = vld [vmem:[%s2057_s1 + $0x28] sm:$0xff]   ;;  %vm367_vm0 = vcmask 523264   ;;  %vm513_vm2 = vcmask 1046528  }
   0xd   : > { %v1725_v1 = vld [vmem:[%s2057_s1 + $0x18] sm:$0xff]   ;;  %1590 = vmatprep.subr.bf16.mxu0 %v1724_v0  ;;  %v1727_v3 = vld [vmem:[%s2057_s1 + $0x10] sm:$0xff]   ;;  %s1698_s7 = smul.u32 24, %s2067_s18  ;;  %v1729_v5 = vld [vmem:[%s2057_s1 + $0x8] sm:$0xff]   ;;  %vm327_vm1 = vsmask.f32 7424 }
   0xe   : > { %1602 = vmatprep.subr.bf16.mxu1 %v1725_v1  ;;  %1591 = vmatpush3.bf16.msra.mxu0 %v1724_v0  ;;  %v1730_v6 = vld [vmem:[%s2057_s1 + $0x20] sm:$0xff]   ;;  %v1735_v16 = vld [vmem:[%s2057_s1 + $0x58] sm:$0xff]   ;;  %v1737_v25 = vld [vmem:[%s2057_s1 + $0x50] sm:$0xff]   ;;  %vm615_vm3 = vcmask 1044480   ;;  %vm713_vm4 = vsmask.f32 4352 }
   0xf   : > { %1603 = vmatpush3.bf16.msra.mxu1 %v1725_v1  ;;  %1592 = vmatprep.subr.bf16.mxu0 %v1726_v2  ;;  %s1869_s12 = scalar_lea.vmem %s2056_s0, %s1698_s7  ;;  %v1731_v10 = vld [vmem:[%s2057_s1] sm:$0xff]   ;;  %v1736_v20 = vld [vmem:[%s2057_s1 + $0x78] sm:$0xff]   ;;  %v1738_v27 = vld [vmem:[%s2057_s1 + $0x70] sm:$0xff]   ;;  %vm927_vm5 = vcmask 1045504   ;;  %vm1025_vm6 = vsmask.f32 5376 }
  0x10   : > { %1604 = vmatprep.subr.bf16.mxu1 %v1727_v3  ;;  %v296_v7 = vld [vmem:[%s1869_s12] sm:$0xf]  ;;  %v1876_v8 = vld [vmem:[%s1869_s12 + $0x4] sm:$0xf]  ;;  %v1879_v9 = vld [vmem:[%s1869_s12 + $0x8] sm:$0xf] }
  0x11   : > { %v307_v11 = vld [vmem:[%s1869_s12 + $0xc] sm:$0x1]  ;;  %v1399_v12 = vcombine.low %v296_v7, %v1876_v8  ;;  %v1407_v23 = vcombine.low %v1879_v9, %v1879_v9  ;;  %v500_v28 = vld [vmem:[%s1869_s12] sm:$0xe]  ;;  %v1744_v46 = vld [vmem:[%s2057_s1 + $0x98] sm:$0xff]   ;;  %v1468_v60 = vcombine.low %v1876_v8, %v1879_v9  ;;  %s1699_s11 = smul.u32 12, %s2067_s18 }
  0x12   : > { %1593 = vmatpush3.bf16.msra.mxu0 %v1726_v2  ;;  %v1887_v13 = vcombine.low %v1879_v9, %v307_v11  ;;  %v1422_v29 = vcombine.low %v500_v28, %v1876_v8  ;;  %v598_v31 = vld [vmem:[%s1869_s12] sm:$0x8]  ;;  %v599_v32 = vld [vmem:[%s1869_s12 + $0xc] sm:$0x7]  ;;  %v1747_v51 = vld [vmem:[%s2057_s1 + $0xb8] sm:$0xff]   ;;  %vm1266_vm7 = vcmask 519168  }
  0x13   : > { %1605 = vmatpush3.bf16.msra.mxu1 %v1727_v3  ;;  %1594 = vmatprep.subr.bf16.mxu0 %v1728_v4  ;;  %v329_v14 = vshrl.u32 %v1399_v12, 16  ;;  %v331_v15 = vshll.u32 %v1399_v12, 16  ;;  %v1739_v33 = vld [vmem:[%s2057_s1 + $0x48] sm:$0xff]   ;;  %v1437_v34 = vcombine.low %v598_v31, %v1876_v8  ;;  %v1438_v35 = vcombine.low %v1879_v9, %v599_v32  ;;  %v1741_v42 = vld [vmem:[%s2057_s1 + $0x40] sm:$0xff]   ;;  %v1748_v54 = vld [vmem:[%s2057_s1 + $0x90] sm:$0xff]   ;;  %s285_s15 = scalar_lea.vmem %s2060_s4, %s1699_s11  ;;  %s294_s26 = scalar_lea.vmem %s2061_s5, %s1699_s11 }
  0x14   : > { %1606 = vmatprep.subr.bf16.mxu1 %v1729_v5  ;;  %1610 = vmatprep.mubr.msk.bf16.mxu1 %vm367_vm0, %v1399_v12  ;;  %v336_v17 = vshll.u32 %v1887_v13, 16  ;;  %v340_v18 = vshrl.u32 %v1887_v13, 16  ;;  %v515_v30 = vrot.slane %v1887_v13, 1  ;;  %v1740_v36 = vld [vmem:[%s2057_s1 + $0x68] sm:$0xff]   ;;  %v514_v37 = vrot.slane %v1422_v29, 1  ;;  %v1742_v45 = vld [vmem:[%s2057_s1 + $0x60] sm:$0xff]  }
  0x15   : > { %v333_v19 = vrot.slane %v331_v15, 1  ;;  %v616_v38 = vrot.slane %v1437_v34, 3  ;;  %v617_v39 = vrot.slane %v1438_v35, 3  ;;  %v715_v41 = vshrl.u32 %v1437_v34, 16  ;;  %v1937_v47 = vld [vmem:[%s1869_s12 + $0xc] sm:$0xf] }
  0x16   : > { %1595 = vmatpush3.bf16.msra.mxu0 %v1728_v4  ;;  %v338_v21 = vrot.slane %v336_v17, 1  ;;  %v516_v40 = vsel %vm513_vm2, %v514_v37, %v515_v30  ;;  %v718_v44 = vshll.u32 %v1437_v34, 16  ;;  %v1453_v50 = vcombine.low %v1879_v9, %v1937_v47  ;;  %v1749_v55 = vld [vmem:[%s2057_s1 + $0xb0] sm:$0xff]   ;;  %v1750_v61 = vld [vmem:[%s2057_s1 + $0x88] sm:$0xff]   ;;  %v904_v62 = vld [vmem:[%s1869_s12 + $0x4] sm:$0xc] }
  0x17   : > { %1607 = vmatpush3.bf16.msra.mxu1 %v1729_v5  ;;  %1596 = vmatprep.subr.bf16.mxu0 %v1730_v6  ;;  %v334_v22 = vor.u32 %v333_v19, %v329_v14  ;;  %v618_v43 = vsel %vm615_vm3, %v616_v38, %v617_v39  ;;  %v717_v48 = vrot.slane %v715_v41, 3  ;;  %v1751_v63 = vld [vmem:[%s2057_s1 + $0xa8] sm:$0xff]   ;;  %v1012_v4 = vld [vmem:[%s1869_s12 + $0x10] sm:$0x7]  ;;  %v1752_v11 = vld [vmem:[%s2057_s1 + $0x80] sm:$0xff]  }
  0x18   : > { %1608 = vmatprep.subr.bf16.mxu1 %v1731_v10  ;;  %v342_v24 = vor.u32 %v340_v18, %v338_v21  ;;  %v720_v49 = vrot.slane %v718_v44, 4  ;;  %v723_v52 = vshrl.u32 %v1453_v50, 16  ;;  %v726_v53 = vshll.u32 %v1453_v50, 16  ;;  %v1962_v1 = vld [vmem:[%s1869_s12 + $0x8] sm:$0xf]  ;;  %v1753_v12 = vld [vmem:[%s2057_s1 + $0xa0] sm:$0xff]  }
  0x19   : > { %v339_v26 = vsel %vm327_vm1, %v334_v22, %v338_v21  ;;  %v906_v2 = vld [vmem:[%s1869_s12 + $0xc] sm:$0xf]  ;;  %v1484_v3 = vcombine.low %v904_v62, %v1962_v1  ;;  %v1755_v18 = vld [vmem:[%s2057_s1 + $0xd8] sm:$0xff]   ;;  %v1124_v31 = vld [vmem:[%s1869_s12 + $0x4] sm:$0x8] }
  0x1a   : > { %1597 = vmatpush3.bf16.msra.mxu0 %v1730_v6  ;;  %1598 = vmatprep.mubr.msk.bf16.mxu0 %vm367_vm0, %v339_v26  ;;  %v721_v56 = vor.u32 %v720_v49, %v717_v48  ;;  %v725_v57 = vrot.slane %v723_v52, 3  ;;  %v728_v58 = vrot.slane %v726_v53, 4  ;;  %v1969_v5 = vcombine.low %v906_v2, %v1012_v4  ;;  %v907_v6 = vld [vmem:[%s1869_s12 + $0x10] sm:$0x3]  ;;  %v1758_v19 = vld [vmem:[%s2057_s1 + $0xf8] sm:$0xff]   ;;  %v1761_v29 = vld [vmem:[%s2057_s1 + $0xc8] sm:$0xff]  }
  0x1b   : > { %1609 = vmatpush3.bf16.msra.mxu1 %v1731_v10  ;;  %1614 = vmatprep.subr.bf16.mxu0 %v1735_v16  ;;  %v1027_v7 = vshrl.u32 %v1484_v3, 16  ;;  %v1030_v8 = vshll.u32 %v1484_v3, 16  ;;  %v1485_v13 = vcombine.low %v906_v2, %v907_v6  ;;  %v928_v21 = vrot.slane %v1484_v3, 2  ;;  %v1760_v26 = vld [vmem:[%s2057_s1 + $0xf0] sm:$0xff]   ;;  %v1763_v32 = vld [vmem:[%s2057_s1 + $0xc0] sm:$0xff]   ;;  %v1768_v35 = vld [vmem:[%s2057_s1 + $0x118] sm:$0xff]  }
  0x1c   : > { %1626 = vmatprep.subr.bf16.mxu1 %v1736_v20  ;;  %v729_v59 = vor.u32 %v728_v58, %v725_v57  ;;  %v1035_v9 = vshrl.u32 %v1969_v5, 16  ;;  %v1038_v10 = vshll.u32 %v1969_v5, 16  ;;  %v1515_v34 = vcombine.low %v1124_v31, %v1962_v1  ;;  %v1769_v38 = vld [vmem:[%s2057_s1 + $0x110] sm:$0xff]   ;;  %v1771_v41 = vld [vmem:[%s2057_s1 + $0x100] sm:$0xff]  }
  0x1d   : > { %1599 = vmatmul.mubr.msk.bf16.vlgmr.msra.gmra.mxu0 %vm367_vm0, %v342_v24  ;;  %v1029_v14 = vrot.slane %v1027_v7, 2  ;;  %v1032_v15 = vrot.slane %v1030_v8, 3  ;;  %v929_v22 = vrot.slane %v1485_v13, 2  ;;  %v1138_v37 = vrot.slane %v1969_v5, 3 }
  0x1e   : > { %1611 = vmatmul.mubr.msk.bf16.vlgmr.msra.gmra.mxu1 %vm367_vm0, %v1407_v23  ;;  %1615 = vmatpush3.bf16.msra.mxu0 %v1735_v16  ;;  %v730_v0 = vsel %vm713_vm4, %v721_v56, %v729_v59  ;;  %v1037_v16 = vrot.slane %v1035_v9, 2  ;;  %v1040_v17 = vrot.slane %v1038_v10, 3 }
  0x1f   : > { %1627 = vmatpush3.bf16.msra.mxu1 %v1736_v20  ;;  %1616 = vmatprep.subr.bf16.mxu0 %v1737_v25  ;;  %v1469_v20 = vcombine.low %v1937_v47, %v1937_v47  ;;  %v1033_v23 = vor.u32 %v1032_v15, %v1029_v14 }
  0x20   : > { %1628 = vmatprep.subr.bf16.mxu1 %v1738_v27  ;;  %1622 = vmatprep.mubr.msk.bf16.mxu0 %vm367_vm0, %v516_v40  ;;  %v1041_v24 = vor.u32 %v1040_v17, %v1037_v16  ;;  %v1770_v40 = vld [vmem:[%s2057_s1 + $0x108] sm:$0xff]  }
  0x21   : > { %1634 = vmatprep.mubr.msk.bf16.mxu1 %vm367_vm0, %v618_v43 }
  0x22   : > { %1617 = vmatpush3.bf16.msra.mxu0 %v1737_v25  ;;  %v1759_v25 = vld [vmem:[%s2057_s1 + $0xd0] sm:$0xff]   ;;  %v1042_v28 = vsel %vm1025_vm6, %v1033_v23, %v1041_v24 }
  0x23   : > { %1629 = vmatpush3.bf16.msra.mxu1 %v1738_v27  ;;  %1618 = vmatprep.subr.bf16.mxu0 %v1739_v33  ;;  %v930_v27 = vsel %vm927_vm5, %v928_v21, %v929_v22 }
  0x24   : > { %1630 = vmatprep.subr.bf16.mxu1 %v1740_v36 }
  0x26   : > { %1619 = vmatpush3.bf16.msra.mxu0 %v1739_v33  ;;  %v1764_v33 = vld [vmem:[%s2057_s1 + $0xe0] sm:$0xff]  }
  0x27   : > { %1631 = vmatpush3.bf16.msra.mxu1 %v1740_v36  ;;  %1620 = vmatprep.subr.bf16.mxu0 %v1741_v42  ;;  %v1137_v36 = vrot.slane %v1515_v34, 3  ;;  %v1523_v34 = vld [vmem:[%s2059_s3] ss:$0 sm:$0xff] }
  0x28   : > { %1632 = vmatprep.subr.bf16.mxu1 %v1742_v45 }
  0x2a   : > { %1621 = vmatpush3.bf16.msra.mxu0 %v1741_v42 }
  0x2b   : > { %1633 = vmatpush3.bf16.msra.mxu1 %v1742_v45  ;;  %1638 = vmatprep.subr.bf16.mxu0 %v1744_v46 }
  0x2c   : > { %1650 = vmatprep.subr.bf16.mxu1 %v1747_v51 }
  0x2d   : > { %1623 = vmatmul.mubr.msk.bf16.vlgmr.msra.gmra.mxu0 %vm367_vm0, %v515_v30  ;;  %v1762_v30 = vld [vmem:[%s2057_s1 + $0xe8] sm:$0xff]  }
  0x2e   : > { %1635 = vmatmul.mubr.msk.bf16.vlgmr.msra.gmra.mxu1 %vm367_vm0, %v617_v39  ;;  %1639 = vmatpush3.bf16.msra.mxu0 %v1744_v46  ;;  %v1139_v39 = vsel %vm615_vm3, %v1137_v36, %v1138_v37  ;;  %v1533_v36 = vld [vmem:[%s285_s15] sm:$0xff]  }
  0x2f   : > { %1651 = vmatpush3.bf16.msra.mxu1 %v1747_v51  ;;  %1640 = vmatprep.subr.bf16.mxu0 %v1748_v54 }
  0x30   : > { %1652 = vmatprep.subr.bf16.mxu1 %v1749_v55  ;;  %1646 = vmatprep.mubr.msk.bf16.mxu0 %vm367_vm0, %v730_v0 }
  0x31   : > { %1658 = vmatprep.mubr.msk.bf16.mxu1 %vm367_vm0, %v1468_v60 }
  0x32   : > { %1641 = vmatpush3.bf16.msra.mxu0 %v1748_v54 }
  0x33   : > { %1653 = vmatpush3.bf16.msra.mxu1 %v1749_v55  ;;  %1642 = vmatprep.subr.bf16.mxu0 %v1750_v61 }
  0x34   : > { %1654 = vmatprep.subr.bf16.mxu1 %v1751_v63 }
  0x36   : > { %1643 = vmatpush3.bf16.msra.mxu0 %v1750_v61 }
  0x37   : > { %1655 = vmatpush3.bf16.msra.mxu1 %v1751_v63  ;;  %1644 = vmatprep.subr.bf16.mxu0 %v1752_v11 }
  0x38   : > { %1656 = vmatprep.subr.bf16.mxu1 %v1753_v12 }
  0x3a   : > { %1645 = vmatpush3.bf16.msra.mxu0 %v1752_v11 }
  0x3b   : > { %1657 = vmatpush3.bf16.msra.mxu1 %v1753_v12  ;;  %1662 = vmatprep.subr.bf16.mxu0 %v1755_v18 }
  0x3c   : > { %1674 = vmatprep.subr.bf16.mxu1 %v1758_v19 }
  0x3d   : > { %1647 = vmatmul.mubr.msk.bf16.vlgmr.msra.gmra.mxu0 %vm367_vm0, %v729_v59 }
  0x3e   : > { %1659 = vmatmul.mubr.msk.bf16.vlgmr.msra.gmra.mxu1 %vm367_vm0, %v1469_v20  ;;  %1663 = vmatpush3.bf16.msra.mxu0 %v1755_v18 }
  0x3f   : > { %1675 = vmatpush3.bf16.msra.mxu1 %v1758_v19  ;;  %1664 = vmatprep.subr.bf16.mxu0 %v1759_v25 }
  0x40   : > { %1676 = vmatprep.subr.bf16.mxu1 %v1760_v26  ;;  %1670 = vmatprep.mubr.msk.bf16.mxu0 %vm367_vm0, %v930_v27 }
  0x41   : > { %1682 = vmatprep.mubr.msk.bf16.mxu1 %vm367_vm0, %v1042_v28  ;;  %v1522_v28 = vld [vmem:[%s2058_s2] ss:$0 sm:$0xff] }
  0x42   : > { %1665 = vmatpush3.bf16.msra.mxu0 %v1759_v25 }
  0x43   : > { %1677 = vmatpush3.bf16.msra.mxu1 %v1760_v26  ;;  %1666 = vmatprep.subr.bf16.mxu0 %v1761_v29 }
  0x44   : > { %1678 = vmatprep.subr.bf16.mxu1 %v1762_v30 }
  0x46   : > { %1667 = vmatpush3.bf16.msra.mxu0 %v1761_v29  ;;  %v1243_v29 = vld [vmem:[%s285_s15 + $0x8] sm:$0xf] }
  0x47   : > { %1679 = vmatpush3.bf16.msra.mxu1 %v1762_v30  ;;  %1668 = vmatprep.subr.bf16.mxu0 %v1763_v32 }
  0x48   : > { %1680 = vmatprep.subr.bf16.mxu1 %v1764_v33 }
  0x4a   : > { %1669 = vmatpush3.bf16.msra.mxu0 %v1763_v32 }
  0x4b   : > { %1681 = vmatpush3.bf16.msra.mxu1 %v1764_v33  ;;  %1686 = vmatprep.subr.bf16.mxu0 %v1768_v35 }
  0x4d   : > { %1671 = vmatmul.mubr.msk.bf16.vlgmr.msra.gmra.mxu0 %vm367_vm0, %v929_v22 }
  0x4e   : > { %1683 = vmatmul.mubr.msk.bf16.vlgmr.msra.gmra.mxu1 %vm367_vm0, %v1041_v24  ;;  %1687 = vmatpush3.bf16.msra.mxu0 %v1768_v35 }
  0x4f   : > { %1694 = vmatprep.mubr.msk.bf16.mxu0 %vm367_vm0, %v1139_v39  ;;  %1688 = vmatprep.subr.bf16.mxu0 %v1769_v38 }
  0x52   : > { %1689 = vmatpush3.bf16.msra.mxu0 %v1769_v38  ;;  %v1246_v38 = vunpack.c.l.bf16 %v1243_v29 }
  0x53   : > { %1690 = vmatprep.subr.bf16.mxu0 %v1770_v40 }
  0x56   : > { %1691 = vmatpush3.bf16.msra.mxu0 %v1770_v40 }
  0x57   : > { %1692 = vmatprep.subr.bf16.mxu0 %v1771_v41 }
  0x5a   : > { %1693 = vmatpush3.bf16.msra.mxu0 %v1771_v41 }
  0x5d   : > { %1695 = vmatmul.mubr.msk.bf16.vlgmr.msra.gmra.mxu0 %vm367_vm0, %v1138_v37 }
  0xdd   : > { %v1600_v42 = vpop.f32.mrf.mxu0 }
  0xde   : > { %v1612_v43 = vpop.f32.mrf.mxu1 }
  0xdf   : > { %v408_v44 = vpop.f32.mrf.mxu0  ;;  %v495_v0 = vadd.f32 %v1612_v43, %v1600_v42 }
  0xe0   : > { %v486_v45 = vpop.f32.mrf.mxu1 }
  0xe1   : > { %v1601_v46 = vpop.f32.mrf.mxu0  ;;  %v487_v3 = vadd.f32 %v486_v45, %v408_v44  ;;  %v1534_v44 = vunpack.c.l.bf16 %v1533_v36 }
  0xe2   : > { %v1613_v47 = vpop.f32.mrf.mxu1 }
  0xe3   : > { %v411_v48 = vpop.f32.mrf.mxu0 }
  0xe4   : > { %v489_v49 = vpop.f32.mrf.mxu1 }
  0xe5   : > { %v490_v10 = vadd.f32 %v489_v49, %v411_v48 }
  0xed   : > { %v1624_v50 = vpop.f32.mrf.mxu0 }
  0xee   : > { %v1636_v51 = vpop.f32.mrf.mxu1  ;;  %v597_v4 = vadd.f32 %v1624_v50, %v495_v0 }
  0xef   : > { %v581_v52 = vpop.f32.mrf.mxu0 }
  0xf0   : > { %v683_v53 = vpop.f32.mrf.mxu1  ;;  %v595_v7 = vadd.f32 %v581_v52, %v487_v3  ;;  %v699_v11 = vadd.f32 %v1636_v51, %v597_v4  ;;  %v1535_v52 = vunpack.c.h.bf16 %v1533_v36 }
  0xf1   : > { %v1625_v54 = vpop.f32.mrf.mxu0 }
  0xf2   : > { %v1637_v55 = vpop.f32.mrf.mxu1  ;;  %v697_v14 = vadd.f32 %v683_v53, %v595_v7 }
  0xf3   : > { %v584_v56 = vpop.f32.mrf.mxu0 }
  0xf4   : > { %v686_v57 = vpop.f32.mrf.mxu1  ;;  %v596_v15 = vadd.f32 %v584_v56, %v490_v10 }
  0xf6   : > { %v698_v18 = vadd.f32 %v686_v57, %v596_v15 }
  0xfd   : > { %v1648_v58 = vpop.f32.mrf.mxu0 }
  0xfe   : > { %v1660_v59 = vpop.f32.mrf.mxu1  ;;  %v811_v16 = vadd.f32 %v1648_v58, %v699_v11 }
  0xff   : > { %v795_v60 = vpop.f32.mrf.mxu0 }
 0x100   : > { %v887_v61 = vpop.f32.mrf.mxu1  ;;  %v809_v17 = vadd.f32 %v795_v60, %v697_v14  ;;  %v903_v19 = vadd.f32 %v1660_v59, %v811_v16 }
 0x101   : > { %v1649_v62 = vpop.f32.mrf.mxu0 }
 0x102   : > { %v1661_v63 = vpop.f32.mrf.mxu1  ;;  %v901_v20 = vadd.f32 %v887_v61, %v809_v17 }
 0x103   : > { %v798_v1 = vpop.f32.mrf.mxu0 }
 0x104   : > { %v890_v2 = vpop.f32.mrf.mxu1  ;;  %v810_v21 = vadd.f32 %v798_v1, %v698_v18 }
 0x106   : > { %v902_v25 = vadd.f32 %v890_v2, %v810_v21 }
 0x10d   : > { %v1672_v5 = vpop.f32.mrf.mxu0 }
 0x10e   : > { %v1684_v6 = vpop.f32.mrf.mxu1  ;;  %v1011_v22 = vadd.f32 %v1672_v5, %v903_v19 }
 0x10f   : > { %v995_v8 = vpop.f32.mrf.mxu0 }
 0x110   : > { %v1107_v9 = vpop.f32.mrf.mxu1  ;;  %v1009_v23 = vadd.f32 %v995_v8, %v901_v20  ;;  %v1123_v26 = vadd.f32 %v1684_v6, %v1011_v22 }
 0x111   : > { %v1673_v12 = vpop.f32.mrf.mxu0 }
 0x112   : > { %v1685_v13 = vpop.f32.mrf.mxu1  ;;  %v1121_v30 = vadd.f32 %v1107_v9, %v1009_v23 }
 0x113   : > { %v998_v24 = vpop.f32.mrf.mxu0 }
 0x114   : > { %v1010_v31 = vadd.f32 %v998_v24, %v902_v25  ;;  %v1110_v33 = vpop.f32.mrf.mxu1 }
 0x116   : > { %v1122_v41 = vadd.f32 %v1110_v33, %v1010_v31 }
 0x11d   : > { %v1696_v27 = vpop.f32.mrf.mxu0 }
 0x11e   : > { %v1220_v32 = vadd.f32 %v1696_v27, %v1123_v26 }
 0x11f   : > { %v1204_v35 = vpop.f32.mrf.mxu0 }
 0x120   : > { %v1230_v37 = vmul.f32 %v1522_v28, %v1220_v32  ;;  %v1218_v39 = vadd.f32 %v1204_v35, %v1121_v30 }
 0x121   : > { %v1697_v40 = vpop.f32.mrf.mxu0 }
 0x122   : > { %v1240_v42 = vadd.f32 %v1523_v34, %v1230_v37  ;;  %v1228_v43 = vmul.f32 %v1522_v28, %v1218_v39 }
 0x123   : > { %v1207_v45 = vpop.f32.mrf.mxu0 }
 0x124   : > { %v1249_v46 = vadd.f32 %v1246_v38, %v1240_v42  ;;  %v1238_v47 = vadd.f32 %v1523_v34, %v1228_v43  ;;  %v1219_v48 = vadd.f32 %v1207_v45, %v1122_v41 }
 0x126   : > { %v1252_v49 = vmax.f32 %v1249_v46, 0.0  ;;  %v1247_v50 = vadd.f32 %v1534_v44, %v1238_v47  ;;  %v1229_v51 = vmul.f32 %v1522_v28, %v1219_v48 }
 0x128   : > { %v1531_v53 = vpack.c.bf16 %v1252_v49, %v1252_v49  ;;  %v1250_v54 = vmax.f32 %v1247_v50, 0.0  ;;  %v1239_v55 = vadd.f32 %v1523_v34, %v1229_v51 }
 0x12a   : > { %1269 = vst.msk [vmem:[%s294_s26 + $0x8] sm:$0xf] %vm1266_vm7, %v1531_v53  ;;  %v1529_v56 = vpack.c.bf16 %v1250_v54, %v1250_v54  ;;  %v1248_v57 = vadd.f32 %v1535_v52, %v1239_v55 }
 0x12c   : > { %1267 = vst.msk [vmem:[%s294_s26] sm:$0xf] %vm1266_vm7, %v1529_v56  ;;  %v1251_v58 = vmax.f32 %v1248_v57, 0.0 }
 0x12e   : > { %v1530_v59 = vpack.c.bf16 %v1251_v58, %v1251_v58 }
 0x130   : > { %1268 = vst.msk [vmem:[%s294_s26 + $0x4] sm:$0xf] %vm1266_vm7, %v1530_v59 }
 0x131 PF: > { %s15_s20 = sadd.s32 1, %s1795_s20   ;;  %s2062_s18 = smov %s1791_s19 }
 0x132   : > { %p12_p5 = scmp.ge.s32.totalorder %s15_s20, 4   ;;  %s2063_s19 = smov %s2065_s21 }
 0x134   :  { %14 = sbr.rel (!%p12_p5) target bundleno = 2 (0x2), region = 81 }

</bundles_post_ra>
